<compile_context>
chip_gen: v7x
topology: tpu7x:2x2x1
jax: 0.10.0
libtpu: 0.0.40
codegen_flags: <defaults>
</compile_context>

<pallas_src>
import math
import numpy as np
import jax
import jax.numpy as jnp
from jax.experimental import pallas as pl
from jax.experimental.pallas import tpu as pltpu

# ----------------------------------------------------------------------------
# Canvas geometry
# ----------------------------------------------------------------------------
H_IMG = W_IMG = 14            # input spatial size implied by fc1 = 16*6*6
HP_A = WP_A = 16              # stage-A canvas: 14x14 interior + zero ring
HP_B = WP_B = 8               # stage-B canvas:  6x6 interior + zero ring
PAS = HP_A * WP_A             # 256 canvas-A pixels / sample
PBS = HP_B * WP_B             # 64  canvas-B pixels / sample
NB = 2                        # samples per grid block (stage-B slab -> 128 lanes)
PA = NB * PAS                 # 512
PB = NB * PBS                 # 128
MA = 128                      # stage-A lane margin (128-aligned interior writes)
MB = 128                      # stage-B lane margin
WA = MA + PA + MA             # 768
WB = MB + PB + MB             # 384

# flat-canvas lane shifts of the 9 taps of a 3x3 conv
_SAME_A = [(dh - 1) * WP_A + (dw - 1) for dh in range(3) for dw in range(3)]
_VALID_A = [dh * WP_A + dw for dh in range(3) for dw in range(3)]
_SAME_B = [(dh - 1) * WP_B + (dw - 1) for dh in range(3) for dw in range(3)]


# ----------------------------------------------------------------------------
# Fused kernel (one grid step = one block of NB samples)
# ----------------------------------------------------------------------------
def _deepnet_res_kernel(
    xin_ref, pool_sel_ref, mask_ref,
    w1_ref, w2_ref, w3_ref, w4_ref, w5_ref, w6_ref,
    fc1t_ref, pack_ref,
    out_ref,
    bufx, buf1, buf2, patcha, bufp, bufq, bufd, patchb,
):
    f32 = jnp.float32

    # --- zero only the read margins; interiors are fully overwritten ---------
    for buf in (bufx, buf1, buf2, bufp, bufq, bufd):
        rows, width = buf.shape
        buf[:, 0:128] = jnp.zeros((rows, 128), f32)
        buf[:, width - 128:width] = jnp.zeros((rows, 128), f32)

    # --- lay the (already zero-ring-padded) input onto the stage-A canvas ----
    bufx[:, MA:MA + PA] = xin_ref[...]

    # --- conv1 (2->8, pad=1) + ReLU : tiny Cin, keep it on the VPU -----------
    acc = pack_ref[0:8, 0:1]                                    # conv1 bias (8,1)
    for idx, s in enumerate(_SAME_A):
        sl = bufx[:, MA + s:MA + s + PA]                        # (2, PA)
        wk = w1_ref[:, 2 * idx:2 * idx + 2]                     # (8, 2)
        acc = acc + wk[:, 0:1] * sl[0:1, :] + wk[:, 1:2] * sl[1:2, :]
    buf1[:, MA:MA + PA] = jnp.maximum(acc, 0.0)

    # --- conv2 (8->16, valid) as ONE im2col matmul, + ReLU + BN1 -------------
    for idx, s in enumerate(_VALID_A):
        patcha[8 * idx:8 * idx + 8, :] = buf1[:, MA + s:MA + s + PA]
    h2 = jnp.dot(w2_ref[...], patcha[...], preferred_element_type=f32) \
        + pack_ref[0:16, 1:2]
    h2 = jnp.maximum(h2, 0.0) * pack_ref[0:16, 2:3] + pack_ref[0:16, 3:4]
    buf2[:, MA:MA + PA] = h2

    # --- max-pool 2x2/2 + sample-local re-canvas (0/1 selection matmul) ------
    mx = jnp.maximum(
        jnp.maximum(buf2[:, MA:MA + PA], buf2[:, MA + 1:MA + 1 + PA]),
        jnp.maximum(buf2[:, MA + WP_A:MA + WP_A + PA],
                    buf2[:, MA + WP_A + 1:MA + WP_A + 1 + PA]))
    sel = pool_sel_ref[...]                                     # (256, 64)
    x1 = jnp.concatenate(
        [jnp.dot(mx[:, n * PAS:(n + 1) * PAS], sel, preferred_element_type=f32)
         for n in range(NB)], axis=1)                           # (16, PB)
    bufp[:, MB:MB + PB] = x1                                    # pad ring exact 0

    mask = mask_ref[...]                                        # (1, PB)

    def conv_b(src, w_ref):
        """3x3 SAME conv on a stage-B canvas: im2col slab + one bf16 MXU matmul."""
        for idx, s in enumerate(_SAME_B):
            patchb[16 * idx:16 * idx + 16, :] = (
                src[:, MB + s:MB + s + PB].astype(jnp.bfloat16))
        return jnp.dot(w_ref[...], patchb[...], preferred_element_type=f32)

    # --- residual block 1: conv3 -> ReLU -> conv4 -> ReLU -> BN2, + x1 -------
    h3 = jnp.maximum(conv_b(bufp, w3_ref) + pack_ref[0:16, 4:5], 0.0)
    bufq[:, MB:MB + PB] = h3 * mask
    h4 = jnp.maximum(conv_b(bufq, w4_ref) + pack_ref[0:16, 5:6], 0.0)
    x2 = (bufp[:, MB:MB + PB] + h4 * pack_ref[0:16, 6:7] + pack_ref[0:16, 7:8]) * mask
    bufd[:, MB:MB + PB] = x2

    # --- residual block 2: conv5 -> ReLU -> conv6 -> ReLU -> BN3, + x2 -------
    h5 = jnp.maximum(conv_b(bufd, w5_ref) + pack_ref[0:16, 8:9], 0.0)
    bufq[:, MB:MB + PB] = h5 * mask
    h6 = jnp.maximum(conv_b(bufq, w6_ref) + pack_ref[0:16, 9:10], 0.0)
    x3 = bufd[:, MB:MB + PB] + h6 * pack_ref[0:16, 10:11] + pack_ref[0:16, 11:12]

    # --- flatten + fc1 with NO per-row copies: 16 broadcast-FMAs against
    #     per-channel fc1 weight tiles (zero at pad pixels), then per-sample
    #     lane reductions.
    t = fc1t_ref[0] * x3[0:1, :]
    for c in range(1, 16):
        t = t + fc1t_ref[c] * x3[c:c + 1, :]                    # (64, PB)
    h = jnp.concatenate(
        [jnp.sum(t[:, n * PBS:(n + 1) * PBS], axis=1, keepdims=True)
         for n in range(NB)], axis=1)                           # (64, NB)
    h = jnp.maximum(h + pack_ref[:, 12:13], 0.0)
    # TODO(synk): F.dropout(p=0.3, training=self.training) is an identity in eval mode.

    # --- fc2 (64 -> 2); logits are produced transposed as (2, NB) ------------
    o0 = jnp.sum(h * pack_ref[:, 13:14], axis=0, keepdims=True)
    o1 = jnp.sum(h * pack_ref[:, 14:15], axis=0, keepdims=True)
    out_ref[0] = jnp.concatenate([o0, o1], axis=0) + pack_ref[0:2, 15:16]


def _build_call(nblk):
    const2 = lambda i: (0, 0)
    const3 = lambda i: (0, 0, 0)
    return pl.pallas_call(
        _deepnet_res_kernel,
        out_shape=jax.ShapeDtypeStruct((nblk, 2, NB), jnp.float32),
        grid_spec=pltpu.PrefetchScalarGridSpec(
            num_scalar_prefetch=0,
            grid=(nblk,),
            in_specs=[
                pl.BlockSpec((2, PA), lambda i: (0, i)),      # input canvas block
                pl.BlockSpec((PAS, PBS), const2),             # sample-local pool selection
                pl.BlockSpec((1, PB), const2),                # canvas-B valid-pixel mask
                pl.BlockSpec((8, 18), const2),                # conv1 weight (f32)
                pl.BlockSpec((16, 72), const2),               # conv2 weight (f32)
                pl.BlockSpec((16, 144), const2),              # conv3 weight (bf16)
                pl.BlockSpec((16, 144), const2),              # conv4 weight (bf16)
                pl.BlockSpec((16, 144), const2),              # conv5 weight (bf16)
                pl.BlockSpec((16, 144), const2),              # conv6 weight (bf16)
                pl.BlockSpec((16, 64, PB), const3),           # fc1 per-channel tiles
                pl.BlockSpec((64, 16), const2),               # packed biases/BN/fc2
            ],
            out_specs=pl.BlockSpec((1, 2, NB), lambda i: (i, 0, 0)),
            scratch_shapes=[
                pltpu.VMEM((2, WA), jnp.float32),     # input canvas
                pltpu.VMEM((8, WA), jnp.float32),     # conv1 canvas
                pltpu.VMEM((16, WA), jnp.float32),    # conv2/bn1 canvas
                pltpu.VMEM((72, PA), jnp.float32),    # stage-A im2col slab
                pltpu.VMEM((16, WB), jnp.float32),    # x1 canvas
                pltpu.VMEM((16, WB), jnp.float32),    # conv3/conv5 canvas (reused)
                pltpu.VMEM((16, WB), jnp.float32),    # x2 canvas
                pltpu.VMEM((144, PB), jnp.bfloat16),  # stage-B im2col slab (MXU operand)
            ],
        ),
        compiler_params=pltpu.CompilerParams(
            dimension_semantics=("parallel",),   # blocks independent -> 2 TCs on v7x
            vmem_limit_bytes=32 * 1024 * 1024,   # per-step footprint ~1 MB, safe on 64 MiB v7x
        ),
    )


# ----------------------------------------------------------------------------
# Forward wrapper
# ----------------------------------------------------------------------------
@jax.jit
def deepnet_res_forward(x, prep):
    """x: (N, 2, 14, 14) float32 NCHW -> logits (N, 2)."""
    N = x.shape[0]
    n_pad = ((N + NB - 1) // NB) * NB
    # TODO(synk): this pad/transpose is the one remaining XLA-side pass over the
    # input; fold it into the kernel (per-row canvas stores / BlockSpec) only if
    # the input DMA ever becomes visible at much larger batches.
    xp = jnp.pad(x, ((0, n_pad - N), (0, 0), (1, 1), (1, 1)))
    xin = xp.transpose(1, 0, 2, 3).reshape(2, n_pad * PAS)
    nblk = n_pad // NB
    out_t = _build_call(nblk)(
        xin, prep["pool_sel"], prep["mask_b"],
        prep["w1"], prep["w2"], prep["w3"], prep["w4"], prep["w5"], prep["w6"],
        prep["fc1t"], prep["pack"])
    return out_t.transpose(0, 2, 1).reshape(n_pad, 2)[:N]


# ----------------------------------------------------------------------------
# Parameter init (PyTorch-default style) and one-time kernel-layout prep
# ----------------------------------------------------------------------------
def init_params(key):
    ks = jax.random.split(key, 16)

    def u(k, shape, fan_in):
        bound = 1.0 / math.sqrt(fan_in)
        return jax.random.uniform(k, shape, jnp.float32, -bound, bound)

    p = {}
    p["conv1_w"], p["conv1_b"] = u(ks[0], (8, 2, 3, 3), 2 * 9), u(ks[1], (8,), 2 * 9)
    p["conv2_w"], p["conv2_b"] = u(ks[2], (16, 8, 3, 3), 8 * 9), u(ks[3], (16,), 8 * 9)
    p["conv3_w"], p["conv3_b"] = u(ks[4], (16, 16, 3, 3), 16 * 9), u(ks[5], (16,), 16 * 9)
    p["conv4_w"], p["conv4_b"] = u(ks[6], (16, 16, 3, 3), 16 * 9), u(ks[7], (16,), 16 * 9)
    p["conv5_w"], p["conv5_b"] = u(ks[8], (16, 16, 3, 3), 16 * 9), u(ks[9], (16,), 16 * 9)
    p["conv6_w"], p["conv6_b"] = u(ks[10], (16, 16, 3, 3), 16 * 9), u(ks[11], (16,), 16 * 9)
    p["fc1_w"], p["fc1_b"] = u(ks[12], (64, 576), 576), u(ks[13], (64,), 576)
    p["fc2_w"], p["fc2_b"] = u(ks[14], (2, 64), 64), u(ks[15], (2,), 64)
    for i in (1, 2, 3):  # BatchNorm2d(16) defaults
        p[f"bn{i}_gamma"] = jnp.ones((16,), jnp.float32)
        p[f"bn{i}_beta"] = jnp.zeros((16,), jnp.float32)
        p[f"bn{i}_mean"] = jnp.zeros((16,), jnp.float32)
        p[f"bn{i}_var"] = jnp.ones((16,), jnp.float32)
    return p


def prepare_params(params):
    """One-time re-layout of PyTorch-style parameters into kernel-ready arrays."""
    f32 = np.float32

    def conv_mat(w):  # (Cout, Cin, 3, 3) -> (Cout, 9*Cin), col = tap*Cin + ci
        w = np.asarray(w, f32)
        co, ci = w.shape[0], w.shape[1]
        return w.transpose(0, 2, 3, 1).reshape(co, 9 * ci)

    def bn_affine(g, b, mean, var, eps=1e-5):
        g, b = np.asarray(g, f32), np.asarray(b, f32)
        mean, var = np.asarray(mean, f32), np.asarray(var, f32)
        s = g / np.sqrt(var + eps)
        return s, b - mean * s

    prep = {}
    prep["w1"] = jnp.asarray(conv_mat(params["conv1_w"]))                 # f32 (VPU)
    prep["w2"] = jnp.asarray(conv_mat(params["conv2_w"]))                 # f32 (8-row tiles)
    for i in (3, 4, 5, 6):
        prep[f"w{i}"] = jnp.asarray(conv_mat(params[f"conv{i}_w"]), jnp.bfloat16)

    # sample-local 0/1 pool selection (256 canvas-A lanes -> 64 canvas-B lanes)
    sel = np.zeros((PAS, PBS), f32)
    msk = np.zeros((1, PB), f32)
    for io in range(6):
        for jo in range(6):
            p_a = (1 + 2 * io) * WP_A + (1 + 2 * jo)
            p_b = (io + 1) * WP_B + (jo + 1)
            sel[p_a, p_b] = 1.0
            for n in range(NB):
                msk[0, n * PBS + p_b] = 1.0
    prep["pool_sel"] = jnp.asarray(sel)
    prep["mask_b"] = jnp.asarray(msk)

    # fc1 weights as per-channel (64, PB) tiles in canvas-B lane order (zero at
    # pad pixels, replicated per sample segment): flatten needs no data movement.
    fc1_w = np.asarray(params["fc1_w"], f32)            # (64, 576), (c,h,w) order
    tiles = np.zeros((16, 64, PB), f32)
    for c in range(16):
        for h in range(6):
            for w in range(6):
                p_b = (h + 1) * WP_B + (w + 1)
                col = fc1_w[:, c * 36 + h * 6 + w]
                for n in range(NB):
                    tiles[c, :, n * PBS + p_b] = col
    prep["fc1t"] = jnp.asarray(tiles)

    # all tiny parameters packed into one (64, 16) array: one DMA, one VMEM tile
    bn1s, bn1t = bn_affine(params["bn1_gamma"], params["bn1_beta"],
                           params["bn1_mean"], params["bn1_var"])
    bn2s, bn2t = bn_affine(params["bn2_gamma"], params["bn2_beta"],
                           params["bn2_mean"], params["bn2_var"])
    bn3s, bn3t = bn_affine(params["bn3_gamma"], params["bn3_beta"],
                           params["bn3_mean"], params["bn3_var"])
    pack = np.zeros((64, 16), f32)
    pack[0:8, 0] = np.asarray(params["conv1_b"], f32)
    pack[0:16, 1] = np.asarray(params["conv2_b"], f32)
    pack[0:16, 2], pack[0:16, 3] = bn1s, bn1t
    pack[0:16, 4] = np.asarray(params["conv3_b"], f32)
    pack[0:16, 5] = np.asarray(params["conv4_b"], f32)
    pack[0:16, 6], pack[0:16, 7] = bn2s, bn2t
    pack[0:16, 8] = np.asarray(params["conv5_b"], f32)
    pack[0:16, 9] = np.asarray(params["conv6_b"], f32)
    pack[0:16, 10], pack[0:16, 11] = bn3s, bn3t
    pack[:, 12] = np.asarray(params["fc1_b"], f32)
    fc2_w = np.asarray(params["fc2_w"], f32)            # (2, 64)
    pack[:, 13] = fc2_w[0, :]
    pack[:, 14] = fc2_w[1, :]
    pack[0:2, 15] = np.asarray(params["fc2_b"], f32)
    prep["pack"] = jnp.asarray(pack)
    return prep


# ----------------------------------------------------------------------------
if __name__ == "__main__":
    key = jax.random.PRNGKey(0)
    k_x, k_p = jax.random.split(key)

    # fc1 = 16*6*6 implies: 14 -(conv1,pad1)-> 14 -(conv2,valid)-> 12 -(pool)-> 6
    x = jax.random.normal(k_x, (2, 2, H_IMG, W_IMG), dtype=jnp.float32)   # NCHW
    params = init_params(k_p)
    prep = prepare_params(params)

    logits = deepnet_res_forward(x, prep)
    jax.block_until_ready(logits)
    assert logits.shape == (2, 2) and logits.dtype == jnp.float32
    print("KERNEL_OK")
</pallas_src>

<mosaic_0001>
module attributes {stable_mosaic.version = 11 : i64} {
  func.func @_deepnet_res_kernel(%arg0: i32, %arg1: memref<2x512xf32, #tpu.memory_space<vmem>>, %arg2: memref<256x64xf32, #tpu.memory_space<vmem>>, %arg3: memref<1x128xf32, #tpu.memory_space<vmem>>, %arg4: memref<8x18xf32, #tpu.memory_space<vmem>>, %arg5: memref<16x72xf32, #tpu.memory_space<vmem>>, %arg6: memref<16x144xbf16, #tpu.memory_space<vmem>>, %arg7: memref<16x144xbf16, #tpu.memory_space<vmem>>, %arg8: memref<16x144xbf16, #tpu.memory_space<vmem>>, %arg9: memref<16x144xbf16, #tpu.memory_space<vmem>>, %arg10: memref<16x64x128xf32, #tpu.memory_space<vmem>>, %arg11: memref<64x16xf32, #tpu.memory_space<vmem>>, %arg12: memref<1x2x2xf32, #tpu.memory_space<vmem>>, %arg13: memref<2x768xf32, #tpu.memory_space<vmem>>, %arg14: memref<8x768xf32, #tpu.memory_space<vmem>>, %arg15: memref<16x768xf32, #tpu.memory_space<vmem>>, %arg16: memref<72x512xf32, #tpu.memory_space<vmem>>, %arg17: memref<16x384xf32, #tpu.memory_space<vmem>>, %arg18: memref<16x384xf32, #tpu.memory_space<vmem>>, %arg19: memref<16x384xf32, #tpu.memory_space<vmem>>, %arg20: memref<144x128xbf16, #tpu.memory_space<vmem>>) attributes {dimension_semantics = [#tpu.dimension_semantics<parallel>], iteration_bounds = array<i64: 1>, scalar_prefetch = 0 : i64, scratch_operands = 8 : i64, tpu.core_type = #tpu.core_type<tc>, window_params = [{transform_indices = @transform_0, window_bounds = array<i64: 2, 512>}, {pipeline_mode = #tpu.pipeline_mode<synchronous>, transform_indices = @transform_1, window_bounds = array<i64: 256, 64>}, {pipeline_mode = #tpu.pipeline_mode<synchronous>, transform_indices = @transform_2, window_bounds = array<i64: 1, 128>}, {pipeline_mode = #tpu.pipeline_mode<synchronous>, transform_indices = @transform_3, window_bounds = array<i64: 8, 18>}, {pipeline_mode = #tpu.pipeline_mode<synchronous>, transform_indices = @transform_4, window_bounds = array<i64: 16, 72>}, {pipeline_mode = #tpu.pipeline_mode<synchronous>, transform_indices = @transform_5, window_bounds = array<i64: 16, 144>}, {pipeline_mode = #tpu.pipeline_mode<synchronous>, transform_indices = @transform_6, window_bounds = array<i64: 16, 144>}, {pipeline_mode = #tpu.pipeline_mode<synchronous>, transform_indices = @transform_7, window_bounds = array<i64: 16, 144>}, {pipeline_mode = #tpu.pipeline_mode<synchronous>, transform_indices = @transform_8, window_bounds = array<i64: 16, 144>}, {pipeline_mode = #tpu.pipeline_mode<synchronous>, transform_indices = @transform_9, window_bounds = array<i64: 16, 64, 128>}, {pipeline_mode = #tpu.pipeline_mode<synchronous>, transform_indices = @transform_10, window_bounds = array<i64: 64, 16>}, {transform_indices = @transform_11, window_bounds = array<i64: 1, 2, 2>}]} {
    %cst = arith.constant 0.000000e+00 : f32
    %0 = vector.broadcast %cst : f32 to vector<2x128xf32>
    %c0 = arith.constant 0 : index
    %c0_0 = arith.constant 0 : index
    %1 = vector.load %arg13[%c0, %c0_0] : memref<2x768xf32, #tpu.memory_space<vmem>>, vector<2x128xf32>
    tpu.vector_store %arg13[%c0, %c0_0], %0 {strides = array<i32>} : memref<2x768xf32, #tpu.memory_space<vmem>>, vector<2x128xf32>,
    %cst_1 = arith.constant 0.000000e+00 : f32
    %2 = vector.broadcast %cst_1 : f32 to vector<2x128xf32>
    %c0_2 = arith.constant 0 : index
    %c640 = arith.constant 640 : index
    %3 = vector.load %arg13[%c0_2, %c640] : memref<2x768xf32, #tpu.memory_space<vmem>>, vector<2x128xf32>
    tpu.vector_store %arg13[%c0_2, %c640], %2 {strides = array<i32>} : memref<2x768xf32, #tpu.memory_space<vmem>>, vector<2x128xf32>,
    %cst_3 = arith.constant 0.000000e+00 : f32
    %4 = vector.broadcast %cst_3 : f32 to vector<8x128xf32>
    %c0_4 = arith.constant 0 : index
    %c0_5 = arith.constant 0 : index
    %5 = vector.load %arg14[%c0_4, %c0_5] : memref<8x768xf32, #tpu.memory_space<vmem>>, vector<8x128xf32>
    tpu.vector_store %arg14[%c0_4, %c0_5], %4 {strides = array<i32>} : memref<8x768xf32, #tpu.memory_space<vmem>>, vector<8x128xf32>,
    %cst_6 = arith.constant 0.000000e+00 : f32
    %6 = vector.broadcast %cst_6 : f32 to vector<8x128xf32>
    %c0_7 = arith.constant 0 : index
    %c640_8 = arith.constant 640 : index
    %7 = vector.load %arg14[%c0_7, %c640_8] : memref<8x768xf32, #tpu.memory_space<vmem>>, vector<8x128xf32>
    tpu.vector_store %arg14[%c0_7, %c640_8], %6 {strides = array<i32>} : memref<8x768xf32, #tpu.memory_space<vmem>>, vector<8x128xf32>,
    %cst_9 = arith.constant 0.000000e+00 : f32
    %8 = vector.broadcast %cst_9 : f32 to vector<16x128xf32>
    %c0_10 = arith.constant 0 : index
    %c0_11 = arith.constant 0 : index
    %9 = vector.load %arg15[%c0_10, %c0_11] : memref<16x768xf32, #tpu.memory_space<vmem>>, vector<16x128xf32>
    tpu.vector_store %arg15[%c0_10, %c0_11], %8 {strides = array<i32>} : memref<16x768xf32, #tpu.memory_space<vmem>>, vector<16x128xf32>,
    %cst_12 = arith.constant 0.000000e+00 : f32
    %10 = vector.broadcast %cst_12 : f32 to vector<16x128xf32>
    %c0_13 = arith.constant 0 : index
    %c640_14 = arith.constant 640 : index
    %11 = vector.load %arg15[%c0_13, %c640_14] : memref<16x768xf32, #tpu.memory_space<vmem>>, vector<16x128xf32>
    tpu.vector_store %arg15[%c0_13, %c640_14], %10 {strides = array<i32>} : memref<16x768xf32, #tpu.memory_space<vmem>>, vector<16x128xf32>,
    %cst_15 = arith.constant 0.000000e+00 : f32
    %12 = vector.broadcast %cst_15 : f32 to vector<16x128xf32>
    %c0_16 = arith.constant 0 : index
    %c0_17 = arith.constant 0 : index
    %13 = vector.load %arg17[%c0_16, %c0_17] : memref<16x384xf32, #tpu.memory_space<vmem>>, vector<16x128xf32>
    tpu.vector_store %arg17[%c0_16, %c0_17], %12 {strides = array<i32>} : memref<16x384xf32, #tpu.memory_space<vmem>>, vector<16x128xf32>,
    %cst_18 = arith.constant 0.000000e+00 : f32
    %14 = vector.broadcast %cst_18 : f32 to vector<16x128xf32>
    %c0_19 = arith.constant 0 : index
    %c256 = arith.constant 256 : index
    %15 = vector.load %arg17[%c0_19, %c256] : memref<16x384xf32, #tpu.memory_space<vmem>>, vector<16x128xf32>
    tpu.vector_store %arg17[%c0_19, %c256], %14 {strides = array<i32>} : memref<16x384xf32, #tpu.memory_space<vmem>>, vector<16x128xf32>,
    %cst_20 = arith.constant 0.000000e+00 : f32
    %16 = vector.broadcast %cst_20 : f32 to vector<16x128xf32>
    %c0_21 = arith.constant 0 : index
    %c0_22 = arith.constant 0 : index
    %17 = vector.load %arg18[%c0_21, %c0_22] : memref<16x384xf32, #tpu.memory_space<vmem>>, vector<16x128xf32>
    tpu.vector_store %arg18[%c0_21, %c0_22], %16 {strides = array<i32>} : memref<16x384xf32, #tpu.memory_space<vmem>>, vector<16x128xf32>,
    %cst_23 = arith.constant 0.000000e+00 : f32
    %18 = vector.broadcast %cst_23 : f32 to vector<16x128xf32>
    %c0_24 = arith.constant 0 : index
    %c256_25 = arith.constant 256 : index
    %19 = vector.load %arg18[%c0_24, %c256_25] : memref<16x384xf32, #tpu.memory_space<vmem>>, vector<16x128xf32>
    tpu.vector_store %arg18[%c0_24, %c256_25], %18 {strides = array<i32>} : memref<16x384xf32, #tpu.memory_space<vmem>>, vector<16x128xf32>,
    %cst_26 = arith.constant 0.000000e+00 : f32
    %20 = vector.broadcast %cst_26 : f32 to vector<16x128xf32>
    %c0_27 = arith.constant 0 : index
    %c0_28 = arith.constant 0 : index
    %21 = vector.load %arg19[%c0_27, %c0_28] : memref<16x384xf32, #tpu.memory_space<vmem>>, vector<16x128xf32>
    tpu.vector_store %arg19[%c0_27, %c0_28], %20 {strides = array<i32>} : memref<16x384xf32, #tpu.memory_space<vmem>>, vector<16x128xf32>,
    %cst_29 = arith.constant 0.000000e+00 : f32
    %22 = vector.broadcast %cst_29 : f32 to vector<16x128xf32>
    %c0_30 = arith.constant 0 : index
    %c256_31 = arith.constant 256 : index
    %23 = vector.load %arg19[%c0_30, %c256_31] : memref<16x384xf32, #tpu.memory_space<vmem>>, vector<16x128xf32>
    tpu.vector_store %arg19[%c0_30, %c256_31], %22 {strides = array<i32>} : memref<16x384xf32, #tpu.memory_space<vmem>>, vector<16x128xf32>,
    %c0_32 = arith.constant 0 : index
    %c0_33 = arith.constant 0 : index
    %24 = vector.load %arg1[%c0_32, %c0_33] : memref<2x512xf32, #tpu.memory_space<vmem>>, vector<2x512xf32>
    %c0_34 = arith.constant 0 : index
    %c128 = arith.constant 128 : index
    %25 = vector.load %arg13[%c0_34, %c128] : memref<2x768xf32, #tpu.memory_space<vmem>>, vector<2x512xf32>
    tpu.vector_store %arg13[%c0_34, %c128], %24 {strides = array<i32>} : memref<2x768xf32, #tpu.memory_space<vmem>>, vector<2x512xf32>,
    %c0_35 = arith.constant 0 : index
    %c0_36 = arith.constant 0 : index
    %26 = vector.load %arg11[%c0_35, %c0_36] : memref<64x16xf32, #tpu.memory_space<vmem>>, vector<8x1xf32>
    %c0_37 = arith.constant 0 : index
    %c111 = arith.constant 111 : index
    %27 = vector.load %arg13[%c0_37, %c111] : memref<2x768xf32, #tpu.memory_space<vmem>>, vector<2x512xf32>
    %c0_38 = arith.constant 0 : index
    %c0_39 = arith.constant 0 : index
    %28 = vector.load %arg4[%c0_38, %c0_39] : memref<8x18xf32, #tpu.memory_space<vmem>>, vector<8x2xf32>
    %29 = vector.extract_strided_slice %28 {offsets = [0, 0], sizes = [8, 1], strides = [1, 1]} : vector<8x2xf32> to vector<8x1xf32>
    %30 = vector.extract_strided_slice %27 {offsets = [0, 0], sizes = [1, 512], strides = [1, 1]} : vector<2x512xf32> to vector<1x512xf32>
    %31 = vector.broadcast %29 : vector<8x1xf32> to vector<8x512xf32>
    %32 = vector.broadcast %30 : vector<1x512xf32> to vector<8x512xf32>
    %33 = arith.mulf %31, %32 : vector<8x512xf32>
    %34 = vector.broadcast %26 : vector<8x1xf32> to vector<8x512xf32>
    %35 = arith.addf %34, %33 : vector<8x512xf32>
    %36 = vector.extract_strided_slice %28 {offsets = [0, 1], sizes = [8, 1], strides = [1, 1]} : vector<8x2xf32> to vector<8x1xf32>
    %37 = vector.extract_strided_slice %27 {offsets = [1, 0], sizes = [1, 512], strides = [1, 1]} : vector<2x512xf32> to vector<1x512xf32>
    %38 = vector.broadcast %36 : vector<8x1xf32> to vector<8x512xf32>
    %39 = vector.broadcast %37 : vector<1x512xf32> to vector<8x512xf32>
    %40 = arith.mulf %38, %39 : vector<8x512xf32>
    %41 = arith.addf %35, %40 : vector<8x512xf32>
    %c0_40 = arith.constant 0 : index
    %c112 = arith.constant 112 : index
    %42 = vector.load %arg13[%c0_40, %c112] : memref<2x768xf32, #tpu.memory_space<vmem>>, vector<2x512xf32>
    %c0_41 = arith.constant 0 : index
    %c2 = arith.constant 2 : index
    %43 = vector.load %arg4[%c0_41, %c2] : memref<8x18xf32, #tpu.memory_space<vmem>>, vector<8x2xf32>
    %44 = vector.extract_strided_slice %43 {offsets = [0, 0], sizes = [8, 1], strides = [1, 1]} : vector<8x2xf32> to vector<8x1xf32>
    %45 = vector.extract_strided_slice %42 {offsets = [0, 0], sizes = [1, 512], strides = [1, 1]} : vector<2x512xf32> to vector<1x512xf32>
    %46 = vector.broadcast %44 : vector<8x1xf32> to vector<8x512xf32>
    %47 = vector.broadcast %45 : vector<1x512xf32> to vector<8x512xf32>
    %48 = arith.mulf %46, %47 : vector<8x512xf32>
    %49 = arith.addf %41, %48 : vector<8x512xf32>
    %50 = vector.extract_strided_slice %43 {offsets = [0, 1], sizes = [8, 1], strides = [1, 1]} : vector<8x2xf32> to vector<8x1xf32>
    %51 = vector.extract_strided_slice %42 {offsets = [1, 0], sizes = [1, 512], strides = [1, 1]} : vector<2x512xf32> to vector<1x512xf32>
    %52 = vector.broadcast %50 : vector<8x1xf32> to vector<8x512xf32>
    %53 = vector.broadcast %51 : vector<1x512xf32> to vector<8x512xf32>
    %54 = arith.mulf %52, %53 : vector<8x512xf32>
    %55 = arith.addf %49, %54 : vector<8x512xf32>
    %c0_42 = arith.constant 0 : index
    %c113 = arith.constant 113 : index
    %56 = vector.load %arg13[%c0_42, %c113] : memref<2x768xf32, #tpu.memory_space<vmem>>, vector<2x512xf32>
    %c0_43 = arith.constant 0 : index
    %c4 = arith.constant 4 : index
    %57 = vector.load %arg4[%c0_43, %c4] : memref<8x18xf32, #tpu.memory_space<vmem>>, vector<8x2xf32>
    %58 = vector.extract_strided_slice %57 {offsets = [0, 0], sizes = [8, 1], strides = [1, 1]} : vector<8x2xf32> to vector<8x1xf32>
    %59 = vector.extract_strided_slice %56 {offsets = [0, 0], sizes = [1, 512], strides = [1, 1]} : vector<2x512xf32> to vector<1x512xf32>
    %60 = vector.broadcast %58 : vector<8x1xf32> to vector<8x512xf32>
    %61 = vector.broadcast %59 : vector<1x512xf32> to vector<8x512xf32>
    %62 = arith.mulf %60, %61 : vector<8x512xf32>
    %63 = arith.addf %55, %62 : vector<8x512xf32>
    %64 = vector.extract_strided_slice %57 {offsets = [0, 1], sizes = [8, 1], strides = [1, 1]} : vector<8x2xf32> to vector<8x1xf32>
    %65 = vector.extract_strided_slice %56 {offsets = [1, 0], sizes = [1, 512], strides = [1, 1]} : vector<2x512xf32> to vector<1x512xf32>
    %66 = vector.broadcast %64 : vector<8x1xf32> to vector<8x512xf32>
    %67 = vector.broadcast %65 : vector<1x512xf32> to vector<8x512xf32>
    %68 = arith.mulf %66, %67 : vector<8x512xf32>
    %69 = arith.addf %63, %68 : vector<8x512xf32>
    %c0_44 = arith.constant 0 : index
    %c127 = arith.constant 127 : index
    %70 = vector.load %arg13[%c0_44, %c127] : memref<2x768xf32, #tpu.memory_space<vmem>>, vector<2x512xf32>
    %c0_45 = arith.constant 0 : index
    %c6 = arith.constant 6 : index
    %71 = vector.load %arg4[%c0_45, %c6] : memref<8x18xf32, #tpu.memory_space<vmem>>, vector<8x2xf32>
    %72 = vector.extract_strided_slice %71 {offsets = [0, 0], sizes = [8, 1], strides = [1, 1]} : vector<8x2xf32> to vector<8x1xf32>
    %73 = vector.extract_strided_slice %70 {offsets = [0, 0], sizes = [1, 512], strides = [1, 1]} : vector<2x512xf32> to vector<1x512xf32>
    %74 = vector.broadcast %72 : vector<8x1xf32> to vector<8x512xf32>
    %75 = vector.broadcast %73 : vector<1x512xf32> to vector<8x512xf32>
    %76 = arith.mulf %74, %75 : vector<8x512xf32>
    %77 = arith.addf %69, %76 : vector<8x512xf32>
    %78 = vector.extract_strided_slice %71 {offsets = [0, 1], sizes = [8, 1], strides = [1, 1]} : vector<8x2xf32> to vector<8x1xf32>
    %79 = vector.extract_strided_slice %70 {offsets = [1, 0], sizes = [1, 512], strides = [1, 1]} : vector<2x512xf32> to vector<1x512xf32>
    %80 = vector.broadcast %78 : vector<8x1xf32> to vector<8x512xf32>
    %81 = vector.broadcast %79 : vector<1x512xf32> to vector<8x512xf32>
    %82 = arith.mulf %80, %81 : vector<8x512xf32>
    %83 = arith.addf %77, %82 : vector<8x512xf32>
    %c0_46 = arith.constant 0 : index
    %c128_47 = arith.constant 128 : index
    %84 = vector.load %arg13[%c0_46, %c128_47] : memref<2x768xf32, #tpu.memory_space<vmem>>, vector<2x512xf32>
    %c0_48 = arith.constant 0 : index
    %c8 = arith.constant 8 : index
    %85 = vector.load %arg4[%c0_48, %c8] : memref<8x18xf32, #tpu.memory_space<vmem>>, vector<8x2xf32>
    %86 = vector.extract_strided_slice %85 {offsets = [0, 0], sizes = [8, 1], strides = [1, 1]} : vector<8x2xf32> to vector<8x1xf32>
    %87 = vector.extract_strided_slice %84 {offsets = [0, 0], sizes = [1, 512], strides = [1, 1]} : vector<2x512xf32> to vector<1x512xf32>
    %88 = vector.broadcast %86 : vector<8x1xf32> to vector<8x512xf32>
    %89 = vector.broadcast %87 : vector<1x512xf32> to vector<8x512xf32>
    %90 = arith.mulf %88, %89 : vector<8x512xf32>
    %91 = arith.addf %83, %90 : vector<8x512xf32>
    %92 = vector.extract_strided_slice %85 {offsets = [0, 1], sizes = [8, 1], strides = [1, 1]} : vector<8x2xf32> to vector<8x1xf32>
    %93 = vector.extract_strided_slice %84 {offsets = [1, 0], sizes = [1, 512], strides = [1, 1]} : vector<2x512xf32> to vector<1x512xf32>
    %94 = vector.broadcast %92 : vector<8x1xf32> to vector<8x512xf32>
    %95 = vector.broadcast %93 : vector<1x512xf32> to vector<8x512xf32>
    %96 = arith.mulf %94, %95 : vector<8x512xf32>
    %97 = arith.addf %91, %96 : vector<8x512xf32>
    %c0_49 = arith.constant 0 : index
    %c129 = arith.constant 129 : index
    %98 = vector.load %arg13[%c0_49, %c129] : memref<2x768xf32, #tpu.memory_space<vmem>>, vector<2x512xf32>
    %c0_50 = arith.constant 0 : index
    %c10 = arith.constant 10 : index
    %99 = vector.load %arg4[%c0_50, %c10] : memref<8x18xf32, #tpu.memory_space<vmem>>, vector<8x2xf32>
    %100 = vector.extract_strided_slice %99 {offsets = [0, 0], sizes = [8, 1], strides = [1, 1]} : vector<8x2xf32> to vector<8x1xf32>
    %101 = vector.extract_strided_slice %98 {offsets = [0, 0], sizes = [1, 512], strides = [1, 1]} : vector<2x512xf32> to vector<1x512xf32>
    %102 = vector.broadcast %100 : vector<8x1xf32> to vector<8x512xf32>
    %103 = vector.broadcast %101 : vector<1x512xf32> to vector<8x512xf32>
    %104 = arith.mulf %102, %103 : vector<8x512xf32>
    %105 = arith.addf %97, %104 : vector<8x512xf32>
    %106 = vector.extract_strided_slice %99 {offsets = [0, 1], sizes = [8, 1], strides = [1, 1]} : vector<8x2xf32> to vector<8x1xf32>
    %107 = vector.extract_strided_slice %98 {offsets = [1, 0], sizes = [1, 512], strides = [1, 1]} : vector<2x512xf32> to vector<1x512xf32>
    %108 = vector.broadcast %106 : vector<8x1xf32> to vector<8x512xf32>
    %109 = vector.broadcast %107 : vector<1x512xf32> to vector<8x512xf32>
    %110 = arith.mulf %108, %109 : vector<8x512xf32>
    %111 = arith.addf %105, %110 : vector<8x512xf32>
    %c0_51 = arith.constant 0 : index
    %c143 = arith.constant 143 : index
    %112 = vector.load %arg13[%c0_51, %c143] : memref<2x768xf32, #tpu.memory_space<vmem>>, vector<2x512xf32>
    %c0_52 = arith.constant 0 : index
    %c12 = arith.constant 12 : index
    %113 = vector.load %arg4[%c0_52, %c12] : memref<8x18xf32, #tpu.memory_space<vmem>>, vector<8x2xf32>
    %114 = vector.extract_strided_slice %113 {offsets = [0, 0], sizes = [8, 1], strides = [1, 1]} : vector<8x2xf32> to vector<8x1xf32>
    %115 = vector.extract_strided_slice %112 {offsets = [0, 0], sizes = [1, 512], strides = [1, 1]} : vector<2x512xf32> to vector<1x512xf32>
    %116 = vector.broadcast %114 : vector<8x1xf32> to vector<8x512xf32>
    %117 = vector.broadcast %115 : vector<1x512xf32> to vector<8x512xf32>
    %118 = arith.mulf %116, %117 : vector<8x512xf32>
    %119 = arith.addf %111, %118 : vector<8x512xf32>
    %120 = vector.extract_strided_slice %113 {offsets = [0, 1], sizes = [8, 1], strides = [1, 1]} : vector<8x2xf32> to vector<8x1xf32>
    %121 = vector.extract_strided_slice %112 {offsets = [1, 0], sizes = [1, 512], strides = [1, 1]} : vector<2x512xf32> to vector<1x512xf32>
    %122 = vector.broadcast %120 : vector<8x1xf32> to vector<8x512xf32>
    %123 = vector.broadcast %121 : vector<1x512xf32> to vector<8x512xf32>
    %124 = arith.mulf %122, %123 : vector<8x512xf32>
    %125 = arith.addf %119, %124 : vector<8x512xf32>
    %c0_53 = arith.constant 0 : index
    %c144 = arith.constant 144 : index
    %126 = vector.load %arg13[%c0_53, %c144] : memref<2x768xf32, #tpu.memory_space<vmem>>, vector<2x512xf32>
    %c0_54 = arith.constant 0 : index
    %c14 = arith.constant 14 : index
    %127 = vector.load %arg4[%c0_54, %c14] : memref<8x18xf32, #tpu.memory_space<vmem>>, vector<8x2xf32>
    %128 = vector.extract_strided_slice %127 {offsets = [0, 0], sizes = [8, 1], strides = [1, 1]} : vector<8x2xf32> to vector<8x1xf32>
    %129 = vector.extract_strided_slice %126 {offsets = [0, 0], sizes = [1, 512], strides = [1, 1]} : vector<2x512xf32> to vector<1x512xf32>
    %130 = vector.broadcast %128 : vector<8x1xf32> to vector<8x512xf32>
    %131 = vector.broadcast %129 : vector<1x512xf32> to vector<8x512xf32>
    %132 = arith.mulf %130, %131 : vector<8x512xf32>
    %133 = arith.addf %125, %132 : vector<8x512xf32>
    %134 = vector.extract_strided_slice %127 {offsets = [0, 1], sizes = [8, 1], strides = [1, 1]} : vector<8x2xf32> to vector<8x1xf32>
    %135 = vector.extract_strided_slice %126 {offsets = [1, 0], sizes = [1, 512], strides = [1, 1]} : vector<2x512xf32> to vector<1x512xf32>
    %136 = vector.broadcast %134 : vector<8x1xf32> to vector<8x512xf32>
    %137 = vector.broadcast %135 : vector<1x512xf32> to vector<8x512xf32>
    %138 = arith.mulf %136, %137 : vector<8x512xf32>
    %139 = arith.addf %133, %138 : vector<8x512xf32>
    %c0_55 = arith.constant 0 : index
    %c145 = arith.constant 145 : index
    %140 = vector.load %arg13[%c0_55, %c145] : memref<2x768xf32, #tpu.memory_space<vmem>>, vector<2x512xf32>
    %c0_56 = arith.constant 0 : index
    %c16 = arith.constant 16 : index
    %141 = vector.load %arg4[%c0_56, %c16] : memref<8x18xf32, #tpu.memory_space<vmem>>, vector<8x2xf32>
    %142 = vector.extract_strided_slice %141 {offsets = [0, 0], sizes = [8, 1], strides = [1, 1]} : vector<8x2xf32> to vector<8x1xf32>
    %143 = vector.extract_strided_slice %140 {offsets = [0, 0], sizes = [1, 512], strides = [1, 1]} : vector<2x512xf32> to vector<1x512xf32>
    %144 = vector.broadcast %142 : vector<8x1xf32> to vector<8x512xf32>
    %145 = vector.broadcast %143 : vector<1x512xf32> to vector<8x512xf32>
    %146 = arith.mulf %144, %145 : vector<8x512xf32>
    %147 = arith.addf %139, %146 : vector<8x512xf32>
    %148 = vector.extract_strided_slice %141 {offsets = [0, 1], sizes = [8, 1], strides = [1, 1]} : vector<8x2xf32> to vector<8x1xf32>
    %149 = vector.extract_strided_slice %140 {offsets = [1, 0], sizes = [1, 512], strides = [1, 1]} : vector<2x512xf32> to vector<1x512xf32>
    %150 = vector.broadcast %148 : vector<8x1xf32> to vector<8x512xf32>
    %151 = vector.broadcast %149 : vector<1x512xf32> to vector<8x512xf32>
    %152 = arith.mulf %150, %151 : vector<8x512xf32>
    %153 = arith.addf %147, %152 : vector<8x512xf32>
    %cst_57 = arith.constant 0.000000e+00 : f32
    %154 = vector.broadcast %cst_57 : f32 to vector<8x512xf32>
    %155 = arith.maximumf %153, %154 : vector<8x512xf32>
    %c0_58 = arith.constant 0 : index
    %c128_59 = arith.constant 128 : index
    %156 = vector.load %arg14[%c0_58, %c128_59] : memref<8x768xf32, #tpu.memory_space<vmem>>, vector<8x512xf32>
    tpu.vector_store %arg14[%c0_58, %c128_59], %155 {strides = array<i32>} : memref<8x768xf32, #tpu.memory_space<vmem>>, vector<8x512xf32>,
    %c0_60 = arith.constant 0 : index
    %c128_61 = arith.constant 128 : index
    %157 = vector.load %arg14[%c0_60, %c128_61] : memref<8x768xf32, #tpu.memory_space<vmem>>, vector<8x512xf32>
    %c0_62 = arith.constant 0 : index
    %c0_63 = arith.constant 0 : index
    %158 = vector.load %arg16[%c0_62, %c0_63] : memref<72x512xf32, #tpu.memory_space<vmem>>, vector<8x512xf32>
    tpu.vector_store %arg16[%c0_62, %c0_63], %157 {strides = array<i32>} : memref<72x512xf32, #tpu.memory_space<vmem>>, vector<8x512xf32>,
    %c0_64 = arith.constant 0 : index
    %c129_65 = arith.constant 129 : index
    %159 = vector.load %arg14[%c0_64, %c129_65] : memref<8x768xf32, #tpu.memory_space<vmem>>, vector<8x512xf32>
    %c8_66 = arith.constant 8 : index
    %c0_67 = arith.constant 0 : index
    %160 = vector.load %arg16[%c8_66, %c0_67] : memref<72x512xf32, #tpu.memory_space<vmem>>, vector<8x512xf32>
    tpu.vector_store %arg16[%c8_66, %c0_67], %159 {strides = array<i32>} : memref<72x512xf32, #tpu.memory_space<vmem>>, vector<8x512xf32>,
    %c0_68 = arith.constant 0 : index
    %c130 = arith.constant 130 : index
    %161 = vector.load %arg14[%c0_68, %c130] : memref<8x768xf32, #tpu.memory_space<vmem>>, vector<8x512xf32>
    %c16_69 = arith.constant 16 : index
    %c0_70 = arith.constant 0 : index
    %162 = vector.load %arg16[%c16_69, %c0_70] : memref<72x512xf32, #tpu.memory_space<vmem>>, vector<8x512xf32>
    tpu.vector_store %arg16[%c16_69, %c0_70], %161 {strides = array<i32>} : memref<72x512xf32, #tpu.memory_space<vmem>>, vector<8x512xf32>,
    %c0_71 = arith.constant 0 : index
    %c144_72 = arith.constant 144 : index
    %163 = vector.load %arg14[%c0_71, %c144_72] : memref<8x768xf32, #tpu.memory_space<vmem>>, vector<8x512xf32>
    %c24 = arith.constant 24 : index
    %c0_73 = arith.constant 0 : index
    %164 = vector.load %arg16[%c24, %c0_73] : memref<72x512xf32, #tpu.memory_space<vmem>>, vector<8x512xf32>
    tpu.vector_store %arg16[%c24, %c0_73], %163 {strides = array<i32>} : memref<72x512xf32, #tpu.memory_space<vmem>>, vector<8x512xf32>,
    %c0_74 = arith.constant 0 : index
    %c145_75 = arith.constant 145 : index
    %165 = vector.load %arg14[%c0_74, %c145_75] : memref<8x768xf32, #tpu.memory_space<vmem>>, vector<8x512xf32>
    %c32 = arith.constant 32 : index
    %c0_76 = arith.constant 0 : index
    %166 = vector.load %arg16[%c32, %c0_76] : memref<72x512xf32, #tpu.memory_space<vmem>>, vector<8x512xf32>
    tpu.vector_store %arg16[%c32, %c0_76], %165 {strides = array<i32>} : memref<72x512xf32, #tpu.memory_space<vmem>>, vector<8x512xf32>,
    %c0_77 = arith.constant 0 : index
    %c146 = arith.constant 146 : index
    %167 = vector.load %arg14[%c0_77, %c146] : memref<8x768xf32, #tpu.memory_space<vmem>>, vector<8x512xf32>
    %c40 = arith.constant 40 : index
    %c0_78 = arith.constant 0 : index
    %168 = vector.load %arg16[%c40, %c0_78] : memref<72x512xf32, #tpu.memory_space<vmem>>, vector<8x512xf32>
    tpu.vector_store %arg16[%c40, %c0_78], %167 {strides = array<i32>} : memref<72x512xf32, #tpu.memory_space<vmem>>, vector<8x512xf32>,
    %c0_79 = arith.constant 0 : index
    %c160 = arith.constant 160 : index
    %169 = vector.load %arg14[%c0_79, %c160] : memref<8x768xf32, #tpu.memory_space<vmem>>, vector<8x512xf32>
    %c48 = arith.constant 48 : index
    %c0_80 = arith.constant 0 : index
    %170 = vector.load %arg16[%c48, %c0_80] : memref<72x512xf32, #tpu.memory_space<vmem>>, vector<8x512xf32>
    tpu.vector_store %arg16[%c48, %c0_80], %169 {strides = array<i32>} : memref<72x512xf32, #tpu.memory_space<vmem>>, vector<8x512xf32>,
    %c0_81 = arith.constant 0 : index
    %c161 = arith.constant 161 : index
    %171 = vector.load %arg14[%c0_81, %c161] : memref<8x768xf32, #tpu.memory_space<vmem>>, vector<8x512xf32>
    %c56 = arith.constant 56 : index
    %c0_82 = arith.constant 0 : index
    %172 = vector.load %arg16[%c56, %c0_82] : memref<72x512xf32, #tpu.memory_space<vmem>>, vector<8x512xf32>
    tpu.vector_store %arg16[%c56, %c0_82], %171 {strides = array<i32>} : memref<72x512xf32, #tpu.memory_space<vmem>>, vector<8x512xf32>,
    %c0_83 = arith.constant 0 : index
    %c162 = arith.constant 162 : index
    %173 = vector.load %arg14[%c0_83, %c162] : memref<8x768xf32, #tpu.memory_space<vmem>>, vector<8x512xf32>
    %c64 = arith.constant 64 : index
    %c0_84 = arith.constant 0 : index
    %174 = vector.load %arg16[%c64, %c0_84] : memref<72x512xf32, #tpu.memory_space<vmem>>, vector<8x512xf32>
    tpu.vector_store %arg16[%c64, %c0_84], %173 {strides = array<i32>} : memref<72x512xf32, #tpu.memory_space<vmem>>, vector<8x512xf32>,
    %c0_85 = arith.constant 0 : index
    %c0_86 = arith.constant 0 : index
    %175 = vector.load %arg5[%c0_85, %c0_86] : memref<16x72xf32, #tpu.memory_space<vmem>>, vector<16x72xf32>
    %c0_87 = arith.constant 0 : index
    %c0_88 = arith.constant 0 : index
    %176 = vector.load %arg16[%c0_87, %c0_88] : memref<72x512xf32, #tpu.memory_space<vmem>>, vector<72x512xf32>
    %cst_89 = arith.constant dense<0.000000e+00> : vector<16x512xf32>
    %177 = tpu.matmul %175, %176, %cst_89 {dimension_numbers = #tpu.dot_dimension_numbers<[1], [0], [0], [1], [0, 0, 1, 1], [], []>} : vector<16x72xf32>, vector<72x512xf32>, vector<16x512xf32> -> vector<16x512xf32>
    %c0_90 = arith.constant 0 : index
    %c1 = arith.constant 1 : index
    %178 = vector.load %arg11[%c0_90, %c1] : memref<64x16xf32, #tpu.memory_space<vmem>>, vector<16x1xf32>
    %179 = vector.broadcast %178 : vector<16x1xf32> to vector<16x512xf32>
    %180 = arith.addf %177, %179 : vector<16x512xf32>
    %cst_91 = arith.constant 0.000000e+00 : f32
    %181 = vector.broadcast %cst_91 : f32 to vector<16x512xf32>
    %182 = arith.maximumf %180, %181 : vector<16x512xf32>
    %c0_92 = arith.constant 0 : index
    %c2_93 = arith.constant 2 : index
    %183 = vector.load %arg11[%c0_92, %c2_93] : memref<64x16xf32, #tpu.memory_space<vmem>>, vector<16x1xf32>
    %184 = vector.broadcast %183 : vector<16x1xf32> to vector<16x512xf32>
    %185 = arith.mulf %182, %184 : vector<16x512xf32>
    %c0_94 = arith.constant 0 : index
    %c3 = arith.constant 3 : index
    %186 = vector.load %arg11[%c0_94, %c3] : memref<64x16xf32, #tpu.memory_space<vmem>>, vector<16x1xf32>
    %187 = vector.broadcast %186 : vector<16x1xf32> to vector<16x512xf32>
    %188 = arith.addf %185, %187 : vector<16x512xf32>
    %c0_95 = arith.constant 0 : index
    %c128_96 = arith.constant 128 : index
    %189 = vector.load %arg15[%c0_95, %c128_96] : memref<16x768xf32, #tpu.memory_space<vmem>>, vector<16x512xf32>
    tpu.vector_store %arg15[%c0_95, %c128_96], %188 {strides = array<i32>} : memref<16x768xf32, #tpu.memory_space<vmem>>, vector<16x512xf32>,
    %c0_97 = arith.constant 0 : index
    %c128_98 = arith.constant 128 : index
    %190 = vector.load %arg15[%c0_97, %c128_98] : memref<16x768xf32, #tpu.memory_space<vmem>>, vector<16x512xf32>
    %c0_99 = arith.constant 0 : index
    %c129_100 = arith.constant 129 : index
    %191 = vector.load %arg15[%c0_99, %c129_100] : memref<16x768xf32, #tpu.memory_space<vmem>>, vector<16x512xf32>
    %192 = arith.maximumf %190, %191 : vector<16x512xf32>
    %c0_101 = arith.constant 0 : index
    %c144_102 = arith.constant 144 : index
    %193 = vector.load %arg15[%c0_101, %c144_102] : memref<16x768xf32, #tpu.memory_space<vmem>>, vector<16x512xf32>
    %c0_103 = arith.constant 0 : index
    %c145_104 = arith.constant 145 : index
    %194 = vector.load %arg15[%c0_103, %c145_104] : memref<16x768xf32, #tpu.memory_space<vmem>>, vector<16x512xf32>
    %195 = arith.maximumf %193, %194 : vector<16x512xf32>
    %196 = arith.maximumf %192, %195 : vector<16x512xf32>
    %c0_105 = arith.constant 0 : index
    %c0_106 = arith.constant 0 : index
    %197 = vector.load %arg2[%c0_105, %c0_106] : memref<256x64xf32, #tpu.memory_space<vmem>>, vector<256x64xf32>
    %198 = vector.extract_strided_slice %196 {offsets = [0, 0], sizes = [16, 256], strides = [1, 1]} : vector<16x512xf32> to vector<16x256xf32>
    %cst_107 = arith.constant dense<0.000000e+00> : vector<16x64xf32>
    %199 = tpu.matmul %198, %197, %cst_107 {dimension_numbers = #tpu.dot_dimension_numbers<[1], [0], [0], [1], [0, 0, 1, 1], [], []>} : vector<16x256xf32>, vector<256x64xf32>, vector<16x64xf32> -> vector<16x64xf32>
    %200 = vector.extract_strided_slice %196 {offsets = [0, 256], sizes = [16, 256], strides = [1, 1]} : vector<16x512xf32> to vector<16x256xf32>
    %cst_108 = arith.constant dense<0.000000e+00> : vector<16x64xf32>
    %201 = tpu.matmul %200, %197, %cst_108 {dimension_numbers = #tpu.dot_dimension_numbers<[1], [0], [0], [1], [0, 0, 1, 1], [], []>} : vector<16x256xf32>, vector<256x64xf32>, vector<16x64xf32> -> vector<16x64xf32>
    %202 = tpu.concatenate %199, %201 in 1 : vector<16x64xf32>, vector<16x64xf32> -> vector<16x128xf32>
    %c0_109 = arith.constant 0 : index
    %c128_110 = arith.constant 128 : index
    %203 = vector.load %arg17[%c0_109, %c128_110] : memref<16x384xf32, #tpu.memory_space<vmem>>, vector<16x128xf32>
    tpu.vector_store %arg17[%c0_109, %c128_110], %202 {strides = array<i32>} : memref<16x384xf32, #tpu.memory_space<vmem>>, vector<16x128xf32>,
    %c0_111 = arith.constant 0 : index
    %c0_112 = arith.constant 0 : index
    %204 = vector.load %arg3[%c0_111, %c0_112] : memref<1x128xf32, #tpu.memory_space<vmem>>, vector<1x128xf32>
    %c0_113 = arith.constant 0 : index
    %c119 = arith.constant 119 : index
    %205 = vector.load %arg17[%c0_113, %c119] : memref<16x384xf32, #tpu.memory_space<vmem>>, vector<16x128xf32>
    %206 = arith.truncf %205 : vector<16x128xf32> to vector<16x128xbf16>
    %c0_114 = arith.constant 0 : index
    %c0_115 = arith.constant 0 : index
    %207 = vector.load %arg20[%c0_114, %c0_115] : memref<144x128xbf16, #tpu.memory_space<vmem>>, vector<16x128xbf16>
    tpu.vector_store %arg20[%c0_114, %c0_115], %206 {strides = array<i32>} : memref<144x128xbf16, #tpu.memory_space<vmem>>, vector<16x128xbf16>,
    %c0_116 = arith.constant 0 : index
    %c120 = arith.constant 120 : index
    %208 = vector.load %arg17[%c0_116, %c120] : memref<16x384xf32, #tpu.memory_space<vmem>>, vector<16x128xf32>
    %209 = arith.truncf %208 : vector<16x128xf32> to vector<16x128xbf16>
    %c16_117 = arith.constant 16 : index
    %c0_118 = arith.constant 0 : index
    %210 = vector.load %arg20[%c16_117, %c0_118] : memref<144x128xbf16, #tpu.memory_space<vmem>>, vector<16x128xbf16>
    tpu.vector_store %arg20[%c16_117, %c0_118], %209 {strides = array<i32>} : memref<144x128xbf16, #tpu.memory_space<vmem>>, vector<16x128xbf16>,
    %c0_119 = arith.constant 0 : index
    %c121 = arith.constant 121 : index
    %211 = vector.load %arg17[%c0_119, %c121] : memref<16x384xf32, #tpu.memory_space<vmem>>, vector<16x128xf32>
    %212 = arith.truncf %211 : vector<16x128xf32> to vector<16x128xbf16>
    %c32_120 = arith.constant 32 : index
    %c0_121 = arith.constant 0 : index
    %213 = vector.load %arg20[%c32_120, %c0_121] : memref<144x128xbf16, #tpu.memory_space<vmem>>, vector<16x128xbf16>
    tpu.vector_store %arg20[%c32_120, %c0_121], %212 {strides = array<i32>} : memref<144x128xbf16, #tpu.memory_space<vmem>>, vector<16x128xbf16>,
    %c0_122 = arith.constant 0 : index
    %c127_123 = arith.constant 127 : index
    %214 = vector.load %arg17[%c0_122, %c127_123] : memref<16x384xf32, #tpu.memory_space<vmem>>, vector<16x128xf32>
    %215 = arith.truncf %214 : vector<16x128xf32> to vector<16x128xbf16>
    %c48_124 = arith.constant 48 : index
    %c0_125 = arith.constant 0 : index
    %216 = vector.load %arg20[%c48_124, %c0_125] : memref<144x128xbf16, #tpu.memory_space<vmem>>, vector<16x128xbf16>
    tpu.vector_store %arg20[%c48_124, %c0_125], %215 {strides = array<i32>} : memref<144x128xbf16, #tpu.memory_space<vmem>>, vector<16x128xbf16>,
    %c0_126 = arith.constant 0 : index
    %c128_127 = arith.constant 128 : index
    %217 = vector.load %arg17[%c0_126, %c128_127] : memref<16x384xf32, #tpu.memory_space<vmem>>, vector<16x128xf32>
    %218 = arith.truncf %217 : vector<16x128xf32> to vector<16x128xbf16>
    %c64_128 = arith.constant 64 : index
    %c0_129 = arith.constant 0 : index
    %219 = vector.load %arg20[%c64_128, %c0_129] : memref<144x128xbf16, #tpu.memory_space<vmem>>, vector<16x128xbf16>
    tpu.vector_store %arg20[%c64_128, %c0_129], %218 {strides = array<i32>} : memref<144x128xbf16, #tpu.memory_space<vmem>>, vector<16x128xbf16>,
    %c0_130 = arith.constant 0 : index
    %c129_131 = arith.constant 129 : index
    %220 = vector.load %arg17[%c0_130, %c129_131] : memref<16x384xf32, #tpu.memory_space<vmem>>, vector<16x128xf32>
    %221 = arith.truncf %220 : vector<16x128xf32> to vector<16x128xbf16>
    %c80 = arith.constant 80 : index
    %c0_132 = arith.constant 0 : index
    %222 = vector.load %arg20[%c80, %c0_132] : memref<144x128xbf16, #tpu.memory_space<vmem>>, vector<16x128xbf16>
    tpu.vector_store %arg20[%c80, %c0_132], %221 {strides = array<i32>} : memref<144x128xbf16, #tpu.memory_space<vmem>>, vector<16x128xbf16>,
    %c0_133 = arith.constant 0 : index
    %c135 = arith.constant 135 : index
    %223 = vector.load %arg17[%c0_133, %c135] : memref<16x384xf32, #tpu.memory_space<vmem>>, vector<16x128xf32>
    %224 = arith.truncf %223 : vector<16x128xf32> to vector<16x128xbf16>
    %c96 = arith.constant 96 : index
    %c0_134 = arith.constant 0 : index
    %225 = vector.load %arg20[%c96, %c0_134] : memref<144x128xbf16, #tpu.memory_space<vmem>>, vector<16x128xbf16>
    tpu.vector_store %arg20[%c96, %c0_134], %224 {strides = array<i32>} : memref<144x128xbf16, #tpu.memory_space<vmem>>, vector<16x128xbf16>,
    %c0_135 = arith.constant 0 : index
    %c136 = arith.constant 136 : index
    %226 = vector.load %arg17[%c0_135, %c136] : memref<16x384xf32, #tpu.memory_space<vmem>>, vector<16x128xf32>
    %227 = arith.truncf %226 : vector<16x128xf32> to vector<16x128xbf16>
    %c112_136 = arith.constant 112 : index
    %c0_137 = arith.constant 0 : index
    %228 = vector.load %arg20[%c112_136, %c0_137] : memref<144x128xbf16, #tpu.memory_space<vmem>>, vector<16x128xbf16>
    tpu.vector_store %arg20[%c112_136, %c0_137], %227 {strides = array<i32>} : memref<144x128xbf16, #tpu.memory_space<vmem>>, vector<16x128xbf16>,
    %c0_138 = arith.constant 0 : index
    %c137 = arith.constant 137 : index
    %229 = vector.load %arg17[%c0_138, %c137] : memref<16x384xf32, #tpu.memory_space<vmem>>, vector<16x128xf32>
    %230 = arith.truncf %229 : vector<16x128xf32> to vector<16x128xbf16>
    %c128_139 = arith.constant 128 : index
    %c0_140 = arith.constant 0 : index
    %231 = vector.load %arg20[%c128_139, %c0_140] : memref<144x128xbf16, #tpu.memory_space<vmem>>, vector<16x128xbf16>
    tpu.vector_store %arg20[%c128_139, %c0_140], %230 {strides = array<i32>} : memref<144x128xbf16, #tpu.memory_space<vmem>>, vector<16x128xbf16>,
    %c0_141 = arith.constant 0 : index
    %c0_142 = arith.constant 0 : index
    %232 = vector.load %arg6[%c0_141, %c0_142] : memref<16x144xbf16, #tpu.memory_space<vmem>>, vector<16x144xbf16>
    %c0_143 = arith.constant 0 : index
    %c0_144 = arith.constant 0 : index
    %233 = vector.load %arg20[%c0_143, %c0_144] : memref<144x128xbf16, #tpu.memory_space<vmem>>, vector<144x128xbf16>
    %cst_145 = arith.constant dense<0.000000e+00> : vector<16x128xf32>
    %234 = tpu.matmul %232, %233, %cst_145 {dimension_numbers = #tpu.dot_dimension_numbers<[1], [0], [0], [1], [0, 0, 1, 1], [], []>} : vector<16x144xbf16>, vector<144x128xbf16>, vector<16x128xf32> -> vector<16x128xf32>
    %c0_146 = arith.constant 0 : index
    %c4_147 = arith.constant 4 : index
    %235 = vector.load %arg11[%c0_146, %c4_147] : memref<64x16xf32, #tpu.memory_space<vmem>>, vector<16x1xf32>
    %236 = vector.broadcast %235 : vector<16x1xf32> to vector<16x128xf32>
    %237 = arith.addf %234, %236 : vector<16x128xf32>
    %cst_148 = arith.constant 0.000000e+00 : f32
    %238 = vector.broadcast %cst_148 : f32 to vector<16x128xf32>
    %239 = arith.maximumf %237, %238 : vector<16x128xf32>
    %240 = vector.broadcast %204 : vector<1x128xf32> to vector<16x128xf32>
    %241 = arith.mulf %239, %240 : vector<16x128xf32>
    %c0_149 = arith.constant 0 : index
    %c128_150 = arith.constant 128 : index
    %242 = vector.load %arg18[%c0_149, %c128_150] : memref<16x384xf32, #tpu.memory_space<vmem>>, vector<16x128xf32>
    tpu.vector_store %arg18[%c0_149, %c128_150], %241 {strides = array<i32>} : memref<16x384xf32, #tpu.memory_space<vmem>>, vector<16x128xf32>,
    %c0_151 = arith.constant 0 : index
    %c119_152 = arith.constant 119 : index
    %243 = vector.load %arg18[%c0_151, %c119_152] : memref<16x384xf32, #tpu.memory_space<vmem>>, vector<16x128xf32>
    %244 = arith.truncf %243 : vector<16x128xf32> to vector<16x128xbf16>
    %c0_153 = arith.constant 0 : index
    %c0_154 = arith.constant 0 : index
    %245 = vector.load %arg20[%c0_153, %c0_154] : memref<144x128xbf16, #tpu.memory_space<vmem>>, vector<16x128xbf16>
    tpu.vector_store %arg20[%c0_153, %c0_154], %244 {strides = array<i32>} : memref<144x128xbf16, #tpu.memory_space<vmem>>, vector<16x128xbf16>,
    %c0_155 = arith.constant 0 : index
    %c120_156 = arith.constant 120 : index
    %246 = vector.load %arg18[%c0_155, %c120_156] : memref<16x384xf32, #tpu.memory_space<vmem>>, vector<16x128xf32>
    %247 = arith.truncf %246 : vector<16x128xf32> to vector<16x128xbf16>
    %c16_157 = arith.constant 16 : index
    %c0_158 = arith.constant 0 : index
    %248 = vector.load %arg20[%c16_157, %c0_158] : memref<144x128xbf16, #tpu.memory_space<vmem>>, vector<16x128xbf16>
    tpu.vector_store %arg20[%c16_157, %c0_158], %247 {strides = array<i32>} : memref<144x128xbf16, #tpu.memory_space<vmem>>, vector<16x128xbf16>,
    %c0_159 = arith.constant 0 : index
    %c121_160 = arith.constant 121 : index
    %249 = vector.load %arg18[%c0_159, %c121_160] : memref<16x384xf32, #tpu.memory_space<vmem>>, vector<16x128xf32>
    %250 = arith.truncf %249 : vector<16x128xf32> to vector<16x128xbf16>
    %c32_161 = arith.constant 32 : index
    %c0_162 = arith.constant 0 : index
    %251 = vector.load %arg20[%c32_161, %c0_162] : memref<144x128xbf16, #tpu.memory_space<vmem>>, vector<16x128xbf16>
    tpu.vector_store %arg20[%c32_161, %c0_162], %250 {strides = array<i32>} : memref<144x128xbf16, #tpu.memory_space<vmem>>, vector<16x128xbf16>,
    %c0_163 = arith.constant 0 : index
    %c127_164 = arith.constant 127 : index
    %252 = vector.load %arg18[%c0_163, %c127_164] : memref<16x384xf32, #tpu.memory_space<vmem>>, vector<16x128xf32>
    %253 = arith.truncf %252 : vector<16x128xf32> to vector<16x128xbf16>
    %c48_165 = arith.constant 48 : index
    %c0_166 = arith.constant 0 : index
    %254 = vector.load %arg20[%c48_165, %c0_166] : memref<144x128xbf16, #tpu.memory_space<vmem>>, vector<16x128xbf16>
    tpu.vector_store %arg20[%c48_165, %c0_166], %253 {strides = array<i32>} : memref<144x128xbf16, #tpu.memory_space<vmem>>, vector<16x128xbf16>,
    %c0_167 = arith.constant 0 : index
    %c128_168 = arith.constant 128 : index
    %255 = vector.load %arg18[%c0_167, %c128_168] : memref<16x384xf32, #tpu.memory_space<vmem>>, vector<16x128xf32>
    %256 = arith.truncf %255 : vector<16x128xf32> to vector<16x128xbf16>
    %c64_169 = arith.constant 64 : index
    %c0_170 = arith.constant 0 : index
    %257 = vector.load %arg20[%c64_169, %c0_170] : memref<144x128xbf16, #tpu.memory_space<vmem>>, vector<16x128xbf16>
    tpu.vector_store %arg20[%c64_169, %c0_170], %256 {strides = array<i32>} : memref<144x128xbf16, #tpu.memory_space<vmem>>, vector<16x128xbf16>,
    %c0_171 = arith.constant 0 : index
    %c129_172 = arith.constant 129 : index
    %258 = vector.load %arg18[%c0_171, %c129_172] : memref<16x384xf32, #tpu.memory_space<vmem>>, vector<16x128xf32>
    %259 = arith.truncf %258 : vector<16x128xf32> to vector<16x128xbf16>
    %c80_173 = arith.constant 80 : index
    %c0_174 = arith.constant 0 : index
    %260 = vector.load %arg20[%c80_173, %c0_174] : memref<144x128xbf16, #tpu.memory_space<vmem>>, vector<16x128xbf16>
    tpu.vector_store %arg20[%c80_173, %c0_174], %259 {strides = array<i32>} : memref<144x128xbf16, #tpu.memory_space<vmem>>, vector<16x128xbf16>,
    %c0_175 = arith.constant 0 : index
    %c135_176 = arith.constant 135 : index
    %261 = vector.load %arg18[%c0_175, %c135_176] : memref<16x384xf32, #tpu.memory_space<vmem>>, vector<16x128xf32>
    %262 = arith.truncf %261 : vector<16x128xf32> to vector<16x128xbf16>
    %c96_177 = arith.constant 96 : index
    %c0_178 = arith.constant 0 : index
    %263 = vector.load %arg20[%c96_177, %c0_178] : memref<144x128xbf16, #tpu.memory_space<vmem>>, vector<16x128xbf16>
    tpu.vector_store %arg20[%c96_177, %c0_178], %262 {strides = array<i32>} : memref<144x128xbf16, #tpu.memory_space<vmem>>, vector<16x128xbf16>,
    %c0_179 = arith.constant 0 : index
    %c136_180 = arith.constant 136 : index
    %264 = vector.load %arg18[%c0_179, %c136_180] : memref<16x384xf32, #tpu.memory_space<vmem>>, vector<16x128xf32>
    %265 = arith.truncf %264 : vector<16x128xf32> to vector<16x128xbf16>
    %c112_181 = arith.constant 112 : index
    %c0_182 = arith.constant 0 : index
    %266 = vector.load %arg20[%c112_181, %c0_182] : memref<144x128xbf16, #tpu.memory_space<vmem>>, vector<16x128xbf16>
    tpu.vector_store %arg20[%c112_181, %c0_182], %265 {strides = array<i32>} : memref<144x128xbf16, #tpu.memory_space<vmem>>, vector<16x128xbf16>,
    %c0_183 = arith.constant 0 : index
    %c137_184 = arith.constant 137 : index
    %267 = vector.load %arg18[%c0_183, %c137_184] : memref<16x384xf32, #tpu.memory_space<vmem>>, vector<16x128xf32>
    %268 = arith.truncf %267 : vector<16x128xf32> to vector<16x128xbf16>
    %c128_185 = arith.constant 128 : index
    %c0_186 = arith.constant 0 : index
    %269 = vector.load %arg20[%c128_185, %c0_186] : memref<144x128xbf16, #tpu.memory_space<vmem>>, vector<16x128xbf16>
    tpu.vector_store %arg20[%c128_185, %c0_186], %268 {strides = array<i32>} : memref<144x128xbf16, #tpu.memory_space<vmem>>, vector<16x128xbf16>,
    %c0_187 = arith.constant 0 : index
    %c0_188 = arith.constant 0 : index
    %270 = vector.load %arg7[%c0_187, %c0_188] : memref<16x144xbf16, #tpu.memory_space<vmem>>, vector<16x144xbf16>
    %c0_189 = arith.constant 0 : index
    %c0_190 = arith.constant 0 : index
    %271 = vector.load %arg20[%c0_189, %c0_190] : memref<144x128xbf16, #tpu.memory_space<vmem>>, vector<144x128xbf16>
    %cst_191 = arith.constant dense<0.000000e+00> : vector<16x128xf32>
    %272 = tpu.matmul %270, %271, %cst_191 {dimension_numbers = #tpu.dot_dimension_numbers<[1], [0], [0], [1], [0, 0, 1, 1], [], []>} : vector<16x144xbf16>, vector<144x128xbf16>, vector<16x128xf32> -> vector<16x128xf32>
    %c0_192 = arith.constant 0 : index
    %c5 = arith.constant 5 : index
    %273 = vector.load %arg11[%c0_192, %c5] : memref<64x16xf32, #tpu.memory_space<vmem>>, vector<16x1xf32>
    %274 = vector.broadcast %273 : vector<16x1xf32> to vector<16x128xf32>
    %275 = arith.addf %272, %274 : vector<16x128xf32>
    %cst_193 = arith.constant 0.000000e+00 : f32
    %276 = vector.broadcast %cst_193 : f32 to vector<16x128xf32>
    %277 = arith.maximumf %275, %276 : vector<16x128xf32>
    %c0_194 = arith.constant 0 : index
    %c128_195 = arith.constant 128 : index
    %278 = vector.load %arg17[%c0_194, %c128_195] : memref<16x384xf32, #tpu.memory_space<vmem>>, vector<16x128xf32>
    %c0_196 = arith.constant 0 : index
    %c6_197 = arith.constant 6 : index
    %279 = vector.load %arg11[%c0_196, %c6_197] : memref<64x16xf32, #tpu.memory_space<vmem>>, vector<16x1xf32>
    %280 = vector.broadcast %279 : vector<16x1xf32> to vector<16x128xf32>
    %281 = arith.mulf %277, %280 : vector<16x128xf32>
    %282 = arith.addf %278, %281 : vector<16x128xf32>
    %c0_198 = arith.constant 0 : index
    %c7 = arith.constant 7 : index
    %283 = vector.load %arg11[%c0_198, %c7] : memref<64x16xf32, #tpu.memory_space<vmem>>, vector<16x1xf32>
    %284 = vector.broadcast %283 : vector<16x1xf32> to vector<16x128xf32>
    %285 = arith.addf %282, %284 : vector<16x128xf32>
    %286 = vector.broadcast %204 : vector<1x128xf32> to vector<16x128xf32>
    %287 = arith.mulf %285, %286 : vector<16x128xf32>
    %c0_199 = arith.constant 0 : index
    %c128_200 = arith.constant 128 : index
    %288 = vector.load %arg19[%c0_199, %c128_200] : memref<16x384xf32, #tpu.memory_space<vmem>>, vector<16x128xf32>
    tpu.vector_store %arg19[%c0_199, %c128_200], %287 {strides = array<i32>} : memref<16x384xf32, #tpu.memory_space<vmem>>, vector<16x128xf32>,
    %c0_201 = arith.constant 0 : index
    %c119_202 = arith.constant 119 : index
    %289 = vector.load %arg19[%c0_201, %c119_202] : memref<16x384xf32, #tpu.memory_space<vmem>>, vector<16x128xf32>
    %290 = arith.truncf %289 : vector<16x128xf32> to vector<16x128xbf16>
    %c0_203 = arith.constant 0 : index
    %c0_204 = arith.constant 0 : index
    %291 = vector.load %arg20[%c0_203, %c0_204] : memref<144x128xbf16, #tpu.memory_space<vmem>>, vector<16x128xbf16>
    tpu.vector_store %arg20[%c0_203, %c0_204], %290 {strides = array<i32>} : memref<144x128xbf16, #tpu.memory_space<vmem>>, vector<16x128xbf16>,
    %c0_205 = arith.constant 0 : index
    %c120_206 = arith.constant 120 : index
    %292 = vector.load %arg19[%c0_205, %c120_206] : memref<16x384xf32, #tpu.memory_space<vmem>>, vector<16x128xf32>
    %293 = arith.truncf %292 : vector<16x128xf32> to vector<16x128xbf16>
    %c16_207 = arith.constant 16 : index
    %c0_208 = arith.constant 0 : index
    %294 = vector.load %arg20[%c16_207, %c0_208] : memref<144x128xbf16, #tpu.memory_space<vmem>>, vector<16x128xbf16>
    tpu.vector_store %arg20[%c16_207, %c0_208], %293 {strides = array<i32>} : memref<144x128xbf16, #tpu.memory_space<vmem>>, vector<16x128xbf16>,
    %c0_209 = arith.constant 0 : index
    %c121_210 = arith.constant 121 : index
    %295 = vector.load %arg19[%c0_209, %c121_210] : memref<16x384xf32, #tpu.memory_space<vmem>>, vector<16x128xf32>
    %296 = arith.truncf %295 : vector<16x128xf32> to vector<16x128xbf16>
    %c32_211 = arith.constant 32 : index
    %c0_212 = arith.constant 0 : index
    %297 = vector.load %arg20[%c32_211, %c0_212] : memref<144x128xbf16, #tpu.memory_space<vmem>>, vector<16x128xbf16>
    tpu.vector_store %arg20[%c32_211, %c0_212], %296 {strides = array<i32>} : memref<144x128xbf16, #tpu.memory_space<vmem>>, vector<16x128xbf16>,
    %c0_213 = arith.constant 0 : index
    %c127_214 = arith.constant 127 : index
    %298 = vector.load %arg19[%c0_213, %c127_214] : memref<16x384xf32, #tpu.memory_space<vmem>>, vector<16x128xf32>
    %299 = arith.truncf %298 : vector<16x128xf32> to vector<16x128xbf16>
    %c48_215 = arith.constant 48 : index
    %c0_216 = arith.constant 0 : index
    %300 = vector.load %arg20[%c48_215, %c0_216] : memref<144x128xbf16, #tpu.memory_space<vmem>>, vector<16x128xbf16>
    tpu.vector_store %arg20[%c48_215, %c0_216], %299 {strides = array<i32>} : memref<144x128xbf16, #tpu.memory_space<vmem>>, vector<16x128xbf16>,
    %c0_217 = arith.constant 0 : index
    %c128_218 = arith.constant 128 : index
    %301 = vector.load %arg19[%c0_217, %c128_218] : memref<16x384xf32, #tpu.memory_space<vmem>>, vector<16x128xf32>
    %302 = arith.truncf %301 : vector<16x128xf32> to vector<16x128xbf16>
    %c64_219 = arith.constant 64 : index
    %c0_220 = arith.constant 0 : index
    %303 = vector.load %arg20[%c64_219, %c0_220] : memref<144x128xbf16, #tpu.memory_space<vmem>>, vector<16x128xbf16>
    tpu.vector_store %arg20[%c64_219, %c0_220], %302 {strides = array<i32>} : memref<144x128xbf16, #tpu.memory_space<vmem>>, vector<16x128xbf16>,
    %c0_221 = arith.constant 0 : index
    %c129_222 = arith.constant 129 : index
    %304 = vector.load %arg19[%c0_221, %c129_222] : memref<16x384xf32, #tpu.memory_space<vmem>>, vector<16x128xf32>
    %305 = arith.truncf %304 : vector<16x128xf32> to vector<16x128xbf16>
    %c80_223 = arith.constant 80 : index
    %c0_224 = arith.constant 0 : index
    %306 = vector.load %arg20[%c80_223, %c0_224] : memref<144x128xbf16, #tpu.memory_space<vmem>>, vector<16x128xbf16>
    tpu.vector_store %arg20[%c80_223, %c0_224], %305 {strides = array<i32>} : memref<144x128xbf16, #tpu.memory_space<vmem>>, vector<16x128xbf16>,
    %c0_225 = arith.constant 0 : index
    %c135_226 = arith.constant 135 : index
    %307 = vector.load %arg19[%c0_225, %c135_226] : memref<16x384xf32, #tpu.memory_space<vmem>>, vector<16x128xf32>
    %308 = arith.truncf %307 : vector<16x128xf32> to vector<16x128xbf16>
    %c96_227 = arith.constant 96 : index
    %c0_228 = arith.constant 0 : index
    %309 = vector.load %arg20[%c96_227, %c0_228] : memref<144x128xbf16, #tpu.memory_space<vmem>>, vector<16x128xbf16>
    tpu.vector_store %arg20[%c96_227, %c0_228], %308 {strides = array<i32>} : memref<144x128xbf16, #tpu.memory_space<vmem>>, vector<16x128xbf16>,
    %c0_229 = arith.constant 0 : index
    %c136_230 = arith.constant 136 : index
    %310 = vector.load %arg19[%c0_229, %c136_230] : memref<16x384xf32, #tpu.memory_space<vmem>>, vector<16x128xf32>
    %311 = arith.truncf %310 : vector<16x128xf32> to vector<16x128xbf16>
    %c112_231 = arith.constant 112 : index
    %c0_232 = arith.constant 0 : index
    %312 = vector.load %arg20[%c112_231, %c0_232] : memref<144x128xbf16, #tpu.memory_space<vmem>>, vector<16x128xbf16>
    tpu.vector_store %arg20[%c112_231, %c0_232], %311 {strides = array<i32>} : memref<144x128xbf16, #tpu.memory_space<vmem>>, vector<16x128xbf16>,
    %c0_233 = arith.constant 0 : index
    %c137_234 = arith.constant 137 : index
    %313 = vector.load %arg19[%c0_233, %c137_234] : memref<16x384xf32, #tpu.memory_space<vmem>>, vector<16x128xf32>
    %314 = arith.truncf %313 : vector<16x128xf32> to vector<16x128xbf16>
    %c128_235 = arith.constant 128 : index
    %c0_236 = arith.constant 0 : index
    %315 = vector.load %arg20[%c128_235, %c0_236] : memref<144x128xbf16, #tpu.memory_space<vmem>>, vector<16x128xbf16>
    tpu.vector_store %arg20[%c128_235, %c0_236], %314 {strides = array<i32>} : memref<144x128xbf16, #tpu.memory_space<vmem>>, vector<16x128xbf16>,
    %c0_237 = arith.constant 0 : index
    %c0_238 = arith.constant 0 : index
    %316 = vector.load %arg8[%c0_237, %c0_238] : memref<16x144xbf16, #tpu.memory_space<vmem>>, vector<16x144xbf16>
    %c0_239 = arith.constant 0 : index
    %c0_240 = arith.constant 0 : index
    %317 = vector.load %arg20[%c0_239, %c0_240] : memref<144x128xbf16, #tpu.memory_space<vmem>>, vector<144x128xbf16>
    %cst_241 = arith.constant dense<0.000000e+00> : vector<16x128xf32>
    %318 = tpu.matmul %316, %317, %cst_241 {dimension_numbers = #tpu.dot_dimension_numbers<[1], [0], [0], [1], [0, 0, 1, 1], [], []>} : vector<16x144xbf16>, vector<144x128xbf16>, vector<16x128xf32> -> vector<16x128xf32>
    %c0_242 = arith.constant 0 : index
    %c8_243 = arith.constant 8 : index
    %319 = vector.load %arg11[%c0_242, %c8_243] : memref<64x16xf32, #tpu.memory_space<vmem>>, vector<16x1xf32>
    %320 = vector.broadcast %319 : vector<16x1xf32> to vector<16x128xf32>
    %321 = arith.addf %318, %320 : vector<16x128xf32>
    %cst_244 = arith.constant 0.000000e+00 : f32
    %322 = vector.broadcast %cst_244 : f32 to vector<16x128xf32>
    %323 = arith.maximumf %321, %322 : vector<16x128xf32>
    %324 = vector.broadcast %204 : vector<1x128xf32> to vector<16x128xf32>
    %325 = arith.mulf %323, %324 : vector<16x128xf32>
    %c0_245 = arith.constant 0 : index
    %c128_246 = arith.constant 128 : index
    %326 = vector.load %arg18[%c0_245, %c128_246] : memref<16x384xf32, #tpu.memory_space<vmem>>, vector<16x128xf32>
    tpu.vector_store %arg18[%c0_245, %c128_246], %325 {strides = array<i32>} : memref<16x384xf32, #tpu.memory_space<vmem>>, vector<16x128xf32>,
    %c0_247 = arith.constant 0 : index
    %c119_248 = arith.constant 119 : index
    %327 = vector.load %arg18[%c0_247, %c119_248] : memref<16x384xf32, #tpu.memory_space<vmem>>, vector<16x128xf32>
    %328 = arith.truncf %327 : vector<16x128xf32> to vector<16x128xbf16>
    %c0_249 = arith.constant 0 : index
    %c0_250 = arith.constant 0 : index
    %329 = vector.load %arg20[%c0_249, %c0_250] : memref<144x128xbf16, #tpu.memory_space<vmem>>, vector<16x128xbf16>
    tpu.vector_store %arg20[%c0_249, %c0_250], %328 {strides = array<i32>} : memref<144x128xbf16, #tpu.memory_space<vmem>>, vector<16x128xbf16>,
    %c0_251 = arith.constant 0 : index
    %c120_252 = arith.constant 120 : index
    %330 = vector.load %arg18[%c0_251, %c120_252] : memref<16x384xf32, #tpu.memory_space<vmem>>, vector<16x128xf32>
    %331 = arith.truncf %330 : vector<16x128xf32> to vector<16x128xbf16>
    %c16_253 = arith.constant 16 : index
    %c0_254 = arith.constant 0 : index
    %332 = vector.load %arg20[%c16_253, %c0_254] : memref<144x128xbf16, #tpu.memory_space<vmem>>, vector<16x128xbf16>
    tpu.vector_store %arg20[%c16_253, %c0_254], %331 {strides = array<i32>} : memref<144x128xbf16, #tpu.memory_space<vmem>>, vector<16x128xbf16>,
    %c0_255 = arith.constant 0 : index
    %c121_256 = arith.constant 121 : index
    %333 = vector.load %arg18[%c0_255, %c121_256] : memref<16x384xf32, #tpu.memory_space<vmem>>, vector<16x128xf32>
    %334 = arith.truncf %333 : vector<16x128xf32> to vector<16x128xbf16>
    %c32_257 = arith.constant 32 : index
    %c0_258 = arith.constant 0 : index
    %335 = vector.load %arg20[%c32_257, %c0_258] : memref<144x128xbf16, #tpu.memory_space<vmem>>, vector<16x128xbf16>
    tpu.vector_store %arg20[%c32_257, %c0_258], %334 {strides = array<i32>} : memref<144x128xbf16, #tpu.memory_space<vmem>>, vector<16x128xbf16>,
    %c0_259 = arith.constant 0 : index
    %c127_260 = arith.constant 127 : index
    %336 = vector.load %arg18[%c0_259, %c127_260] : memref<16x384xf32, #tpu.memory_space<vmem>>, vector<16x128xf32>
    %337 = arith.truncf %336 : vector<16x128xf32> to vector<16x128xbf16>
    %c48_261 = arith.constant 48 : index
    %c0_262 = arith.constant 0 : index
    %338 = vector.load %arg20[%c48_261, %c0_262] : memref<144x128xbf16, #tpu.memory_space<vmem>>, vector<16x128xbf16>
    tpu.vector_store %arg20[%c48_261, %c0_262], %337 {strides = array<i32>} : memref<144x128xbf16, #tpu.memory_space<vmem>>, vector<16x128xbf16>,
    %c0_263 = arith.constant 0 : index
    %c128_264 = arith.constant 128 : index
    %339 = vector.load %arg18[%c0_263, %c128_264] : memref<16x384xf32, #tpu.memory_space<vmem>>, vector<16x128xf32>
    %340 = arith.truncf %339 : vector<16x128xf32> to vector<16x128xbf16>
    %c64_265 = arith.constant 64 : index
    %c0_266 = arith.constant 0 : index
    %341 = vector.load %arg20[%c64_265, %c0_266] : memref<144x128xbf16, #tpu.memory_space<vmem>>, vector<16x128xbf16>
    tpu.vector_store %arg20[%c64_265, %c0_266], %340 {strides = array<i32>} : memref<144x128xbf16, #tpu.memory_space<vmem>>, vector<16x128xbf16>,
    %c0_267 = arith.constant 0 : index
    %c129_268 = arith.constant 129 : index
    %342 = vector.load %arg18[%c0_267, %c129_268] : memref<16x384xf32, #tpu.memory_space<vmem>>, vector<16x128xf32>
    %343 = arith.truncf %342 : vector<16x128xf32> to vector<16x128xbf16>
    %c80_269 = arith.constant 80 : index
    %c0_270 = arith.constant 0 : index
    %344 = vector.load %arg20[%c80_269, %c0_270] : memref<144x128xbf16, #tpu.memory_space<vmem>>, vector<16x128xbf16>
    tpu.vector_store %arg20[%c80_269, %c0_270], %343 {strides = array<i32>} : memref<144x128xbf16, #tpu.memory_space<vmem>>, vector<16x128xbf16>,
    %c0_271 = arith.constant 0 : index
    %c135_272 = arith.constant 135 : index
    %345 = vector.load %arg18[%c0_271, %c135_272] : memref<16x384xf32, #tpu.memory_space<vmem>>, vector<16x128xf32>
    %346 = arith.truncf %345 : vector<16x128xf32> to vector<16x128xbf16>
    %c96_273 = arith.constant 96 : index
    %c0_274 = arith.constant 0 : index
    %347 = vector.load %arg20[%c96_273, %c0_274] : memref<144x128xbf16, #tpu.memory_space<vmem>>, vector<16x128xbf16>
    tpu.vector_store %arg20[%c96_273, %c0_274], %346 {strides = array<i32>} : memref<144x128xbf16, #tpu.memory_space<vmem>>, vector<16x128xbf16>,
    %c0_275 = arith.constant 0 : index
    %c136_276 = arith.constant 136 : index
    %348 = vector.load %arg18[%c0_275, %c136_276] : memref<16x384xf32, #tpu.memory_space<vmem>>, vector<16x128xf32>
    %349 = arith.truncf %348 : vector<16x128xf32> to vector<16x128xbf16>
    %c112_277 = arith.constant 112 : index
    %c0_278 = arith.constant 0 : index
    %350 = vector.load %arg20[%c112_277, %c0_278] : memref<144x128xbf16, #tpu.memory_space<vmem>>, vector<16x128xbf16>
    tpu.vector_store %arg20[%c112_277, %c0_278], %349 {strides = array<i32>} : memref<144x128xbf16, #tpu.memory_space<vmem>>, vector<16x128xbf16>,
    %c0_279 = arith.constant 0 : index
    %c137_280 = arith.constant 137 : index
    %351 = vector.load %arg18[%c0_279, %c137_280] : memref<16x384xf32, #tpu.memory_space<vmem>>, vector<16x128xf32>
    %352 = arith.truncf %351 : vector<16x128xf32> to vector<16x128xbf16>
    %c128_281 = arith.constant 128 : index
    %c0_282 = arith.constant 0 : index
    %353 = vector.load %arg20[%c128_281, %c0_282] : memref<144x128xbf16, #tpu.memory_space<vmem>>, vector<16x128xbf16>
    tpu.vector_store %arg20[%c128_281, %c0_282], %352 {strides = array<i32>} : memref<144x128xbf16, #tpu.memory_space<vmem>>, vector<16x128xbf16>,
    %c0_283 = arith.constant 0 : index
    %c0_284 = arith.constant 0 : index
    %354 = vector.load %arg9[%c0_283, %c0_284] : memref<16x144xbf16, #tpu.memory_space<vmem>>, vector<16x144xbf16>
    %c0_285 = arith.constant 0 : index
    %c0_286 = arith.constant 0 : index
    %355 = vector.load %arg20[%c0_285, %c0_286] : memref<144x128xbf16, #tpu.memory_space<vmem>>, vector<144x128xbf16>
    %cst_287 = arith.constant dense<0.000000e+00> : vector<16x128xf32>
    %356 = tpu.matmul %354, %355, %cst_287 {dimension_numbers = #tpu.dot_dimension_numbers<[1], [0], [0], [1], [0, 0, 1, 1], [], []>} : vector<16x144xbf16>, vector<144x128xbf16>, vector<16x128xf32> -> vector<16x128xf32>
    %c0_288 = arith.constant 0 : index
    %c9 = arith.constant 9 : index
    %357 = vector.load %arg11[%c0_288, %c9] : memref<64x16xf32, #tpu.memory_space<vmem>>, vector<16x1xf32>
    %358 = vector.broadcast %357 : vector<16x1xf32> to vector<16x128xf32>
    %359 = arith.addf %356, %358 : vector<16x128xf32>
    %cst_289 = arith.constant 0.000000e+00 : f32
    %360 = vector.broadcast %cst_289 : f32 to vector<16x128xf32>
    %361 = arith.maximumf %359, %360 : vector<16x128xf32>
    %c0_290 = arith.constant 0 : index
    %c128_291 = arith.constant 128 : index
    %362 = vector.load %arg19[%c0_290, %c128_291] : memref<16x384xf32, #tpu.memory_space<vmem>>, vector<16x128xf32>
    %c0_292 = arith.constant 0 : index
    %c10_293 = arith.constant 10 : index
    %363 = vector.load %arg11[%c0_292, %c10_293] : memref<64x16xf32, #tpu.memory_space<vmem>>, vector<16x1xf32>
    %364 = vector.broadcast %363 : vector<16x1xf32> to vector<16x128xf32>
    %365 = arith.mulf %361, %364 : vector<16x128xf32>
    %366 = arith.addf %362, %365 : vector<16x128xf32>
    %c0_294 = arith.constant 0 : index
    %c11 = arith.constant 11 : index
    %367 = vector.load %arg11[%c0_294, %c11] : memref<64x16xf32, #tpu.memory_space<vmem>>, vector<16x1xf32>
    %368 = vector.broadcast %367 : vector<16x1xf32> to vector<16x128xf32>
    %369 = arith.addf %366, %368 : vector<16x128xf32>
    %c0_295 = arith.constant 0 : index
    %c0_296 = arith.constant 0 : index
    %c0_297 = arith.constant 0 : index
    %370 = vector.load %arg10[%c0_295, %c0_296, %c0_297] : memref<16x64x128xf32, #tpu.memory_space<vmem>>, vector<1x64x128xf32>
    %371 = vector.shape_cast %370 : vector<1x64x128xf32> to vector<64x128xf32>
    %372 = vector.extract_strided_slice %369 {offsets = [0, 0], sizes = [1, 128], strides = [1, 1]} : vector<16x128xf32> to vector<1x128xf32>
    %373 = vector.broadcast %372 : vector<1x128xf32> to vector<64x128xf32>
    %374 = arith.mulf %371, %373 : vector<64x128xf32>
    %c1_298 = arith.constant 1 : index
    %c0_299 = arith.constant 0 : index
    %c0_300 = arith.constant 0 : index
    %375 = vector.load %arg10[%c1_298, %c0_299, %c0_300] : memref<16x64x128xf32, #tpu.memory_space<vmem>>, vector<1x64x128xf32>
    %376 = vector.shape_cast %375 : vector<1x64x128xf32> to vector<64x128xf32>
    %377 = vector.extract_strided_slice %369 {offsets = [1, 0], sizes = [1, 128], strides = [1, 1]} : vector<16x128xf32> to vector<1x128xf32>
    %378 = vector.broadcast %377 : vector<1x128xf32> to vector<64x128xf32>
    %379 = arith.mulf %376, %378 : vector<64x128xf32>
    %380 = arith.addf %374, %379 : vector<64x128xf32>
    %c2_301 = arith.constant 2 : index
    %c0_302 = arith.constant 0 : index
    %c0_303 = arith.constant 0 : index
    %381 = vector.load %arg10[%c2_301, %c0_302, %c0_303] : memref<16x64x128xf32, #tpu.memory_space<vmem>>, vector<1x64x128xf32>
    %382 = vector.shape_cast %381 : vector<1x64x128xf32> to vector<64x128xf32>
    %383 = vector.extract_strided_slice %369 {offsets = [2, 0], sizes = [1, 128], strides = [1, 1]} : vector<16x128xf32> to vector<1x128xf32>
    %384 = vector.broadcast %383 : vector<1x128xf32> to vector<64x128xf32>
    %385 = arith.mulf %382, %384 : vector<64x128xf32>
    %386 = arith.addf %380, %385 : vector<64x128xf32>
    %c3_304 = arith.constant 3 : index
    %c0_305 = arith.constant 0 : index
    %c0_306 = arith.constant 0 : index
    %387 = vector.load %arg10[%c3_304, %c0_305, %c0_306] : memref<16x64x128xf32, #tpu.memory_space<vmem>>, vector<1x64x128xf32>
    %388 = vector.shape_cast %387 : vector<1x64x128xf32> to vector<64x128xf32>
    %389 = vector.extract_strided_slice %369 {offsets = [3, 0], sizes = [1, 128], strides = [1, 1]} : vector<16x128xf32> to vector<1x128xf32>
    %390 = vector.broadcast %389 : vector<1x128xf32> to vector<64x128xf32>
    %391 = arith.mulf %388, %390 : vector<64x128xf32>
    %392 = arith.addf %386, %391 : vector<64x128xf32>
    %c4_307 = arith.constant 4 : index
    %c0_308 = arith.constant 0 : index
    %c0_309 = arith.constant 0 : index
    %393 = vector.load %arg10[%c4_307, %c0_308, %c0_309] : memref<16x64x128xf32, #tpu.memory_space<vmem>>, vector<1x64x128xf32>
    %394 = vector.shape_cast %393 : vector<1x64x128xf32> to vector<64x128xf32>
    %395 = vector.extract_strided_slice %369 {offsets = [4, 0], sizes = [1, 128], strides = [1, 1]} : vector<16x128xf32> to vector<1x128xf32>
    %396 = vector.broadcast %395 : vector<1x128xf32> to vector<64x128xf32>
    %397 = arith.mulf %394, %396 : vector<64x128xf32>
    %398 = arith.addf %392, %397 : vector<64x128xf32>
    %c5_310 = arith.constant 5 : index
    %c0_311 = arith.constant 0 : index
    %c0_312 = arith.constant 0 : index
    %399 = vector.load %arg10[%c5_310, %c0_311, %c0_312] : memref<16x64x128xf32, #tpu.memory_space<vmem>>, vector<1x64x128xf32>
    %400 = vector.shape_cast %399 : vector<1x64x128xf32> to vector<64x128xf32>
    %401 = vector.extract_strided_slice %369 {offsets = [5, 0], sizes = [1, 128], strides = [1, 1]} : vector<16x128xf32> to vector<1x128xf32>
    %402 = vector.broadcast %401 : vector<1x128xf32> to vector<64x128xf32>
    %403 = arith.mulf %400, %402 : vector<64x128xf32>
    %404 = arith.addf %398, %403 : vector<64x128xf32>
    %c6_313 = arith.constant 6 : index
    %c0_314 = arith.constant 0 : index
    %c0_315 = arith.constant 0 : index
    %405 = vector.load %arg10[%c6_313, %c0_314, %c0_315] : memref<16x64x128xf32, #tpu.memory_space<vmem>>, vector<1x64x128xf32>
    %406 = vector.shape_cast %405 : vector<1x64x128xf32> to vector<64x128xf32>
    %407 = vector.extract_strided_slice %369 {offsets = [6, 0], sizes = [1, 128], strides = [1, 1]} : vector<16x128xf32> to vector<1x128xf32>
    %408 = vector.broadcast %407 : vector<1x128xf32> to vector<64x128xf32>
    %409 = arith.mulf %406, %408 : vector<64x128xf32>
    %410 = arith.addf %404, %409 : vector<64x128xf32>
    %c7_316 = arith.constant 7 : index
    %c0_317 = arith.constant 0 : index
    %c0_318 = arith.constant 0 : index
    %411 = vector.load %arg10[%c7_316, %c0_317, %c0_318] : memref<16x64x128xf32, #tpu.memory_space<vmem>>, vector<1x64x128xf32>
    %412 = vector.shape_cast %411 : vector<1x64x128xf32> to vector<64x128xf32>
    %413 = vector.extract_strided_slice %369 {offsets = [7, 0], sizes = [1, 128], strides = [1, 1]} : vector<16x128xf32> to vector<1x128xf32>
    %414 = vector.broadcast %413 : vector<1x128xf32> to vector<64x128xf32>
    %415 = arith.mulf %412, %414 : vector<64x128xf32>
    %416 = arith.addf %410, %415 : vector<64x128xf32>
    %c8_319 = arith.constant 8 : index
    %c0_320 = arith.constant 0 : index
    %c0_321 = arith.constant 0 : index
    %417 = vector.load %arg10[%c8_319, %c0_320, %c0_321] : memref<16x64x128xf32, #tpu.memory_space<vmem>>, vector<1x64x128xf32>
    %418 = vector.shape_cast %417 : vector<1x64x128xf32> to vector<64x128xf32>
    %419 = vector.extract_strided_slice %369 {offsets = [8, 0], sizes = [1, 128], strides = [1, 1]} : vector<16x128xf32> to vector<1x128xf32>
    %420 = vector.broadcast %419 : vector<1x128xf32> to vector<64x128xf32>
    %421 = arith.mulf %418, %420 : vector<64x128xf32>
    %422 = arith.addf %416, %421 : vector<64x128xf32>
    %c9_322 = arith.constant 9 : index
    %c0_323 = arith.constant 0 : index
    %c0_324 = arith.constant 0 : index
    %423 = vector.load %arg10[%c9_322, %c0_323, %c0_324] : memref<16x64x128xf32, #tpu.memory_space<vmem>>, vector<1x64x128xf32>
    %424 = vector.shape_cast %423 : vector<1x64x128xf32> to vector<64x128xf32>
    %425 = vector.extract_strided_slice %369 {offsets = [9, 0], sizes = [1, 128], strides = [1, 1]} : vector<16x128xf32> to vector<1x128xf32>
    %426 = vector.broadcast %425 : vector<1x128xf32> to vector<64x128xf32>
    %427 = arith.mulf %424, %426 : vector<64x128xf32>
    %428 = arith.addf %422, %427 : vector<64x128xf32>
    %c10_325 = arith.constant 10 : index
    %c0_326 = arith.constant 0 : index
    %c0_327 = arith.constant 0 : index
    %429 = vector.load %arg10[%c10_325, %c0_326, %c0_327] : memref<16x64x128xf32, #tpu.memory_space<vmem>>, vector<1x64x128xf32>
    %430 = vector.shape_cast %429 : vector<1x64x128xf32> to vector<64x128xf32>
    %431 = vector.extract_strided_slice %369 {offsets = [10, 0], sizes = [1, 128], strides = [1, 1]} : vector<16x128xf32> to vector<1x128xf32>
    %432 = vector.broadcast %431 : vector<1x128xf32> to vector<64x128xf32>
    %433 = arith.mulf %430, %432 : vector<64x128xf32>
    %434 = arith.addf %428, %433 : vector<64x128xf32>
    %c11_328 = arith.constant 11 : index
    %c0_329 = arith.constant 0 : index
    %c0_330 = arith.constant 0 : index
    %435 = vector.load %arg10[%c11_328, %c0_329, %c0_330] : memref<16x64x128xf32, #tpu.memory_space<vmem>>, vector<1x64x128xf32>
    %436 = vector.shape_cast %435 : vector<1x64x128xf32> to vector<64x128xf32>
    %437 = vector.extract_strided_slice %369 {offsets = [11, 0], sizes = [1, 128], strides = [1, 1]} : vector<16x128xf32> to vector<1x128xf32>
    %438 = vector.broadcast %437 : vector<1x128xf32> to vector<64x128xf32>
    %439 = arith.mulf %436, %438 : vector<64x128xf32>
    %440 = arith.addf %434, %439 : vector<64x128xf32>
    %c12_331 = arith.constant 12 : index
    %c0_332 = arith.constant 0 : index
    %c0_333 = arith.constant 0 : index
    %441 = vector.load %arg10[%c12_331, %c0_332, %c0_333] : memref<16x64x128xf32, #tpu.memory_space<vmem>>, vector<1x64x128xf32>
    %442 = vector.shape_cast %441 : vector<1x64x128xf32> to vector<64x128xf32>
    %443 = vector.extract_strided_slice %369 {offsets = [12, 0], sizes = [1, 128], strides = [1, 1]} : vector<16x128xf32> to vector<1x128xf32>
    %444 = vector.broadcast %443 : vector<1x128xf32> to vector<64x128xf32>
    %445 = arith.mulf %442, %444 : vector<64x128xf32>
    %446 = arith.addf %440, %445 : vector<64x128xf32>
    %c13 = arith.constant 13 : index
    %c0_334 = arith.constant 0 : index
    %c0_335 = arith.constant 0 : index
    %447 = vector.load %arg10[%c13, %c0_334, %c0_335] : memref<16x64x128xf32, #tpu.memory_space<vmem>>, vector<1x64x128xf32>
    %448 = vector.shape_cast %447 : vector<1x64x128xf32> to vector<64x128xf32>
    %449 = vector.extract_strided_slice %369 {offsets = [13, 0], sizes = [1, 128], strides = [1, 1]} : vector<16x128xf32> to vector<1x128xf32>
    %450 = vector.broadcast %449 : vector<1x128xf32> to vector<64x128xf32>
    %451 = arith.mulf %448, %450 : vector<64x128xf32>
    %452 = arith.addf %446, %451 : vector<64x128xf32>
    %c14_336 = arith.constant 14 : index
    %c0_337 = arith.constant 0 : index
    %c0_338 = arith.constant 0 : index
    %453 = vector.load %arg10[%c14_336, %c0_337, %c0_338] : memref<16x64x128xf32, #tpu.memory_space<vmem>>, vector<1x64x128xf32>
    %454 = vector.shape_cast %453 : vector<1x64x128xf32> to vector<64x128xf32>
    %455 = vector.extract_strided_slice %369 {offsets = [14, 0], sizes = [1, 128], strides = [1, 1]} : vector<16x128xf32> to vector<1x128xf32>
    %456 = vector.broadcast %455 : vector<1x128xf32> to vector<64x128xf32>
    %457 = arith.mulf %454, %456 : vector<64x128xf32>
    %458 = arith.addf %452, %457 : vector<64x128xf32>
    %c15 = arith.constant 15 : index
    %c0_339 = arith.constant 0 : index
    %c0_340 = arith.constant 0 : index
    %459 = vector.load %arg10[%c15, %c0_339, %c0_340] : memref<16x64x128xf32, #tpu.memory_space<vmem>>, vector<1x64x128xf32>
    %460 = vector.shape_cast %459 : vector<1x64x128xf32> to vector<64x128xf32>
    %461 = vector.extract_strided_slice %369 {offsets = [15, 0], sizes = [1, 128], strides = [1, 1]} : vector<16x128xf32> to vector<1x128xf32>
    %462 = vector.broadcast %461 : vector<1x128xf32> to vector<64x128xf32>
    %463 = arith.mulf %460, %462 : vector<64x128xf32>
    %464 = arith.addf %458, %463 : vector<64x128xf32>
    %465 = vector.extract_strided_slice %464 {offsets = [0, 0], sizes = [64, 64], strides = [1, 1]} : vector<64x128xf32> to vector<64x64xf32>
    %cst_341 = arith.constant dense<0.000000e+00> : vector<64xf32>
    %466 = vector.multi_reduction <add>, %465, %cst_341 [1] : vector<64x64xf32> to vector<64xf32>
    %467 = vector.shape_cast %466 : vector<64xf32> to vector<64x1xf32>
    %468 = vector.extract_strided_slice %464 {offsets = [0, 64], sizes = [64, 64], strides = [1, 1]} : vector<64x128xf32> to vector<64x64xf32>
    %cst_342 = arith.constant dense<0.000000e+00> : vector<64xf32>
    %469 = vector.multi_reduction <add>, %468, %cst_342 [1] : vector<64x64xf32> to vector<64xf32>
    %470 = vector.shape_cast %469 : vector<64xf32> to vector<64x1xf32>
    %471 = tpu.concatenate %467, %470 in 1 : vector<64x1xf32>, vector<64x1xf32> -> vector<64x2xf32>
    %c0_343 = arith.constant 0 : index
    %c12_344 = arith.constant 12 : index
    %472 = vector.load %arg11[%c0_343, %c12_344] : memref<64x16xf32, #tpu.memory_space<vmem>>, vector<64x1xf32>
    %473 = vector.broadcast %472 : vector<64x1xf32> to vector<64x2xf32>
    %474 = arith.addf %471, %473 : vector<64x2xf32>
    %cst_345 = arith.constant 0.000000e+00 : f32
    %475 = vector.broadcast %cst_345 : f32 to vector<64x2xf32>
    %476 = arith.maximumf %474, %475 : vector<64x2xf32>
    %c0_346 = arith.constant 0 : index
    %c13_347 = arith.constant 13 : index
    %477 = vector.load %arg11[%c0_346, %c13_347] : memref<64x16xf32, #tpu.memory_space<vmem>>, vector<64x1xf32>
    %478 = vector.broadcast %477 : vector<64x1xf32> to vector<64x2xf32>
    %479 = arith.mulf %476, %478 : vector<64x2xf32>
    %cst_348 = arith.constant dense<0.000000e+00> : vector<2xf32>
    %480 = vector.multi_reduction <add>, %479, %cst_348 [0] : vector<64x2xf32> to vector<2xf32>
    %481 = vector.shape_cast %480 : vector<2xf32> to vector<1x2xf32>
    %c0_349 = arith.constant 0 : index
    %c14_350 = arith.constant 14 : index
    %482 = vector.load %arg11[%c0_349, %c14_350] : memref<64x16xf32, #tpu.memory_space<vmem>>, vector<64x1xf32>
    %483 = vector.broadcast %482 : vector<64x1xf32> to vector<64x2xf32>
    %484 = arith.mulf %476, %483 : vector<64x2xf32>
    %cst_351 = arith.constant dense<0.000000e+00> : vector<2xf32>
    %485 = vector.multi_reduction <add>, %484, %cst_351 [0] : vector<64x2xf32> to vector<2xf32>
    %486 = vector.shape_cast %485 : vector<2xf32> to vector<1x2xf32>
    %487 = tpu.concatenate %481, %486 in 0 : vector<1x2xf32>, vector<1x2xf32> -> vector<2x2xf32>
    %c0_352 = arith.constant 0 : index
    %c15_353 = arith.constant 15 : index
    %488 = vector.load %arg11[%c0_352, %c15_353] : memref<64x16xf32, #tpu.memory_space<vmem>>, vector<2x1xf32>
    %489 = vector.broadcast %488 : vector<2x1xf32> to vector<2x2xf32>
    %490 = arith.addf %487, %489 : vector<2x2xf32>
    %c0_354 = arith.constant 0 : index
    %c0_355 = arith.constant 0 : index
    %c0_356 = arith.constant 0 : index
    %491 = vector.load %arg12[%c0_354, %c0_355, %c0_356] : memref<1x2x2xf32, #tpu.memory_space<vmem>>, vector<1x2x2xf32>
    %492 = vector.shape_cast %491 : vector<1x2x2xf32> to vector<2x2xf32>
    %493 = vector.shape_cast %490 : vector<2x2xf32> to vector<1x2x2xf32>
    tpu.vector_store %arg12[%c0_354, %c0_355, %c0_356], %493 {strides = array<i32>} : memref<1x2x2xf32, #tpu.memory_space<vmem>>, vector<1x2x2xf32>,
    return
  }
  func.func @transform_0(%arg0: i32) -> (i32, i32) {
    %c0_i32 = arith.constant 0 : i32
    %c0_i32_0 = arith.constant 0 : i32
    return %c0_i32, %arg0 : i32, i32
  }
  func.func @transform_1(%arg0: i32) -> (i32, i32) {
    %c0_i32 = arith.constant 0 : i32
    %c0_i32_0 = arith.constant 0 : i32
    %c0_i32_1 = arith.constant 0 : i32
    return %c0_i32, %c0_i32_0 : i32, i32
  }
  func.func @transform_2(%arg0: i32) -> (i32, i32) {
    %c0_i32 = arith.constant 0 : i32
    %c0_i32_0 = arith.constant 0 : i32
    %c0_i32_1 = arith.constant 0 : i32
    return %c0_i32, %c0_i32_0 : i32, i32
  }
  func.func @transform_3(%arg0: i32) -> (i32, i32) {
    %c0_i32 = arith.constant 0 : i32
    %c0_i32_0 = arith.constant 0 : i32
    %c0_i32_1 = arith.constant 0 : i32
    return %c0_i32, %c0_i32_0 : i32, i32
  }
  func.func @transform_4(%arg0: i32) -> (i32, i32) {
    %c0_i32 = arith.constant 0 : i32
    %c0_i32_0 = arith.constant 0 : i32
    %c0_i32_1 = arith.constant 0 : i32
    return %c0_i32, %c0_i32_0 : i32, i32
  }
  func.func @transform_5(%arg0: i32) -> (i32, i32) {
    %c0_i32 = arith.constant 0 : i32
    %c0_i32_0 = arith.constant 0 : i32
    %c0_i32_1 = arith.constant 0 : i32
    return %c0_i32, %c0_i32_0 : i32, i32
  }
  func.func @transform_6(%arg0: i32) -> (i32, i32) {
    %c0_i32 = arith.constant 0 : i32
    %c0_i32_0 = arith.constant 0 : i32
    %c0_i32_1 = arith.constant 0 : i32
    return %c0_i32, %c0_i32_0 : i32, i32
  }
  func.func @transform_7(%arg0: i32) -> (i32, i32) {
    %c0_i32 = arith.constant 0 : i32
    %c0_i32_0 = arith.constant 0 : i32
    %c0_i32_1 = arith.constant 0 : i32
    return %c0_i32, %c0_i32_0 : i32, i32
  }
  func.func @transform_8(%arg0: i32) -> (i32, i32) {
    %c0_i32 = arith.constant 0 : i32
    %c0_i32_0 = arith.constant 0 : i32
    %c0_i32_1 = arith.constant 0 : i32
    return %c0_i32, %c0_i32_0 : i32, i32
  }
  func.func @transform_9(%arg0: i32) -> (i32, i32, i32) {
    %c0_i32 = arith.constant 0 : i32
    %c0_i32_0 = arith.constant 0 : i32
    %c0_i32_1 = arith.constant 0 : i32
    %c0_i32_2 = arith.constant 0 : i32
    return %c0_i32, %c0_i32_0, %c0_i32_1 : i32, i32, i32
  }
  func.func @transform_10(%arg0: i32) -> (i32, i32) {
    %c0_i32 = arith.constant 0 : i32
    %c0_i32_0 = arith.constant 0 : i32
    %c0_i32_1 = arith.constant 0 : i32
    return %c0_i32, %c0_i32_0 : i32, i32
  }
  func.func @transform_11(%arg0: i32) -> (i32, i32, i32) {
    %c0_i32 = arith.constant 0 : i32
    %c0_i32_0 = arith.constant 0 : i32
    %c0_i32_1 = arith.constant 0 : i32
    return %arg0, %c0_i32, %c0_i32_0 : i32, i32, i32
  }
}

</mosaic_0001>

<bundles_post_ra>
// kernel: deepnet_res_forward.1
= control target key start
LH: loop header
LB: loop body
LE: loop exit
PB: predicated region body
PF: predicated region fallthrough
CT: control target
= control target key end

     0   :  { %16 = vsyncpa [#allocation11], 0  ;;  %s3936_s17 = smov [#allocation10]   ;;  %s5704_s0 = inlined_call_operand.vmem [shape: f32[2,512], index: 0, kind: input, shape index: {}]   ;;  %s5705_s1 = inlined_call_operand.vmem [shape: f32[256,64], index: 1, kind: input, shape index: {}]   ;;  %s5706_s2 = inlined_call_operand.vmem [shape: f32[1,128], index: 2, kind: input, shape index: {}]   ;;  %s5707_s3 = inlined_call_operand.vmem [shape: f32[8,18], index: 3, kind: input, shape index: {}]   ;;  %s5708_s4 = inlined_call_operand.vmem [shape: f32[16,72], index: 4, kind: input, shape index: {}]   ;;  %s5709_s5 = inlined_call_operand.vmem [shape: bf16[16,144], index: 5, kind: input, shape index: {}]   ;;  %s5710_s6 = inlined_call_operand.vmem [shape: bf16[16,144], index: 6, kind: input, shape index: {}]   ;;  %s5711_s7 = inlined_call_operand.vmem [shape: bf16[16,144], index: 7, kind: input, shape index: {}]   ;;  %s5712_s8 = inlined_call_operand.vmem [shape: bf16[16,144], index: 8, kind: input, shape index: {}]   ;;  %s5713_s9 = inlined_call_operand.hbm [shape: f32[16,64,128], index: 9, kind: input, shape index: {}]   ;;  %s5714_s10 = inlined_call_operand.vmem [shape: f32[64,16], index: 10, kind: input, shape index: {}]   ;;  %s5715_s11 = inlined_call_operand.vmem [shape: f32[1,2,2], index: 11, kind: output, shape index: {}]  }
   0x1   :  { %s40_s18 = sshll.u32 %s3936_s17, 4  ;;  %s3912_s21 = scalar_lea.hbm %s5713_s9, 16384  ;;  %s41_s18 = int_to_ptr.vmem [resolvable:$true] %s40_s18 }
   0x2   :  { %p3913_p0 = scmp.ne.s32.totalorder %s5713_s9, %s3912_s21  ;;  %p3916_p1 = scmp.lt.u32.totalorder %s3912_s21, %s5713_s9 }
   0x4   :  { %p3918_p2 = pnand %p3916_p1, %p3913_p0 }
   0x6   :  { %3921 = shalt.err (!%p3918_p2)
}
   0x7   :  { %s3922_s26 = scalar_lea.vmem %s41_s18, 16384  ;;  %p3927_p4 = scmp.lt.s32.totalorder %s41_s18, %s41_s18 }
   0x8   :  { %p3923_p3 = scmp.ne.s32.totalorder %s41_s18, %s3922_s26  ;;  %p3928_p5 = scmp.lt.s32.totalorder %s3922_s26, %s3922_s26 }
   0xa   :  { %p3929_p6 = por %p3928_p5, %p3927_p4 }
   0xc   :  { %p3930_p7 = pnand %p3929_p6, %p3923_p3 }
   0xe   :  { %3933 = shalt.err (!%p3930_p7)
}
   0xf   :  { %s3937_s27 = smov 128   ;;  %s3938_s28 = smov 8  }
  0x10   :  { %46 = dma.hbm_to_vmem [thread:$0]  %s5713_s9, 16384, %s41_s18, [#allocation11], %s3937_s27, %s3937_s27, %s3938_s28  }
  0x11   :  { %3934 = dma.done.wait [#allocation11], 16384  }
  0x12   :  { %3935 = vsyncadd [#allocation11], 4294950912  ;;  %v5741_v0 = vmov 2   ;;  %v5737_v1 = vmov 4   ;;  %v5742_v2 = vmov 0.0   ;;  %v78_v3 = vld [vmem:[%s5707_s3] sm:$0xff]  ;;  %v86_v22 = vlaneseq }
  0x13   :  { %3727 = vset.pattern.permute.xlu0 %v5741_v0  ;;  %3729 = vset.pattern.permute.xlu1 %v5737_v1  ;;  %53 = vst [vmem:[#allocation2] sm:$0x3] %v5742_v2  ;;  %54 = vst [vmem:[#allocation2 + $0xa] sm:$0x3] %v5742_v2  ;;  %v4060_v4 = vld [vmem:[%s5704_s0] sm:$0xff]  ;;  %v5739_v5 = vmov 3  }
  0x14   :  { %1474 = vmatprep.mubr.f32.mxu1 %v5742_v2  ;;  %1397 = vmatprep.mubr.f32.mxu0 %v5742_v2  ;;  %74 = vst [vmem:[#allocation2 + $0x2] sm:$0xff] %v4060_v4  ;;  %v5733_v6 = vmov 5   ;;  %v5732_v7 = vmov 6   ;;  %v5730_v8 = vmov 7   ;;  %v5728_v9 = vmov 8   ;;  %v75_v15 = vld [vmem:[%s5714_s10] sm:$0xff] }
  0x15   :  { %206 = vperm.xlu0 %3727, %v78_v3   ;;  %283 = vperm.xlu1 %3729, %v78_v3   ;;  %v5726_v10 = vmov 10   ;;  %v5725_v11 = vmov 9   ;;  %v5717_v12 = vmov 13   ;;  %v5723_v13 = vmov 11   ;;  %s3958_s15 = smov 127   ;;  %s3959_s16 = smov 126  }
  0x16   :  { %v3951_v14 = vmov 16   ;;  %v5721_v16 = vmov 12   ;;  %v5735_v17 = vmov 0   ;;  %v5719_v18 = vmov 14   ;;  %s3960_s17 = smov 112   ;;  %s3961_s18 = smov 111  }
  0x17   :  { %v3955_v19 = vmov 1   ;;  %v5716_v20 = vmov 15   ;;  %v3957_v21 = vmov 17   ;;  %v4080_v23 = vshrl.u32 %v86_v22, 7  ;;  %s3962_s19 = smov 110   ;;  %s3963_s20 = smov 96  }
  0x18   :  { %s3964_s21 = smov 95   ;;  %s3965_s22 = smov 94   ;;  %vm229_vm0 = vcmask 1039360   ;;  %vm306_vm1 = vcmask 1031168   ;;  %vm383_vm2 = vcmask 916480   ;;  %vm494_vm3 = vcmask 908288  }
  0x19   :  { %3728 = vset.pattern.permute.xlu0 %v5739_v5  ;;  %3730 = vset.pattern.permute.xlu1 %v5733_v6  ;;  %v4083_v24 = vsub.s32 0, %v4080_v23  ;;  %v4086_v25 = vsub.s32 6, %v4080_v23  ;;  %v4094_v30 = vsub.s32 4, %v4080_v23  ;;  %v4097_v31 = vsub.s32 7, %v4080_v23  ;;  %s3966_s23 = smov 17   ;;  %s3970_s3 = smov 7  }
  0x1a   :  { %245 = vperm.xlu0 %3728, %v78_v3   ;;  %322 = vperm.xlu1 %3730, %v78_v3   ;;  %v4100_v32 = vsub.s32 1, %v4080_v23  ;;  %v4103_v33 = vsub.s32 5, %v4080_v23  ;;  %vm650_vm4 = vcmask 900096   ;;  %vm772_vm5 = vcmask 785408  }
  0x1b   :  { %v77_v26 = vld [vmem:[#allocation2 + $0x8] sm:$0x3]  ;;  %v4088_v27 = vld [vmem:[#allocation2] sm:$0xff]  ;;  %vm849_vm6 = vcmask 777216   ;;  %vm926_vm7 = vcmask 769024   ;;  %vm999_vm8 = vcmask 138240  }
  0x1c   :  { %v105_v28 = vrot.slane %v77_v26, %v4083_v24  ;;  %v101_v29 = vrot.slane %v4088_v27, %v4086_v25  ;;  %v97_v36 = vrot.slane %v4088_v27, %v4094_v30  ;;  %v165_v37 = vrot.slane %v4088_v27, %v4097_v31 }
  0x1d   :  { %v169_v38 = vrot.slane %v77_v26, %v4100_v32  ;;  %v161_v40 = vrot.slane %v4088_v27, %v4103_v33  ;;  %vm1326_vm9 = vcmask 588800   ;;  %vm1863_vm10 = vcmask 523264  }
  0x1e   :  { %3731 = vset.pattern.permute.xlu1 %v5732_v7  ;;  %3732 = vset.pattern.permute.xlu0 %v5730_v8  ;;  %v4106_v34 = vrot.slane %v105_v28, %v4083_v24  ;;  %v4109_v35 = vrot.slane %v101_v29, %v4083_v24  ;;  %v4125_v43 = vrot.slane %v97_v36, %v4083_v24  ;;  %v4205_v36 = vsub.s32 2, %v4080_v23 }
  0x1f   :  { %360 = vperm.xlu1 %3731, %v78_v3   ;;  %399 = vperm.xlu0 %3732, %v78_v3   ;;  %v4128_v44 = vrot.slane %v165_v37, %v4100_v32  ;;  %v4133_v45 = vrot.slane %v169_v38, %v4100_v32  ;;  %v4136_v46 = vrot.slane %v161_v40, %v4100_v32  ;;  %vm2033_vm11 = vcmask 130048  }
  0x20   :  { %v523_v40 = vrot.slane %v4060_v4, %v4103_v33  ;;  %vm1881_vm12 = vcmask 72704   ;;  %vm1897_vm13 = vcmask 64512   ;;  %vm1913_vm14 = vcmask 56320  }
  0x21   :  { %vm1929_vm15 = vcmask 7168  }
  0x23   :  { %3733 = vset.pattern.permute.xlu1 %v5728_v9  ;;  %3735 = vset.pattern.permute.xlu0 %v5726_v10 }
  0x24   :  { %438 = vperm.xlu1 %3733, %v78_v3   ;;  %580 = vperm.xlu0 %3735, %v78_v3  }
  0x28   :  { %3734 = vset.pattern.permute.xlu1 %v5725_v11  ;;  %3738 = vset.pattern.permute.xlu0 %v5717_v12 }
  0x29   :  { %509 = vperm.xlu1 %3734, %v78_v3   ;;  %788 = vperm.xlu0 %3738, %v78_v3  }
  0x2d   :  { %3736 = vset.pattern.permute.xlu1 %v5723_v13  ;;  %3741 = vset.pattern.permute.xlu0 %v3951_v14 }
  0x2e   :  { %666 = vperm.xlu1 %3736, %v78_v3   ;;  %903 = vperm.xlu0 %3741, %v78_v3  }
  0x32   :  { %3737 = vset.pattern.permute.xlu1 %v5721_v16  ;;  %3744 = vset.pattern.permute.xlu0 %v5735_v17 }
  0x33   :  { %749 = vperm.xlu1 %3737, %v78_v3   ;;  %138 = vperm.xlu0 %3744, %v75_v15   ;;  %v453_v15 = vrot.slane %v4060_v4, %v4094_v30 }
  0x35   :  { %v4202_v29 = vrot.slane %v453_v15, %v4083_v24 }
  0x37   :  { %3739 = vset.pattern.permute.xlu1 %v5719_v18  ;;  %3816 = vset.pattern.permute.xlu0 %v3955_v19  ;;  %v153_v18 = vrot.slane %v4088_v27, %v4100_v32 }
  0x38   :  { %826 = vperm.xlu1 %3739, %v78_v3  }
  0x39   :  { %v4313_v7 = vrot.slane %v153_v18, %v4100_v32 }
  0x3c   :  { %3740 = vset.pattern.permute.xlu1 %v5716_v20 }
  0x3d   :  { %865 = vperm.xlu1 %3740, %v78_v3  }
  0x41   :  { %3742 = vset.pattern.permute.xlu1 %v3957_v21  ;;  %v457_v21 = vrot.slane %v4060_v4, %v4086_v25 }
  0x42   :  { %942 = vperm.xlu1 %3742, %v78_v3  }
  0x43   :  { %v4211_v38 = vrot.slane %v457_v21, %v4083_v24 }
  0x46   :  { %3743 = vset.pattern.permute.xlu1 %v5735_v17 }
  0x47   :  { %81 = vperm.xlu1 %3743, %v78_v3  }
  0x4b   :  { %3745 = vset.pattern.permute.xlu1 %v3955_v19 }
  0x4c   :  { %147 = vperm.xlu1 %3745, %v78_v3  }
  0x94   :  { %v4116_v39 = vpop.permute.xlu0 %206  ;;  %v4142_v49 = vpop.permute.xlu1 %283 }
  0x95   :  { %v213_v41 = vmul.f32 %v4116_v39, %v4106_v34  ;;  %v212_v42 = vmul.f32 %v4116_v39, %v4109_v35  ;;  %v211_v48 = vmul.f32 %v4116_v39, %v4125_v43  ;;  %v289_v53 = vmul.f32 %v4142_v49, %v4109_v35 }
  0x96   :  { %v290_v55 = vmul.f32 %v4142_v49, %v4106_v34  ;;  %v288_v58 = vmul.f32 %v4142_v49, %v4125_v43 }
  0x97   :  { %227 = vrot.lane.b32.xlu0 %v213_v41, %s3958_s15  ;;  %225 = vrot.lane.b32.xlu1 %v212_v42, %s3958_s15  ;;  %v449_v41 = vrot.slane %v4060_v4, %v4205_v36 }
  0x99   :  { %v4138_v47 = vpop.permute.xlu0 %245  ;;  %v4155_v54 = vpop.permute.xlu1 %322 }
  0x9a   :  { %v251_v50 = vmul.f32 %v4138_v47, %v4128_v44  ;;  %v252_v51 = vmul.f32 %v4138_v47, %v4133_v45  ;;  %v250_v52 = vmul.f32 %v4138_v47, %v4136_v46  ;;  %v328_v57 = vmul.f32 %v4155_v54, %v4128_v44 }
  0x9b   :  { %223 = vrot.lane.b32.xlu1 %v211_v48, %s3958_s15  ;;  %v329_v59 = vmul.f32 %v4155_v54, %v4133_v45  ;;  %v327_v61 = vmul.f32 %v4155_v54, %v4136_v46  ;;  %v4220_v48 = vsub.s32 3, %v4080_v23 }
  0x9c   :  { %264 = vrot.lane.b32.xlu0 %v251_v50, %s3958_s15 }
  0x9d   :  { %v519_v23 = vrot.slane %v4060_v4, %v4220_v48  ;;  %v157_v20 = vrot.slane %v4088_v27, %v4220_v48 }
  0x9e   :  { %v4161_v56 = vpop.permute.xlu1 %360  ;;  %v4182_v3 = vpop.permute.xlu0 %399 }
  0x9f   :  { %266 = vrot.lane.b32.xlu1 %v252_v51, %s3958_s15  ;;  %v366_v62 = vmul.f32 %v4161_v56, %v4109_v35  ;;  %v367_v63 = vmul.f32 %v4161_v56, %v4106_v34  ;;  %v405_v19 = vmul.f32 %v4182_v3, %v4128_v44  ;;  %v365_v22 = vmul.f32 %v4161_v56, %v4125_v43 }
  0xa0   :  { %262 = vrot.lane.b32.xlu0 %v250_v52, %s3958_s15  ;;  %v406_v28 = vmul.f32 %v4182_v3, %v4133_v45  ;;  %v404_v37 = vmul.f32 %v4182_v3, %v4136_v46  ;;  %v527_v51 = vrot.slane %v4060_v4, %v4097_v31 }
  0xa3   :  { %302 = vrot.lane.b32.xlu1 %v289_v53, %s3959_s16  ;;  %v4171_v60 = vpop.permute.xlu1 %438  ;;  %v4231_v53 = vrot.slane %v523_v40, %v4100_v32 }
  0xa4   :  { %304 = vrot.lane.b32.xlu0 %v290_v55, %s3959_s16  ;;  %v480_v50 = vmul.f32 %v4202_v29, %v4171_v60  ;;  %v481_v52 = vmul.f32 %v4211_v38, %v4171_v60  ;;  %v4236_v55 = vrot.slane %v449_v41, %v4083_v24  ;;  %v93_v41 = vrot.slane %v4088_v27, %v4205_v36 }
  0xa7   :  { %300 = vrot.lane.b32.xlu1 %v288_v58, %s3959_s16  ;;  %v4242_v58 = vrot.slane %v527_v51, %v4100_v32 }
  0xa8   :  { %341 = vrot.lane.b32.xlu0 %v328_v57, %s3959_s16  ;;  %v4184_v14 = vpop.permute.xlu1 %509 }
  0xa9   :  { %v551_v21 = vmul.f32 %v4242_v58, %v4184_v14 }
  0xab   :  { %343 = vrot.lane.b32.xlu1 %v329_v59, %s3959_s16  ;;  %v4244_v59 = vpop.permute.xlu0 %580 }
  0xac   :  { %339 = vrot.lane.b32.xlu0 %v327_v61, %s3959_s16  ;;  %v550_v61 = vmul.f32 %v4231_v53, %v4184_v14  ;;  %v632_v51 = vmul.f32 %v4244_v59, %v4202_v29 }
  0xad   :  { %v4196_v26 = vpop.permute.xlu1 %666 }
  0xaf   :  { %379 = vrot.lane.b32.xlu1 %v366_v62, %s3960_s17  ;;  %v4250_v62 = vrot.slane %v519_v23, %v4100_v32  ;;  %v633_v23 = vmul.f32 %v4244_v59, %v4211_v38 }
  0xb0   :  { %381 = vrot.lane.b32.xlu0 %v367_v63, %s3960_s17  ;;  %v479_v63 = vmul.f32 %v4236_v55, %v4171_v60 }
  0xb2   :  { %v4217_v42 = vpop.permute.xlu1 %749 }
  0xb3   :  { %377 = vrot.lane.b32.xlu1 %v365_v22, %s3960_s17  ;;  %v4259_v22 = vpop.permute.xlu0 %788 }
  0xb4   :  { %418 = vrot.lane.b32.xlu0 %v405_v19, %s3960_s17  ;;  %v578_v19 = vld [vmem:[#allocation2 + $0xa] sm:$0x3] }
  0xb7   :  { %420 = vrot.lane.b32.xlu1 %v406_v28, %s3960_s17  ;;  %v4238_v57 = vpop.permute.xlu1 %826  ;;  %v549_v28 = vmul.f32 %v4250_v62, %v4184_v14 }
  0xb8   :  { %416 = vrot.lane.b32.xlu0 %v404_v37, %s3960_s17  ;;  %v604_v37 = vrot.slane %v578_v19, %v4083_v24 }
  0xbb   :  { %490 = vrot.lane.b32.xlu1 %v480_v50, %s3961_s18  ;;  %v89_v50 = vrot.slane %v4088_v27, %v4083_v24  ;;  %v631_v27 = vmul.f32 %v4244_v59, %v4236_v55 }
  0xbc   :  { %492 = vrot.lane.b32.xlu0 %v481_v52, %s3961_s18  ;;  %v4254_v15 = vpop.permute.xlu1 %865  ;;  %v4274_v52 = vpop.permute.xlu0 %903 }
  0xbd   :  { %v4288_v12 = vrot.slane %v89_v50, %v4083_v24 }
  0xbf   :  { %488 = vrot.lane.b32.xlu1 %v479_v63, %s3961_s18  ;;  %v4283_v63 = vrot.slane %v93_v41, %v4083_v24 }
  0xc0   :  { %560 = vrot.lane.b32.xlu0 %v550_v61, %s3961_s18  ;;  %v4280_v61 = vrot.slane %v604_v37, %v4083_v24 }
  0xc1   :  { %v4265_v40 = vpop.permute.xlu1 %942 }
  0xc2   :  { %v634_v11 = vmul.f32 %v4280_v61, %v4244_v59 }
  0xc3   :  { %562 = vrot.lane.b32.xlu1 %v551_v21, %s3961_s18 }
  0xc4   :  { %558 = vrot.lane.b32.xlu0 %v549_v28, %s3961_s18  ;;  %v139_v28 = vpop.permute.xlu0 %138 }
  0xc6   :  { %v82_v21 = vpop.permute.xlu1 %81 }
  0xc7   :  { %644 = vrot.lane.b32.xlu1 %v632_v51, %s3962_s19  ;;  %v135_v37 = vmul.f32 %v4106_v34, %v82_v21  ;;  %v134_v16 = vmul.f32 %v4109_v35, %v82_v21  ;;  %v133_v41 = vmul.f32 %v4125_v43, %v82_v21  ;;  %v132_v13 = vmul.f32 %v4283_v63, %v82_v21 }
  0xc8   :  { %646 = vrot.lane.b32.xlu0 %v633_v23, %s3962_s19  ;;  %v131_v50 = vmul.f32 %v4288_v12, %v82_v21  ;;  %v688_v51 = vrot.slane %v578_v19, %v4100_v32  ;;  %v4305_v34 = vrot.slane %v157_v20, %v4100_v32  ;;  %v716_v23 = vmul.f32 %v4196_v26, %v4231_v53 }
  0xc9   :  { %v145_v35 = vadd.f32 %v139_v28, %v135_v37  ;;  %v144_v10 = vadd.f32 %v139_v28, %v134_v16  ;;  %v143_v43 = vadd.f32 %v139_v28, %v133_v41  ;;  %v142_v9 = vadd.f32 %v139_v28, %v132_v13 }
  0xca   :  { %v717_v21 = vmul.f32 %v4196_v26, %v4242_v58  ;;  %v141_v19 = vadd.f32 %v139_v28, %v131_v50  ;;  %v713_v37 = vrot.slane %v688_v51, %v4100_v32  ;;  %v753_v50 = vmul.f32 %v4217_v42, %v4236_v55 }
  0xcb   :  { %648 = vrot.lane.b32.xlu1 %v634_v11, %s3962_s19  ;;  %v148_v8 = vpop.permute.xlu1 %147  ;;  %v794_v51 = vmul.f32 %v4259_v22, %v4242_v58 }
  0xcc   :  { %642 = vrot.lane.b32.xlu0 %v631_v27, %s3962_s19  ;;  %v199_v20 = vmul.f32 %v4133_v45, %v148_v8  ;;  %v198_v16 = vmul.f32 %v4128_v44, %v148_v8  ;;  %v197_v13 = vmul.f32 %v4136_v46, %v148_v8  ;;  %v196_v11 = vmul.f32 %v4305_v34, %v148_v8 }
  0xcd   :  { %v195_v41 = vmul.f32 %v4313_v7, %v148_v8  ;;  %v718_v44 = vmul.f32 %v713_v37, %v4196_v26  ;;  %v715_v46 = vmul.f32 %v4196_v26, %v4250_v62  ;;  %v754_v8 = vmul.f32 %v4217_v42, %v4202_v29 }
  0xce   :  { %v4322_v6 = vadd.f32 %v199_v20, %v145_v35  ;;  %v4324_v17 = vadd.f32 %v198_v16, %v144_v10  ;;  %v4326_v18 = vadd.f32 %v197_v13, %v143_v43  ;;  %v4328_v28 = vadd.f32 %v196_v11, %v142_v9 }
  0xcf   :  { %728 = vrot.lane.b32.xlu1 %v716_v23, %s3962_s19  ;;  %v4331_v45 = vadd.f32 %v195_v41, %v141_v19  ;;  %v755_v9 = vmul.f32 %v4217_v42, %v4211_v38  ;;  %v756_v10 = vmul.f32 %v4217_v42, %v4280_v61  ;;  %v793_v27 = vmul.f32 %v4259_v22, %v4231_v53 }
  0xd0   :  { %730 = vrot.lane.b32.xlu0 %v717_v21, %s3962_s19  ;;  %v795_v35 = vmul.f32 %v4259_v22, %v713_v37  ;;  %v792_v43 = vmul.f32 %v4259_v22, %v4250_v62  ;;  %v831_v23 = vmul.f32 %v4238_v57, %v4202_v29  ;;  %v832_v21 = vmul.f32 %v4238_v57, %v4211_v38 }
  0xd1   :  { %v833_v19 = vmul.f32 %v4238_v57, %v4280_v61  ;;  %v830_v20 = vmul.f32 %v4238_v57, %v4236_v55  ;;  %v870_v16 = vmul.f32 %v4254_v15, %v4231_v53  ;;  %v871_v13 = vmul.f32 %v4254_v15, %v4242_v58 }
  0xd2   :  { %v872_v11 = vmul.f32 %v4254_v15, %v713_v37  ;;  %v869_v41 = vmul.f32 %v4254_v15, %v4250_v62 }
  0xd3   :  { %732 = vrot.lane.b32.xlu1 %v718_v44, %s3962_s19  ;;  %v908_v44 = vmul.f32 %v4274_v52, %v4202_v29  ;;  %v947_v29 = vmul.f32 %v4265_v40, %v4231_v53  ;;  %v210_v53 = vmul.f32 %v4116_v39, %v4283_v63 }
  0xd4   :  { %726 = vrot.lane.b32.xlu0 %v715_v46, %s3962_s19  ;;  %v909_v46 = vmul.f32 %v4274_v52, %v4211_v38  ;;  %v948_v38 = vmul.f32 %v4265_v40, %v4242_v58 }
  0xd7   :  { %766 = vrot.lane.b32.xlu1 %v754_v8, %s3963_s20  ;;  %v910_v8 = vmul.f32 %v4274_v52, %v4280_v61  ;;  %v946_v61 = vmul.f32 %v4265_v40, %v4250_v62  ;;  %v249_v62 = vmul.f32 %v4138_v47, %v4305_v34 }
  0xd8   :  { %768 = vrot.lane.b32.xlu0 %v755_v9, %s3963_s20  ;;  %v907_v9 = vmul.f32 %v4274_v52, %v4236_v55  ;;  %v209_v55 = vmul.f32 %v4116_v39, %v4288_v12  ;;  %v287_v39 = vmul.f32 %v4142_v49, %v4283_v63 }
  0xdb   :  { %770 = vrot.lane.b32.xlu1 %v756_v10, %s3963_s20  ;;  %v949_v10 = vmul.f32 %v4265_v40, %v713_v37 }
  0xdc   :  { %764 = vrot.lane.b32.xlu0 %v753_v50, %s3963_s20  ;;  %v248_v50 = vmul.f32 %v4138_v47, %v4313_v7  ;;  %v326_v47 = vmul.f32 %v4155_v54, %v4305_v34 }
  0xdf   :  { %805 = vrot.lane.b32.xlu1 %v793_v27, %s3963_s20 }
  0xe0   :  { %807 = vrot.lane.b32.xlu0 %v794_v51, %s3963_s20 }
  0xe3   :  { %809 = vrot.lane.b32.xlu1 %v795_v35, %s3963_s20  ;;  %v286_v35 = vmul.f32 %v4142_v49, %v4288_v12  ;;  %v364_v49 = vmul.f32 %v4161_v56, %v4283_v63  ;;  %v403_v63 = vmul.f32 %v4182_v3, %v4305_v34 }
  0xe4   :  { %803 = vrot.lane.b32.xlu0 %v792_v43, %s3963_s20 }
  0xe7   :  { %843 = vrot.lane.b32.xlu1 %v831_v23, %s3964_s21 }
  0xe8   :  { %845 = vrot.lane.b32.xlu0 %v832_v21, %s3964_s21  ;;  %v325_v21 = vmul.f32 %v4155_v54, %v4313_v7  ;;  %v515_v54 = vrot.slane %v4060_v4, %v4100_v32 }
  0xeb   :  { %847 = vrot.lane.b32.xlu1 %v833_v19, %s3964_s21 }
  0xec   :  { %841 = vrot.lane.b32.xlu0 %v830_v20, %s3964_s21  ;;  %v445_v20 = vrot.slane %v4060_v4, %v4083_v24 }
  0xef   :  { %882 = vrot.lane.b32.xlu1 %v870_v16, %s3964_s21 }
  0xf0   :  { %884 = vrot.lane.b32.xlu0 %v871_v13, %s3964_s21  ;;  %v363_v13 = vmul.f32 %v4161_v56, %v4288_v12  ;;  %v535_v12 = vrot.slane %v515_v54, %v4100_v32 }
  0xf2   :  { %v548_v34 = vmul.f32 %v535_v12, %v4184_v14 }
  0xf3   :  { %886 = vrot.lane.b32.xlu1 %v872_v11, %s3964_s21 }
  0xf4   :  { %880 = vrot.lane.b32.xlu0 %v869_v41, %s3964_s21  ;;  %v465_v41 = vrot.slane %v445_v20, %v4083_v24 }
  0xf6   :  { %v478_v56 = vmul.f32 %v465_v41, %v4171_v60  ;;  %v752_v14 = vmul.f32 %v4217_v42, %v465_v41 }
  0xf7   :  { %920 = vrot.lane.b32.xlu1 %v908_v44, %s3965_s22 }
  0xf8   :  { %922 = vrot.lane.b32.xlu0 %v909_v46, %s3965_s22  ;;  %v402_v46 = vmul.f32 %v4182_v3, %v4313_v7  ;;  %v630_v7 = vmul.f32 %v4244_v59, %v465_v41 }
  0xfb   :  { %924 = vrot.lane.b32.xlu1 %v910_v8, %s3965_s22 }
  0xfc   :  { %918 = vrot.lane.b32.xlu0 %v907_v9, %s3965_s22 }
  0xff   :  { %959 = vrot.lane.b32.xlu1 %v947_v29, %s3965_s22  ;;  %v714_v29 = vmul.f32 %v4196_v26, %v535_v12  ;;  %v829_v26 = vmul.f32 %v4238_v57, %v465_v41 }
 0x100   :  { %961 = vrot.lane.b32.xlu0 %v948_v38, %s3965_s22 }
 0x103   :  { %963 = vrot.lane.b32.xlu1 %v949_v10, %s3965_s22  ;;  %v791_v10 = vmul.f32 %v4259_v22, %v535_v12  ;;  %v906_v22 = vmul.f32 %v4274_v52, %v465_v41 }
 0x104   :  { %957 = vrot.lane.b32.xlu0 %v946_v61, %s3965_s22 }
 0x107   :  { %221 = vrot.lane.b32.xlu1 %v210_v53, %s3958_s15  ;;  %v868_v53 = vmul.f32 %v4254_v15, %v535_v12 }
 0x108   :  { %219 = vrot.lane.b32.xlu0 %v209_v55, %s3958_s15 }
 0x109   :  { %v4414_v58 = vpop.permute.xlu0 %227  ;;  %v4416_v37 = vpop.permute.xlu1 %225 }
 0x10b   :  { %260 = vrot.lane.b32.xlu1 %v249_v62, %s3958_s15  ;;  %v945_v62 = vmul.f32 %v4265_v40, %v535_v12 }
 0x10c   :  { %258 = vrot.lane.b32.xlu0 %v248_v50, %s3958_s15 }
 0x10d   :  { %v4424_v27 = vpop.permute.xlu1 %223 }
 0x10e   :  { %v4428_v51 = vpop.permute.xlu0 %264 }
 0x10f   :  { %298 = vrot.lane.b32.xlu1 %v287_v39, %s3959_s16 }
 0x110   :  { %296 = vrot.lane.b32.xlu0 %v286_v35, %s3959_s16 }
 0x111   :  { %v4434_v43 = vpop.permute.xlu1 %266 }
 0x112   :  { %v4438_v23 = vpop.permute.xlu0 %262 }
 0x113   :  { %337 = vrot.lane.b32.xlu1 %v326_v47, %s3959_s16  ;;  %v270_v1 = vsel %vm229_vm0, %v4438_v23, %v4428_v51 }
 0x114   :  { %335 = vrot.lane.b32.xlu0 %v325_v21, %s3959_s16 }
 0x115   :  { %v4444_v19 = vpop.permute.xlu1 %302 }
 0x116   :  { %v4450_v16 = vpop.permute.xlu0 %304 }
 0x117   :  { %375 = vrot.lane.b32.xlu1 %v364_v49, %s3960_s17 }
 0x118   :  { %373 = vrot.lane.b32.xlu0 %v363_v13, %s3960_s17 }
 0x119   :  { %v4458_v11 = vpop.permute.xlu1 %300 }
 0x11a   :  { %v4463_v44 = vpop.permute.xlu0 %341 }
 0x11b   :  { %414 = vrot.lane.b32.xlu1 %v403_v63, %s3960_s17 }
 0x11c   :  { %412 = vrot.lane.b32.xlu0 %v402_v46, %s3960_s17 }
 0x11d   :  { %v4470_v4 = vpop.permute.xlu1 %343 }
 0x11e   :  { %v4473_v8 = vpop.permute.xlu0 %339 }
 0x11f   :  { %486 = vrot.lane.b32.xlu1 %v478_v56, %s3961_s18 }
 0x120   :  { %556 = vrot.lane.b32.xlu0 %v548_v34, %s3961_s18  ;;  %v233_v34 = vsel %vm229_vm0, %v4416_v37, %v4414_v58 }
 0x121   :  { %v4478_v9 = vpop.permute.xlu1 %379 }
 0x122   :  { %v4481_v3 = vpop.permute.xlu0 %381 }
 0x123   :  { %640 = vrot.lane.b32.xlu1 %v630_v7, %s3962_s19  ;;  %v271_v7 = vsel %vm229_vm0, %v4428_v51, %v4434_v43 }
 0x124   :  { %724 = vrot.lane.b32.xlu0 %v714_v29, %s3962_s19 }
 0x125   :  { %v4486_v60 = vpop.permute.xlu1 %377 }
 0x126   :  { %v4489_v38 = vpop.permute.xlu0 %418 }
 0x127   :  { %762 = vrot.lane.b32.xlu1 %v752_v14, %s3963_s20  ;;  %v242_v14 = vadd.f32 %v233_v34, %v4324_v17  ;;  %v348_v17 = vsel %vm306_vm1, %v4463_v44, %v4470_v4 }
 0x128   :  { %801 = vrot.lane.b32.xlu0 %v791_v10, %s3963_s20 }
 0x129   :  { %v4494_v59 = vpop.permute.xlu1 %420 }
 0x12a   :  { %v4497_v61 = vpop.permute.xlu0 %416 }
 0x12b   :  { %839 = vrot.lane.b32.xlu1 %v829_v26, %s3964_s21  ;;  %v232_v26 = vsel %vm229_vm0, %v4424_v27, %v4416_v37 }
 0x12c   :  { %878 = vrot.lane.b32.xlu0 %v868_v53, %s3964_s21  ;;  %v310_v53 = vsel %vm306_vm1, %v4444_v19, %v4450_v16  ;;  %v241_v37 = vadd.f32 %v232_v26, %v4326_v18  ;;  %v347_v18 = vsel %vm306_vm1, %v4473_v8, %v4463_v44 }
 0x12d   :  { %v4502_v42 = vpop.permute.xlu1 %490 }
 0x12e   :  { %v4505_v55 = vpop.permute.xlu0 %492  ;;  %v279_v51 = vadd.f32 %v270_v1, %v241_v37  ;;  %v386_v1 = vsel %vm383_vm2, %v4486_v60, %v4478_v9  ;;  %v424_v37 = vsel %vm383_vm2, %v4497_v61, %v4489_v38 }
 0x12f   :  { %916 = vrot.lane.b32.xlu1 %v906_v22, %s3965_s22  ;;  %v280_v22 = vadd.f32 %v271_v7, %v242_v14 }
 0x130   :  { %955 = vrot.lane.b32.xlu0 %v945_v62, %s3965_s22  ;;  %v243_v62 = vadd.f32 %v4414_v58, %v4322_v6  ;;  %v309_v6 = vsel %vm306_vm1, %v4458_v11, %v4444_v19  ;;  %v387_v58 = vsel %vm383_vm2, %v4478_v9, %v4481_v3 }
 0x131   :  { %v4510_v57 = vpop.permute.xlu1 %488  ;;  %v319_v5 = vadd.f32 %v310_v53, %v280_v22  ;;  %v318_v53 = vadd.f32 %v309_v6, %v279_v51 }
 0x132   :  { %v4512_v50 = vpop.permute.xlu0 %560  ;;  %v281_v7 = vadd.f32 %v4434_v43, %v243_v62  ;;  %v425_v43 = vsel %vm383_vm2, %v4489_v38, %v4494_v59  ;;  %v496_v51 = vsel %vm494_vm3, %v4510_v57, %v4502_v42 }
 0x133   :  { %v357_v14 = vadd.f32 %v348_v17, %v319_v5  ;;  %v497_v5 = vsel %vm494_vm3, %v4502_v42, %v4505_v55 }
 0x134   :  { %v320_v2 = vadd.f32 %v4450_v16, %v281_v7  ;;  %v356_v16 = vadd.f32 %v347_v18, %v318_v53 }
 0x135   :  { %v4514_v15 = vpop.permute.xlu1 %562  ;;  %v396_v19 = vadd.f32 %v387_v58, %v357_v14 }
 0x136   :  { %v4516_v39 = vpop.permute.xlu0 %558  ;;  %v358_v62 = vadd.f32 %v4470_v4, %v320_v2  ;;  %v566_v2 = vsel %vm494_vm3, %v4512_v50, %v4514_v15  ;;  %v395_v7 = vadd.f32 %v386_v1, %v356_v16 }
 0x137   :  { %v434_v44 = vadd.f32 %v425_v43, %v396_v19  ;;  %v565_v43 = vsel %vm494_vm3, %v4516_v39, %v4512_v50 }
 0x138   :  { %v397_v17 = vadd.f32 %v4481_v3, %v358_v62  ;;  %v433_v14 = vadd.f32 %v424_v37, %v395_v7 }
 0x139   :  { %v4518_v35 = vpop.permute.xlu1 %644  ;;  %v506_v9 = vadd.f32 %v497_v5, %v434_v44 }
 0x13a   :  { %v4520_v47 = vpop.permute.xlu0 %646  ;;  %v435_v58 = vadd.f32 %v4494_v59, %v397_v17  ;;  %v505_v19 = vadd.f32 %v496_v51, %v433_v14 }
 0x13b   :  { %v653_v3 = vsel %vm650_vm4, %v4518_v35, %v4520_v47  ;;  %v575_v38 = vadd.f32 %v566_v2, %v506_v9 }
 0x13c   :  { %v507_v18 = vadd.f32 %v4505_v55, %v435_v58  ;;  %v574_v16 = vadd.f32 %v565_v43, %v505_v19 }
 0x13d   :  { %v4522_v52 = vpop.permute.xlu1 %648  ;;  %v663_v42 = vadd.f32 %v653_v3, %v575_v38 }
 0x13e   :  { %v4524_v21 = vpop.permute.xlu0 %642  ;;  %v654_v62 = vsel %vm650_vm4, %v4520_v47, %v4522_v52  ;;  %v576_v5 = vadd.f32 %v4514_v15, %v507_v18 }
 0x13f   :  { %v652_v55 = vsel %vm650_vm4, %v4524_v21, %v4518_v35 }
 0x140   :  { %v664_v47 = vadd.f32 %v654_v62, %v576_v5  ;;  %v662_v37 = vadd.f32 %v652_v55, %v574_v16 }
 0x141   :  { %v4526_v40 = vpop.permute.xlu1 %728 }
 0x142   :  { %v4528_v49 = vpop.permute.xlu0 %730 }
 0x143   :  { %v736_v59 = vsel %vm650_vm4, %v4526_v40, %v4528_v49 }
 0x144   :  { %v746_v44 = vadd.f32 %v736_v59, %v663_v42 }
 0x145   :  { %v4530_v20 = vpop.permute.xlu1 %732 }
 0x146   :  { %v4532_v13 = vpop.permute.xlu0 %726  ;;  %v737_v17 = vsel %vm650_vm4, %v4528_v49, %v4530_v20 }
 0x147   :  { %v735_v15 = vsel %vm650_vm4, %v4532_v13, %v4526_v40  ;;  %v747_v58 = vadd.f32 %v737_v17, %v664_v47 }
 0x148   :  { %v745_v20 = vadd.f32 %v735_v15, %v662_v37 }
 0x149   :  { %v4534_v54 = vpop.permute.xlu1 %766 }
 0x14a   :  { %v4536_v63 = vpop.permute.xlu0 %768 }
 0x14b   :  { %v775_v50 = vsel %vm772_vm5, %v4534_v54, %v4536_v63 }
 0x14c   :  { %v785_v2 = vadd.f32 %v775_v50, %v746_v44 }
 0x14d   :  { %v4538_v41 = vpop.permute.xlu1 %770 }
 0x14e   :  { %v4540_v46 = vpop.permute.xlu0 %764  ;;  %v776_v7 = vsel %vm772_vm5, %v4536_v63, %v4538_v41 }
 0x14f   :  { %v774_v49 = vsel %vm772_vm5, %v4540_v46, %v4534_v54  ;;  %v786_v14 = vadd.f32 %v776_v7, %v747_v58 }
 0x150   :  { %v784_v54 = vadd.f32 %v774_v49, %v745_v20 }
 0x151   :  { %v4542_v12 = vpop.permute.xlu1 %805 }
 0x152   :  { %v4544_v56 = vpop.permute.xlu0 %807 }
 0x153   :  { %v813_v35 = vsel %vm772_vm5, %v4542_v12, %v4544_v56 }
 0x154   :  { %v823_v51 = vadd.f32 %v813_v35, %v785_v2 }
 0x155   :  { %v4552_v29 = vpop.permute.xlu1 %809 }
 0x156   :  { %v4555_v10 = vpop.permute.xlu0 %803  ;;  %v814_v3 = vsel %vm772_vm5, %v4544_v56, %v4552_v29 }
 0x157   :  { %v812_v63 = vsel %vm772_vm5, %v4555_v10, %v4542_v12  ;;  %v824_v19 = vadd.f32 %v814_v3, %v786_v14 }
 0x158   :  { %v822_v42 = vadd.f32 %v812_v63, %v784_v54 }
 0x159   :  { %v4571_v34 = vpop.permute.xlu1 %843 }
 0x15a   :  { %v4574_v0 = vpop.permute.xlu0 %845 }
 0x15b   :  { %v852_v40 = vsel %vm849_vm6, %v4571_v34, %v4574_v0 }
 0x15c   :  { %v862_v18 = vadd.f32 %v852_v40, %v823_v51 }
 0x15d   :  { %v848_v26 = vpop.permute.xlu1 %847 }
 0x15e   :  { %v4590_v22 = vpop.permute.xlu0 %841  ;;  %v853_v43 = vsel %vm849_vm6, %v4574_v0, %v848_v26 }
 0x15f   :  { %v851_v56 = vsel %vm849_vm6, %v4590_v22, %v4571_v34  ;;  %v863_v5 = vadd.f32 %v853_v43, %v824_v19 }
 0x160   :  { %v861_v16 = vadd.f32 %v851_v56, %v822_v42 }
 0x161   :  { %v883_v4 = vpop.permute.xlu1 %882 }
 0x162   :  { %v885_v6 = vpop.permute.xlu0 %884 }
 0x163   :  { %v890_v41 = vsel %vm849_vm6, %v883_v4, %v885_v6 }
 0x164   :  { %v900_v62 = vadd.f32 %v890_v41, %v862_v18 }
 0x165   :  { %v887_v53 = vpop.permute.xlu1 %886 }
 0x166   :  { %v4623_v1 = vpop.permute.xlu0 %880  ;;  %v891_v12 = vsel %vm849_vm6, %v885_v6, %v887_v53 }
 0x167   :  { %v889_v55 = vsel %vm849_vm6, %v4623_v1, %v883_v4  ;;  %v901_v17 = vadd.f32 %v891_v12, %v863_v5 }
 0x168   :  { %v899_v15 = vadd.f32 %v889_v55, %v861_v16 }
 0x169   :  { %v921_v52 = vpop.permute.xlu1 %920 }
 0x16a   :  { %v923_v9 = vpop.permute.xlu0 %922 }
 0x16b   :  { %v929_v29 = vsel %vm926_vm7, %v921_v52, %v923_v9 }
 0x16c   :  { %v939_v0 = vadd.f32 %v929_v29, %v900_v62 }
 0x16d   :  { %v925_v38 = vpop.permute.xlu1 %924 }
 0x16e   :  { %v4659_v59 = vpop.permute.xlu0 %918  ;;  %v930_v26 = vsel %vm926_vm7, %v923_v9, %v925_v38 }
 0x16f   :  { %v928_v34 = vsel %vm926_vm7, %v4659_v59, %v921_v52  ;;  %v940_v37 = vadd.f32 %v930_v26, %v901_v17 }
 0x170   :  { %v938_v53 = vadd.f32 %v928_v34, %v899_v15 }
 0x171   :  { %v960_v50 = vpop.permute.xlu1 %959 }
 0x172   :  { %v962_v44 = vpop.permute.xlu0 %961 }
 0x173   :  { %v967_v47 = vsel %vm926_vm7, %v960_v50, %v962_v44 }
 0x174   :  { %v977_v35 = vadd.f32 %v967_v47, %v939_v0 }
 0x175   :  { %v964_v6 = vpop.permute.xlu1 %963 }
 0x176   :  { %v982_v2 = vmax.f32 %v977_v35, 0.0  ;;  %v968_v4 = vsel %vm926_vm7, %v962_v44, %v964_v6  ;;  %v4673_v7 = vpop.permute.xlu0 %957 }
 0x177   :  { %v978_v58 = vadd.f32 %v968_v4, %v940_v37  ;;  %v966_v9 = vsel %vm926_vm7, %v4673_v7, %v960_v50 }
 0x178   :  { %v976_v49 = vadd.f32 %v966_v9, %v938_v53  ;;  %995 = vrot.lane.b32.xlu1 %v982_v2, %s3966_s23 }
 0x179   :  { %v983_v52 = vmax.f32 %v978_v58, 0.0  ;;  %v222_v40 = vpop.permute.xlu1 %221 }
 0x17a   :  { %v981_v20 = vmax.f32 %v976_v49, 0.0  ;;  %v220_v51 = vpop.permute.xlu0 %219  ;;  %v231_v54 = vsel %vm229_vm0, %v222_v40, %v4424_v27 }
 0x17b   :  { %997 = vrot.lane.b32.xlu0 %v983_v52, %s3966_s23  ;;  %v230_v38 = vsel %vm229_vm0, %v220_v51, %v222_v40  ;;  %v240_v42 = vadd.f32 %v231_v54, %v4328_v28 }
 0x17c   :  { %993 = vrot.lane.b32.xlu1 %v981_v20, %s3966_s23  ;;  %v239_v19 = vadd.f32 %v230_v38, %v4331_v45 }
 0x17d   :  { %v261_v3 = vpop.permute.xlu1 %260 }
 0x17e   :  { %v259_v14 = vpop.permute.xlu0 %258  ;;  %v269_v56 = vsel %vm229_vm0, %v261_v3, %v4438_v23 }
 0x17f   :  { %v268_v18 = vsel %vm229_vm0, %v259_v14, %v261_v3  ;;  %v278_v55 = vadd.f32 %v269_v56, %v240_v42 }
 0x180   :  { %v277_v12 = vadd.f32 %v268_v18, %v239_v19 }
 0x181   :  { %v299_v63 = vpop.permute.xlu1 %298 }
 0x182   :  { %v297_v41 = vpop.permute.xlu0 %296  ;;  %v308_v5 = vsel %vm306_vm1, %v299_v63, %v4458_v11 }
 0x183   :  { %v307_v62 = vsel %vm306_vm1, %v297_v41, %v299_v63  ;;  %v317_v26 = vadd.f32 %v308_v5, %v278_v55 }
 0x184   :  { %v316_v16 = vadd.f32 %v307_v62, %v277_v12 }
 0x185   :  { %v338_v43 = vpop.permute.xlu1 %337 }
 0x186   :  { %v336_v29 = vpop.permute.xlu0 %335  ;;  %v346_v45 = vsel %vm306_vm1, %v338_v43, %v4473_v8 }
 0x187   :  { %v345_v27 = vsel %vm306_vm1, %v336_v29, %v338_v43  ;;  %v355_v17 = vadd.f32 %v346_v45, %v317_v26 }
 0x188   :  { %v354_v44 = vadd.f32 %v345_v27, %v316_v16 }
 0x189   :  { %v376_v50 = vpop.permute.xlu1 %375 }
 0x18a   :  { %v374_v0 = vpop.permute.xlu0 %373  ;;  %v385_v28 = vsel %vm383_vm2, %v376_v50, %v4486_v60 }
 0x18b   :  { %v384_v23 = vsel %vm383_vm2, %v374_v0, %v376_v50  ;;  %v394_v35 = vadd.f32 %v385_v28, %v355_v17 }
 0x18c   :  { %v393_v47 = vadd.f32 %v384_v23, %v354_v44 }
 0x18d   :  { %v415_v34 = vpop.permute.xlu1 %414 }
 0x18e   :  { %v423_v11 = vsel %vm383_vm2, %v415_v34, %v4497_v61  ;;  %v413_v15 = vpop.permute.xlu0 %412 }
 0x18f   :  { %v422_v37 = vsel %vm383_vm2, %v413_v15, %v415_v34  ;;  %v432_v8 = vadd.f32 %v423_v11, %v394_v35  ;;  %v5744_v34 = vmov 0.0  }
 0x190   :  { %v431_v6 = vadd.f32 %v422_v37, %v393_v47 }
 0x191   :  { %v487_v53 = vpop.permute.xlu1 %486 }
 0x192   :  { %v495_v2 = vsel %vm494_vm3, %v487_v53, %v4510_v57  ;;  %v503_v4 = vadd.f32 %v487_v53, %v431_v6  ;;  %v557_v58 = vpop.permute.xlu0 %556  ;;  %v4775_v6 = vld [vmem:[%s5714_s10 + $0x8] sm:$0xff]  ;;  %v5745_v53 = vmov 2  }
 0x193   :  { %v504_v9 = vadd.f32 %v495_v2, %v432_v8  ;;  %v564_v60 = vsel %vm494_vm3, %v557_v58, %v4516_v39  ;;  %v4780_v8 = vld [vmem:[%s5714_s10] sm:$0xff]  ;;  %v5746_v2 = vmov 3  }
 0x194   :  { %v572_v49 = vadd.f32 %v557_v58, %v503_v4  ;;  %v5747_v4 = vmov 4  }
 0x195   :  { %v573_v52 = vadd.f32 %v564_v60, %v504_v9  ;;  %v641_v40 = vpop.permute.xlu1 %640 }
 0x196   :  { %v651_v61 = vsel %vm650_vm4, %v641_v40, %v4524_v21  ;;  %v660_v20 = vadd.f32 %v641_v40, %v572_v49  ;;  %v725_v51 = vpop.permute.xlu0 %724 }
 0x197   :  { %v661_v3 = vadd.f32 %v651_v61, %v573_v52  ;;  %v734_v14 = vsel %vm650_vm4, %v725_v51, %v4532_v13 }
 0x198   :  { %v743_v63 = vadd.f32 %v725_v51, %v660_v20 }
 0x199   :  { %v744_v57 = vadd.f32 %v734_v14, %v661_v3  ;;  %v763_v41 = vpop.permute.xlu1 %762 }
 0x19a   :  { %v773_v38 = vsel %vm772_vm5, %v763_v41, %v4540_v46  ;;  %v782_v54 = vadd.f32 %v763_v41, %v743_v63  ;;  %v802_v39 = vpop.permute.xlu0 %801 }
 0x19b   :  { %v783_v18 = vadd.f32 %v773_v38, %v744_v57  ;;  %v811_v43 = vsel %vm772_vm5, %v802_v39, %v4555_v10 }
 0x19c   :  { %v820_v19 = vadd.f32 %v802_v39, %v782_v54 }
 0x19d   :  { %v821_v21 = vadd.f32 %v811_v43, %v783_v18  ;;  %v840_v56 = vpop.permute.xlu1 %839 }
 0x19e   :  { %v850_v29 = vsel %vm849_vm6, %v840_v56, %v4590_v22  ;;  %v859_v42 = vadd.f32 %v840_v56, %v820_v19  ;;  %v879_v13 = vpop.permute.xlu0 %878 }
 0x19f   :  { %v860_v62 = vadd.f32 %v850_v29, %v821_v21  ;;  %v888_v12 = vsel %vm849_vm6, %v879_v13, %v4623_v1 }
 0x1a0   :  { %v897_v5 = vadd.f32 %v879_v13, %v859_v42 }
 0x1a1   :  { %v898_v46 = vadd.f32 %v888_v12, %v860_v62  ;;  %v917_v55 = vpop.permute.xlu1 %916 }
 0x1a2   :  { %v927_v27 = vsel %vm926_vm7, %v917_v55, %v4659_v59  ;;  %v936_v50 = vadd.f32 %v917_v55, %v897_v5  ;;  %v956_v10 = vpop.permute.xlu0 %955 }
 0x1a3   :  { %v937_v16 = vadd.f32 %v927_v27, %v898_v46  ;;  %v965_v45 = vsel %vm926_vm7, %v956_v10, %v4673_v7 }
 0x1a4   :  { %v974_v0 = vadd.f32 %v956_v10, %v936_v50 }
 0x1a5   :  { %v975_v22 = vadd.f32 %v965_v45, %v937_v16 }
 0x1a6   :  { %v979_v26 = vmax.f32 %v974_v0, 0.0 }
 0x1a7   :  { %v980_v23 = vmax.f32 %v975_v22, 0.0 }
 0x1a8   :  { %989 = vrot.lane.b32.xlu1 %v979_v26, %s3966_s23 }
 0x1a9   :  { %991 = vrot.lane.b32.xlu0 %v980_v23, %s3966_s23 }
 0x1ea   :  { %v996_v1 = vpop.permute.xlu1 %995 }
 0x1ed   :  { %v998_v44 = vpop.permute.xlu0 %997 }
 0x1ee   :  { %v1003_v28 = vsel %vm999_vm8, %v996_v1, %v998_v44  ;;  %v994_v59 = vpop.permute.xlu1 %993 }
 0x1ef   :  { %v4724_v17 = vsel %vm999_vm8, %v994_v59, %v996_v1  ;;  %v3746_v47 = vpack.i.bf16 %v5744_v34, %v1003_v28 }
 0x1f0   :  { %1034 = vrot.lane.b32.xlu1 %v4724_v17, %s3958_s15 }
 0x1f1   :  { %3747 = vrot.lane.b32.xlu0 %v3746_v47, %s3958_s15 }
 0x1f4   :  { %3757 = vrot.lane.b32.xlu1 %v3746_v47, %s3960_s17 }
 0x1f5   :  { %3752 = vrot.lane.b32.xlu0 %v3746_v47, %s3959_s16 }
 0x1f8   :  { %1098 = vrot.lane.b32.xlu1 %v4724_v17, %s3960_s17 }
 0x1f9   :  { %1066 = vrot.lane.b32.xlu0 %v4724_v17, %s3959_s16 }
 0x1fc   :  { %3767 = vrot.lane.b32.xlu1 %v3746_v47, %s3962_s19 }
 0x1fd   :  { %3762 = vrot.lane.b32.xlu0 %v3746_v47, %s3961_s18 }
 0x200   :  { %1162 = vrot.lane.b32.xlu1 %v4724_v17, %s3962_s19 }
 0x201   :  { %1130 = vrot.lane.b32.xlu0 %v4724_v17, %s3961_s18 }
 0x204   :  { %3777 = vrot.lane.b32.xlu1 %v3746_v47, %s3964_s21 }
 0x205   :  { %3772 = vrot.lane.b32.xlu0 %v3746_v47, %s3963_s20 }
 0x208   :  { %1226 = vrot.lane.b32.xlu1 %v4724_v17, %s3964_s21 }
 0x209   :  { %1194 = vrot.lane.b32.xlu0 %v4724_v17, %s3963_s20 }
 0x20c   :  { %1262 = vrot.lane.b32.xlu1 %v5744_v34, %s3965_s22 }
 0x20d   :  { %1260 = vrot.lane.b32.xlu0 %v1003_v28, %s3965_s22 }
 0x211   :  { %1258 = vrot.lane.b32.xlu0 %v4724_v17, %s3965_s22 }
 0x21a   :  { %v990_v7 = vpop.permute.xlu1 %989 }
 0x21b   :  { %v992_v11 = vpop.permute.xlu0 %991 }
 0x21c   :  { %v4754_v15 = vsel %vm999_vm8, %v990_v7, %v992_v11  ;;  %v4757_v35 = vsel %vm999_vm8, %v992_v11, %v994_v59 }
 0x21d   :  { %v3786_v37 = vpack.i.bf16 %v4754_v15, %v4757_v35 }
 0x21f   :  { %3787 = vrot.lane.b32.xlu0 %v3786_v37, %s3959_s16  ;;  %3782 = vrot.lane.b32.xlu1 %v3786_v37, %s3958_s15  ;;  %s3971_s16 = smov 1  }
 0x223   :  { %3797 = vrot.lane.b32.xlu0 %v3786_v37, %s3961_s18  ;;  %3792 = vrot.lane.b32.xlu1 %v3786_v37, %s3960_s17  ;;  %s3972_s18 = smov 121  }
 0x227   :  { %3807 = vrot.lane.b32.xlu0 %v3786_v37, %s3963_s20  ;;  %3802 = vrot.lane.b32.xlu1 %v3786_v37, %s3962_s19  ;;  %s3973_s19 = smov 120   ;;  %s3974_s20 = smov 119  }
 0x22b   :  { %1256 = vrot.lane.b32.xlu0 %v4757_v35, %s3965_s22  ;;  %3812 = vrot.lane.b32.xlu1 %v3786_v37, %s3964_s21 }
 0x22f   :  { %1254 = vrot.lane.b32.xlu1 %v4754_v15, %s3965_s22  ;;  %1318 = vperm.xlu0 %3816, %v4780_v8  }
 0x233   :  { %1323 = vperm.xlu1 %3745, %v4775_v6   ;;  %3818 = vset.pattern.permute.xlu0 %v5746_v2 }
 0x234   :  { %1512 = vperm.xlu0 %3818, %v4780_v8  }
 0x237   :  { %3817 = vset.pattern.permute.xlu1 %v5745_v53 }
 0x238   :  { %1496 = vperm.xlu1 %3817, %v4780_v8   ;;  %3870 = vset.pattern.permute.xlu0 %v5747_v4 }
 0x23c   :  { %1500 = vperm.xlu1 %3817, %v4775_v6  }
 0x240   :  { %3819 = vset.pattern.permute.xlu1 %v5746_v2 }
 0x241   :  { %1516 = vperm.xlu1 %3819, %v4775_v6  }
 0x245   :  { %3871 = vset.pattern.permute.xlu1 %v5747_v4 }
 0x262   :  { %v4793_v58 = vpop.permute.xlu1 %1034 }
 0x263   :  { %v3748_v9 = vpop.permute.xlu0 %3747 }
 0x264   :  { %v3750_v60 = vunpack.i.h.bf16 %v3748_v9  ;;  %v3749_v49 = vunpack.i.l.bf16 %v3748_v9 }
 0x266   :  { %v3758_v52 = vpop.permute.xlu1 %3757  ;;  %v1043_v40 = vsel %vm229_vm0, %v3749_v49, %v3750_v60  ;;  %v1042_v61 = vsel %vm229_vm0, %v4793_v58, %v3749_v49 }
 0x267   :  { %v3760_v20 = vunpack.i.h.bf16 %v3758_v52  ;;  %v3759_v51 = vunpack.i.l.bf16 %v3758_v52  ;;  %v3753_v3 = vpop.permute.xlu0 %3752  ;;  %v3608_v14 = vpack.c.bf16 %v1043_v40, %v1003_v28  ;;  %v3610_v63 = vpack.c.bf16 %v1042_v61, %v4724_v17  ;;  %v4835_v52 = vld [vmem:[%s5708_s4] sm:$0xff]  ;;  %v1277_v61 = vld [vmem:[%s5708_s4 + $0x8] sm:$0xff] }
 0x268   :  { %v3755_v57 = vunpack.i.h.bf16 %v3753_v3  ;;  %v3754_v41 = vunpack.i.l.bf16 %v3753_v3 }
 0x269   :  { %3609 = vmatprep.subr.bf16.mxu1 %v3608_v14  ;;  %v1107_v38 = vsel %vm383_vm2, %v3759_v51, %v3760_v20 }
 0x26a   :  { %3611 = vmatpush1.bf16.msra.mxu1 %v3610_v63  ;;  %v4800_v54 = vpop.permute.xlu1 %1098  ;;  %v1075_v39 = vsel %vm306_vm1, %v3754_v41, %v3755_v57 }
 0x26b   :  { %v1106_v18 = vsel %vm383_vm2, %v4800_v54, %v3759_v51  ;;  %v4805_v43 = vpop.permute.xlu0 %1066  ;;  %v3612_v19 = vpack.c.bf16 %v1107_v38, %v1075_v39 }
 0x26c   :  { %v1074_v21 = vsel %vm306_vm1, %v4805_v43, %v3754_v41 }
 0x26d   :  { %3613 = vmatprep.subr.bf16.mxu1 %v3612_v19  ;;  %v3614_v56 = vpack.c.bf16 %v1106_v18, %v1074_v21 }
 0x26e   :  { %v3768_v29 = vpop.permute.xlu1 %3767 }
 0x26f   :  { %v3770_v42 = vunpack.i.h.bf16 %v3768_v29  ;;  %v3769_v13 = vunpack.i.l.bf16 %v3768_v29  ;;  %v3763_v62 = vpop.permute.xlu0 %3762  ;;  %3615 = vmatpush1.bf16.msra.mxu1 %v3614_v56 }
 0x270   :  { %v3765_v12 = vunpack.i.h.bf16 %v3763_v62  ;;  %v3764_v5 = vunpack.i.l.bf16 %v3763_v62 }
 0x271   :  { %v1171_v46 = vsel %vm650_vm4, %v3769_v13, %v3770_v42 }
 0x272   :  { %v4810_v55 = vpop.permute.xlu1 %1162  ;;  %v1139_v27 = vsel %vm494_vm3, %v3764_v5, %v3765_v12 }
 0x273   :  { %v1170_v50 = vsel %vm650_vm4, %v4810_v55, %v3769_v13  ;;  %v4815_v10 = vpop.permute.xlu0 %1130  ;;  %v3616_v16 = vpack.c.bf16 %v1171_v46, %v1139_v27 }
 0x274   :  { %v1138_v45 = vsel %vm494_vm3, %v4815_v10, %v3764_v5 }
 0x275   :  { %3617 = vmatprep.subr.bf16.mxu1 %v3616_v16  ;;  %v3618_v0 = vpack.c.bf16 %v1170_v50, %v1138_v45 }
 0x276   :  { %v3778_v22 = vpop.permute.xlu1 %3777 }
 0x277   :  { %v3780_v26 = vunpack.i.h.bf16 %v3778_v22  ;;  %v3779_v23 = vunpack.i.l.bf16 %v3778_v22  ;;  %v3773_v1 = vpop.permute.xlu0 %3772  ;;  %3619 = vmatpush1.bf16.msra.mxu1 %v3618_v0 }
 0x278   :  { %v3775_v44 = vunpack.i.h.bf16 %v3773_v1  ;;  %v3774_v28 = vunpack.i.l.bf16 %v3773_v1 }
 0x279   :  { %v1235_v59 = vsel %vm849_vm6, %v3779_v23, %v3780_v26 }
 0x27a   :  { %v4820_v17 = vpop.permute.xlu1 %1226  ;;  %v1203_v47 = vsel %vm772_vm5, %v3774_v28, %v3775_v44 }
 0x27b   :  { %v1234_v7 = vsel %vm849_vm6, %v4820_v17, %v3779_v23  ;;  %v4825_v11 = vpop.permute.xlu0 %1194  ;;  %v3620_v37 = vpack.c.bf16 %v1235_v59, %v1203_v47 }
 0x27c   :  { %v1202_v53 = vsel %vm772_vm5, %v4825_v11, %v3774_v28 }
 0x27d   :  { %3621 = vmatprep.subr.bf16.mxu1 %v3620_v37  ;;  %v3622_v2 = vpack.c.bf16 %v1234_v7, %v1202_v53 }
 0x27e   :  { %v1263_v4 = vpop.permute.xlu1 %1262 }
 0x27f   :  { %v1261_v9 = vpop.permute.xlu0 %1260  ;;  %3623 = vmatpush1.bf16.msra.mxu1 %v3622_v2 }
 0x280   :  { %v1267_v60 = vsel %vm926_vm7, %v1261_v9, %v1263_v4 }
 0x281   :  { %1426 = vmatprep.subr.mxu1 %v1267_v60 }
 0x283   :  { %v4830_v49 = vpop.permute.xlu0 %1258 }
 0x284   :  { %v1266_v40 = vsel %vm926_vm7, %v4830_v49, %v1261_v9 }
 0x285   :  { %1427 = vmatpush1.msra.mxu1 %v1266_v40 }
 0x286   :  { %3501 = vmatmul.mubr.msk.f32.vlgmr.msra.gmra.mrb[0].mxu1 %vm1326_vm9, %v4835_v52 }
 0x287   :  { %1480 = vmatprep.mubr.f32.mxu1 %v5744_v34 }
 0x28a   :  { %3502 = vmatmul.mubr.msk.f32.gmra.mrb[2].mxu1 %vm1326_vm9, %v1277_v61 }
 0x291   :  { %v3788_v20 = vpop.permute.xlu0 %3787  ;;  %v3783_v51 = vpop.permute.xlu1 %3782 }
 0x292   :  { %v3785_v3 = vunpack.i.h.bf16 %v3783_v51  ;;  %v3784_v14 = vunpack.i.l.bf16 %v3783_v51  ;;  %v3790_v63 = vunpack.i.h.bf16 %v3788_v20  ;;  %v3789_v57 = vunpack.i.l.bf16 %v3788_v20 }
 0x294   :  { %v1041_v41 = vsel %vm229_vm0, %v3784_v14, %v4793_v58  ;;  %v1040_v38 = vsel %vm229_vm0, %v3785_v3, %v3784_v14  ;;  %v1073_v62 = vsel %vm306_vm1, %v3789_v57, %v4805_v43  ;;  %v1072_v12 = vsel %vm306_vm1, %v3790_v63, %v3789_v57 }
 0x295   :  { %v3798_v39 = vpop.permute.xlu0 %3797  ;;  %v3793_v18 = vpop.permute.xlu1 %3792  ;;  %v3592_v19 = vpack.c.bf16 %v1041_v41, %v4757_v35  ;;  %v3594_v21 = vpack.c.bf16 %v1040_v38, %v4754_v15  ;;  %vm1965_vm1 = vcmask 990208  }
 0x296   :  { %v3795_v56 = vunpack.i.h.bf16 %v3793_v18  ;;  %v3794_v29 = vunpack.i.l.bf16 %v3793_v18  ;;  %v3800_v42 = vunpack.i.h.bf16 %v3798_v39  ;;  %v3799_v13 = vunpack.i.l.bf16 %v3798_v39 }
 0x297   :  { %3593 = vmatprep.subr.bf16.mxu0 %v3592_v19 }
 0x298   :  { %3595 = vmatpush1.bf16.msra.mxu0 %v3594_v21  ;;  %v1105_v58 = vsel %vm383_vm2, %v3794_v29, %v4800_v54  ;;  %v1104_v5 = vsel %vm383_vm2, %v3795_v56, %v3794_v29  ;;  %v1137_v45 = vsel %vm494_vm3, %v3799_v13, %v4815_v10  ;;  %v1136_v0 = vsel %vm494_vm3, %v3800_v42, %v3799_v13 }
 0x299   :  { %v3808_v46 = vpop.permute.xlu0 %3807  ;;  %v3803_v35 = vpop.permute.xlu1 %3802  ;;  %v3596_v27 = vpack.c.bf16 %v1105_v58, %v1073_v62  ;;  %v3598_v15 = vpack.c.bf16 %v1104_v5, %v1072_v12  ;;  %vm1997_vm3 = vcmask 973824  }
 0x29a   :  { %v3805_v50 = vunpack.i.h.bf16 %v3803_v35  ;;  %v3804_v16 = vunpack.i.l.bf16 %v3803_v35  ;;  %v3810_v43 = vunpack.i.h.bf16 %v3808_v46  ;;  %v3809_v22 = vunpack.i.l.bf16 %v3808_v46 }
 0x29b   :  { %3597 = vmatprep.subr.bf16.mxu0 %v3596_v27 }
 0x29c   :  { %3599 = vmatpush1.bf16.msra.mxu0 %v3598_v15  ;;  %v1169_v54 = vsel %vm650_vm4, %v3804_v16, %v4810_v55  ;;  %v1168_v26 = vsel %vm650_vm4, %v3805_v50, %v3804_v16  ;;  %v1201_v10 = vsel %vm772_vm5, %v3809_v22, %v4825_v11  ;;  %v1200_v7 = vsel %vm772_vm5, %v3810_v43, %v3809_v22 }
 0x29d   :  { %v3813_v23 = vpop.permute.xlu1 %3812  ;;  %v3600_v1 = vpack.c.bf16 %v1169_v54, %v1137_v45  ;;  %v3602_v44 = vpack.c.bf16 %v1168_v26, %v1136_v0  ;;  %v1257_v55 = vpop.permute.xlu0 %1256  ;;  %vm3483_vm4 = vcmask 1040384   ;;  %vm3492_vm5 = vcmask 9216  }
 0x29e   :  { %v3815_v28 = vunpack.i.h.bf16 %v3813_v23  ;;  %v3814_v59 = vunpack.i.l.bf16 %v3813_v23  ;;  %v1265_v9 = vsel %vm926_vm7, %v1257_v55, %v4830_v49 }
 0x29f   :  { %3601 = vmatprep.subr.bf16.mxu0 %v3600_v1 }
 0x2a0   :  { %3603 = vmatpush1.bf16.msra.mxu0 %v3602_v44  ;;  %v1233_v47 = vsel %vm849_vm6, %v3814_v59, %v4820_v17  ;;  %v1232_v37 = vsel %vm849_vm6, %v3815_v28, %v3814_v59 }
 0x2a1   :  { %v3604_v53 = vpack.c.bf16 %v1233_v47, %v1201_v10  ;;  %v3606_v2 = vpack.c.bf16 %v1232_v37, %v1200_v7  ;;  %v1255_v4 = vpop.permute.xlu1 %1254 }
 0x2a2   :  { %v1264_v60 = vsel %vm926_vm7, %v1255_v4, %v1257_v55  ;;  %v1689_v55 = vld [vmem:[%s5705_s1 + $0x80] sm:$0xff] }
 0x2a3   :  { %3605 = vmatprep.subr.bf16.mxu0 %v3604_v53  ;;  %v1690_v53 = vld [vmem:[%s5705_s1 + $0x88] sm:$0xff] }
 0x2a4   :  { %3607 = vmatpush1.bf16.msra.mxu0 %v3606_v2  ;;  %v1673_v2 = vld [vmem:[%s5705_s1] sm:$0xff] }
 0x2a5   :  { %1349 = vmatprep.subr.mxu0 %v1265_v9  ;;  %v3624_v9 = vpack.c.bf16 %v1690_v53, %v1689_v55  ;;  %v1687_v55 = vld [vmem:[%s5705_s1 + $0x70] sm:$0xff]  ;;  %v1688_v53 = vld [vmem:[%s5705_s1 + $0x78] sm:$0xff] }
 0x2a7   :  { %3657 = vmatprep.subr.bf16.mxu1 %v3624_v9 }
 0x2a8   :  { %1350 = vmatpush1.msra.mxu0 %v1264_v60  ;;  %v1674_v60 = vld [vmem:[%s5705_s1 + $0x8] sm:$0xff] }
 0x2a9   :  { %3499 = vmatmul.mubr.msk.f32.vlgmr.msra.gmra.mrb[0].mxu0 %vm1326_vm9, %v4835_v52  ;;  %3625 = vmatprep.subr.bf16.mxu0 %v3624_v9  ;;  %v3654_v9 = vpack.c.bf16 %v1688_v53, %v1687_v55 }
 0x2aa   :  { %1403 = vmatprep.mubr.f32.mxu0 %v5744_v34 }
 0x2ad   :  { %3500 = vmatmul.mubr.msk.f32.gmra.mrb[2].mxu0 %vm1326_vm9, %v1277_v61 }
 0x2ae   :  { %v1319_v40 = vpop.permute.xlu0 %1318 }
 0x2b2   :  { %v1324_v17 = vpop.permute.xlu1 %1323 }
 0x2b3   :  { %v1513_v18 = vpop.permute.xlu0 %1512 }
 0x2b7   :  { %v1497_v11 = vpop.permute.xlu1 %1496 }
 0x2bb   :  { %v1501_v57 = vpop.permute.xlu1 %1500 }
 0x2c0   :  { %v1517_v42 = vpop.permute.xlu1 %1516 }
 0x359   :  { %v1476_v20 = vpop.f32.mrb[0].mxu1 }
 0x35a   :  { %v1477_v51 = vadd.f32 %v1476_v20, %v1319_v40  ;;  %v1478_v3 = vpop.f32.mrb[1].mxu1  ;;  %v3626_v20 = vpack.c.bf16 %v1674_v60, %v1673_v2 }
 0x35b   :  { %v1479_v14 = vadd.f32 %v1478_v3, %v1319_v40  ;;  %v1675_v3 = vld [vmem:[%s5705_s1 + $0x10] sm:$0xff] }
 0x35c   :  { %v1489_v63 = vmax.f32 %v1477_v51, 0.0  ;;  %3659 = vmatpush3.bf16.msra.mxu1 %v3626_v20  ;;  %3627 = vmatpush3.bf16.msra.mxu0 %v3626_v20 }
 0x35d   :  { %v1490_v49 = vmax.f32 %v1479_v14, 0.0  ;;  %v1482_v41 = vpop.f32.mrb[2].mxu1  ;;  %v1676_v14 = vld [vmem:[%s5705_s1 + $0x18] sm:$0xff] }
 0x35e   :  { %v1483_v38 = vadd.f32 %v1482_v41, %v1324_v17  ;;  %v1484_v39 = vpop.f32.mrb[3].mxu1  ;;  %v1505_v56 = vmul.f32 %v1497_v11, %v1489_v63  ;;  %v1693_v63 = vld [vmem:[%s5705_s1 + $0xa0] sm:$0xff]  ;;  %v3630_v41 = vpack.c.bf16 %v1676_v14, %v1675_v3 }
 0x35f   :  { %v1506_v19 = vmul.f32 %v1497_v11, %v1490_v49  ;;  %v1485_v52 = vadd.f32 %v1484_v39, %v1324_v17  ;;  %v1694_v49 = vld [vmem:[%s5705_s1 + $0xa8] sm:$0xff]  ;;  %v1677_v39 = vld [vmem:[%s5705_s1 + $0x20] sm:$0xff] }
 0x360   :  { %v1493_v21 = vmax.f32 %v1483_v38, 0.0  ;;  %v4882_v5 = vadd.f32 %v1513_v18, %v1505_v56  ;;  %v3632_v38 = vpack.c.bf16 %v1694_v49, %v1693_v63 }
 0x361   :  { %v1494_v29 = vmax.f32 %v1485_v52, 0.0  ;;  %v4876_v61 = vadd.f32 %v1513_v18, %v1506_v19  ;;  %v1695_v19 = vld [vmem:[%s5705_s1 + $0xb0] sm:$0xff]  ;;  %v1696_v52 = vld [vmem:[%s5705_s1 + $0xb8] sm:$0xff] }
 0x362   :  { %v1509_v13 = vmul.f32 %v1501_v57, %v1493_v21  ;;  %v3636_v56 = vpack.c.bf16 %v1696_v52, %v1695_v19 }
 0x363   :  { %v1510_v62 = vmul.f32 %v1501_v57, %v1494_v29  ;;  %v3820_v58 = vpack.i.bf16 %v5744_v34, %v4876_v61  ;;  %v1679_v29 = vld [vmem:[%s5705_s1 + $0x30] sm:$0xff] }
 0x364   :  { %v4880_v12 = vadd.f32 %v1517_v42, %v1509_v13  ;;  %v1697_v13 = vld [vmem:[%s5705_s1 + $0xc0] sm:$0xff] }
 0x365   :  { %v4884_v46 = vadd.f32 %v1517_v42, %v1510_v62  ;;  %3821 = vrot.lane.b32.xlu0 %v3820_v58, %s3958_s15  ;;  %v1698_v62 = vld [vmem:[%s5705_s1 + $0xc8] sm:$0xff] }
 0x366   :  { %v3830_v35 = vpack.i.bf16 %v4880_v12, %v5744_v34 }
 0x367   :  { %v3825_v27 = vpack.i.bf16 %v4884_v46, %v4882_v5 }
 0x369   :  { %3831 = vrot.lane.b32.xlu0 %v3830_v35, %s3958_s15  ;;  %3826 = vrot.lane.b32.xlu1 %v3825_v27, %s3958_s15  ;;  %v3640_v35 = vpack.c.bf16 %v1698_v62, %v1697_v13  ;;  %v1681_v27 = vld [vmem:[%s5705_s1 + $0x40] sm:$0xff] }
 0x37c   :  { %v1399_v15 = vpop.f32.mrb[0].mxu0 }
 0x37d   :  { %v1400_v50 = vadd.f32 %v1399_v15, %v1319_v40  ;;  %v1401_v16 = vpop.f32.mrb[1].mxu0  ;;  %v1682_v15 = vld [vmem:[%s5705_s1 + $0x48] sm:$0xff] }
 0x37e   :  { %v1402_v45 = vadd.f32 %v1401_v16, %v1319_v40  ;;  %v1700_v16 = vld [vmem:[%s5705_s1 + $0xd8] sm:$0xff] }
 0x37f   :  { %v1487_v0 = vmax.f32 %v1400_v50, 0.0  ;;  %v1699_v50 = vld [vmem:[%s5705_s1 + $0xd0] sm:$0xff] }
 0x380   :  { %v1488_v43 = vmax.f32 %v1402_v45, 0.0  ;;  %v1405_v22 = vpop.f32.mrb[2].mxu0  ;;  %v3642_v45 = vpack.c.bf16 %v1682_v15, %v1681_v27 }
 0x381   :  { %v1503_v54 = vmul.f32 %v1497_v11, %v1487_v0  ;;  %v1406_v26 = vadd.f32 %v1405_v22, %v1324_v17  ;;  %v1407_v23 = vpop.f32.mrb[3].mxu0  ;;  %v3644_v0 = vpack.c.bf16 %v1700_v16, %v1699_v50  ;;  %v1684_v22 = vld [vmem:[%s5705_s1 + $0x58] sm:$0xff] }
 0x382   :  { %v1504_v1 = vmul.f32 %v1497_v11, %v1488_v43  ;;  %v1408_v44 = vadd.f32 %v1407_v23, %v1324_v17  ;;  %v1691_v17 = vld [vmem:[%s5705_s1 + $0x90] sm:$0xff]  ;;  %v1692_v11 = vld [vmem:[%s5705_s1 + $0x98] sm:$0xff]  ;;  %v1702_v23 = vld [vmem:[%s5705_s1 + $0xe8] sm:$0xff] }
 0x383   :  { %v4893_v34 = vadd.f32 %v1513_v18, %v1503_v54  ;;  %v1491_v28 = vmax.f32 %v1406_v26, 0.0  ;;  %v3628_v51 = vpack.c.bf16 %v1692_v11, %v1691_v17  ;;  %v1683_v43 = vld [vmem:[%s5705_s1 + $0x50] sm:$0xff]  ;;  %v1701_v26 = vld [vmem:[%s5705_s1 + $0xe0] sm:$0xff] }
 0x384   :  { %v4895_v59 = vadd.f32 %v1513_v18, %v1504_v1  ;;  %v1492_v10 = vmax.f32 %v1408_v44, 0.0  ;;  %v1678_v18 = vld [vmem:[%s5705_s1 + $0x28] sm:$0xff]  ;;  %v3646_v54 = vpack.c.bf16 %v1684_v22, %v1683_v43  ;;  %v3648_v1 = vpack.c.bf16 %v1702_v23, %v1701_v26  ;;  %v1685_v44 = vld [vmem:[%s5705_s1 + $0x60] sm:$0xff] }
 0x385   :  { %v1507_v47 = vmul.f32 %v1501_v57, %v1491_v28  ;;  %3661 = vmatprep.subr.bf16.mxu1 %v3628_v51  ;;  %3629 = vmatprep.subr.bf16.mxu0 %v3628_v51  ;;  %v3634_v21 = vpack.c.bf16 %v1678_v18, %v1677_v39  ;;  %v1686_v28 = vld [vmem:[%s5705_s1 + $0x68] sm:$0xff]  ;;  %v5748_v51 = vmov 0  }
 0x386   :  { %v3835_v7 = vpack.i.bf16 %v4893_v34, %v4895_v59  ;;  %v1508_v37 = vmul.f32 %v1501_v57, %v1492_v10  ;;  %3663 = vmatpush3.bf16.msra.mxu1 %v3630_v41  ;;  %3631 = vmatpush3.bf16.msra.mxu0 %v3630_v41  ;;  %v3650_v10 = vpack.c.bf16 %v1686_v28, %v1685_v44 }
 0x387   :  { %v4908_v4 = vadd.f32 %v1517_v42, %v1507_v47  ;;  %3665 = vmatprep.subr.bf16.mxu1 %v3632_v38  ;;  %3633 = vmatprep.subr.bf16.mxu0 %v3632_v38  ;;  %v1703_v47 = vld [vmem:[%s5705_s1 + $0xf0] sm:$0xff] }
 0x388   :  { %v4919_v40 = vadd.f32 %v1517_v42, %v1508_v37  ;;  %3836 = vrot.lane.b32.xlu1 %v3835_v7, %s3958_s15  ;;  %v1680_v42 = vld [vmem:[%s5705_s1 + $0x38] sm:$0xff] }
 0x389   :  { %v3638_v58 = vpack.c.bf16 %v1680_v42, %v1679_v29  ;;  %v1704_v7 = vld [vmem:[%s5705_s1 + $0xf8] sm:$0xff]  ;;  %s3967_s1 = smov 64  }
 0x38a   :  { %v3840_v57 = vpack.i.bf16 %v4908_v4, %v4919_v40  ;;  %3667 = vmatpush3.bf16.msra.mxu1 %v3634_v21  ;;  %3635 = vmatpush3.bf16.msra.mxu0 %v3634_v21  ;;  %v3652_v37 = vpack.c.bf16 %v1704_v7, %v1703_v47 }
 0x38b   :  { %3669 = vmatprep.subr.bf16.mxu1 %v3636_v56  ;;  %3637 = vmatprep.subr.bf16.mxu0 %v3636_v56 }
 0x38c   :  { %3841 = vrot.lane.b32.xlu1 %v3840_v57, %s3958_s15 }
 0x38e   :  { %3671 = vmatpush3.bf16.msra.mxu1 %v3638_v58  ;;  %3639 = vmatpush3.bf16.msra.mxu0 %v3638_v58 }
 0x38f   :  { %3673 = vmatprep.subr.bf16.mxu1 %v3640_v35  ;;  %3641 = vmatprep.subr.bf16.mxu0 %v3640_v35 }
 0x392   :  { %3675 = vmatpush3.bf16.msra.mxu1 %v3642_v45  ;;  %3643 = vmatpush3.bf16.msra.mxu0 %v3642_v45 }
 0x393   :  { %3677 = vmatprep.subr.bf16.mxu1 %v3644_v0  ;;  %3645 = vmatprep.subr.bf16.mxu0 %v3644_v0 }
 0x396   :  { %3679 = vmatpush3.bf16.msra.mxu1 %v3646_v54  ;;  %3647 = vmatpush3.bf16.msra.mxu0 %v3646_v54 }
 0x397   :  { %3681 = vmatprep.subr.bf16.mxu1 %v3648_v1  ;;  %3649 = vmatprep.subr.bf16.mxu0 %v3648_v1 }
 0x39a   :  { %3683 = vmatpush3.bf16.msra.mxu1 %v3650_v10  ;;  %3651 = vmatpush3.bf16.msra.mxu0 %v3650_v10 }
 0x39b   :  { %3685 = vmatprep.subr.bf16.mxu1 %v3652_v37  ;;  %3653 = vmatprep.subr.bf16.mxu0 %v3652_v37 }
 0x39e   :  { %3687 = vmatpush3.bf16.msra.mxu1 %v3654_v9  ;;  %3655 = vmatpush3.bf16.msra.mxu0 %v3654_v9 }
 0x39f   :  { %2037 = vmatprep.subr.bf16.mxu0 %v5748_v51  ;;  %2249 = vmatprep.subr.bf16.mxu1 %v5748_v51 }
 0x3d7   :  { %v3822_v2 = vpop.permute.xlu0 %3821 }
 0x3d8   :  { %v3824_v60 = vunpack.i.h.bf16 %v3822_v2  ;;  %v3823_v17 = vunpack.i.l.bf16 %v3822_v2 }
 0x3da   :  { %v1613_v11 = vmax.f32 %v3824_v60, 0.0  ;;  %v1586_v20 = vsel %vm229_vm0, %v3823_v17, %v3824_v60 }
 0x3db   :  { %v1602_v3 = vmax.f32 %v4876_v61, %v1586_v20  ;;  %v3832_v14 = vpop.permute.xlu0 %3831  ;;  %v3827_v63 = vpop.permute.xlu1 %3826 }
 0x3dc   :  { %v3834_v49 = vunpack.i.h.bf16 %v3832_v14  ;;  %v3833_v57 = vunpack.i.l.bf16 %v3832_v14  ;;  %v3829_v41 = vunpack.i.h.bf16 %v3827_v63  ;;  %v3828_v38 = vunpack.i.l.bf16 %v3827_v63 }
 0x3dd   :  { %v3845_v39 = vpack.i.bf16 %v1613_v11, %v1602_v3 }
 0x3de   :  { %v1618_v18 = vmax.f32 %v3833_v57, 0.0  ;;  %v1589_v19 = vsel %vm229_vm0, %v3834_v49, %v3829_v41  ;;  %v1590_v52 = vsel %vm229_vm0, %v3829_v41, %v3833_v57  ;;  %v1585_v21 = vsel %vm229_vm0, %v3828_v38, %v3823_v17 }
 0x3df   :  { %v1605_v56 = vmax.f32 %v4880_v12, %v1589_v19  ;;  %v1606_v29 = vmax.f32 %v4884_v46, %v1590_v52  ;;  %v1601_v61 = vmax.f32 %v4882_v5, %v1585_v21  ;;  %3846 = vrot.lane.b32.xlu0 %v3845_v39, %s3960_s17 }
 0x3e1   :  { %v3855_v42 = vpack.i.bf16 %v1605_v56, %v1618_v18  ;;  %v3850_v13 = vpack.i.bf16 %v1606_v29, %v1601_v61 }
 0x3e3   :  { %3856 = vrot.lane.b32.xlu1 %v3855_v42, %s3960_s17  ;;  %3851 = vrot.lane.b32.xlu0 %v3850_v13, %s3960_s17 }
 0x3fa   :  { %v3837_v62 = vpop.permute.xlu1 %3836 }
 0x3fb   :  { %v3839_v58 = vunpack.i.h.bf16 %v3837_v62  ;;  %v3838_v35 = vunpack.i.l.bf16 %v3837_v62  ;;  %v3968_v62 = vmov 0.0|0.0  }
 0x3fd   :  { %v1583_v27 = vsel %vm229_vm0, %v3839_v58, %v3838_v35  ;;  %v1584_v15 = vsel %vm229_vm0, %v3838_v35, %v3828_v38 }
 0x3fe   :  { %v1599_v12 = vmax.f32 %v4893_v34, %v1583_v27  ;;  %v1600_v46 = vmax.f32 %v4895_v59, %v1584_v15  ;;  %v3842_v5 = vpop.permute.xlu1 %3841 }
 0x3ff   :  { %v3844_v50 = vunpack.i.h.bf16 %v3842_v5  ;;  %v3843_v16 = vunpack.i.l.bf16 %v3842_v5 }
 0x400   :  { %v3860_v45 = vpack.i.bf16 %v1599_v12, %v1600_v46 }
 0x401   :  { %v1587_v0 = vsel %vm229_vm0, %v3844_v50, %v3843_v16  ;;  %v1588_v43 = vsel %vm229_vm0, %v3843_v16, %v3834_v49 }
 0x402   :  { %v1603_v22 = vmax.f32 %v4908_v4, %v1587_v0  ;;  %v1604_v54 = vmax.f32 %v4919_v40, %v1588_v43  ;;  %3861 = vrot.lane.b32.xlu0 %v3860_v45, %s3960_s17  ;;  %v3901_v43 = vld [vmem:[%s5709_s5 + $0x4] ss:$8 sps:$4 sm:$0xff]  }
 0x404   :  { %v3865_v26 = vpack.i.bf16 %v1603_v22, %v1604_v54 }
 0x406   :  { %3866 = vrot.lane.b32.xlu1 %v3865_v26, %s3960_s17  ;;  %s3969_s17 = smov 9  }
 0x451   :  { %v3847_v34 = vpop.permute.xlu0 %3846 }
 0x452   :  { %v3849_v23 = vunpack.i.h.bf16 %v3847_v34  ;;  %v3848_v59 = vunpack.i.l.bf16 %v3847_v34 }
 0x454   :  { %v1652_v1 = vsel %vm383_vm2, %v3848_v59, %v3849_v23 }
 0x455   :  { %v3857_v44 = vpop.permute.xlu1 %3856  ;;  %v3852_v28 = vpop.permute.xlu0 %3851  ;;  %v1668_v10 = vmax.f32 %v1602_v3, %v1652_v1 }
 0x456   :  { %v3859_v47 = vunpack.i.h.bf16 %v3857_v44  ;;  %v3858_v7 = vunpack.i.l.bf16 %v3857_v44  ;;  %v3854_v37 = vunpack.i.h.bf16 %v3852_v28  ;;  %v3853_v55 = vunpack.i.l.bf16 %v3852_v28 }
 0x457   :  { %1844 = vmatprep.mubr.f32.mxu1 %v1668_v10 }
 0x458   :  { %v1651_v4 = vsel %vm383_vm2, %v3853_v55, %v3848_v59  ;;  %v1656_v40 = vsel %vm383_vm2, %v3854_v37, %v3858_v7  ;;  %v1655_v9 = vsel %vm383_vm2, %v3859_v47, %v3854_v37 }
 0x459   :  { %v1667_v53 = vmax.f32 %v1601_v61, %v1651_v4  ;;  %v1672_v2 = vmax.f32 %v1606_v29, %v1656_v40  ;;  %v1671_v60 = vmax.f32 %v1605_v56, %v1655_v9 }
 0x45b   :  { %1845 = vmatmul.mubr.f32.vlgmr.msra.gmra.mrb[4].mxu1 %v1667_v53 }
 0x45c   :  { %1849 = vmatprep.mubr.f32.mxu1 %v1672_v2 }
 0x45f   :  { %1850 = vmatmul.mubr.f32.gmra.mrb[6].mxu1 %v1671_v60 }
 0x474   :  { %v3862_v17 = vpop.permute.xlu0 %3861 }
 0x475   :  { %v3864_v11 = vunpack.i.h.bf16 %v3862_v17  ;;  %v3863_v20 = vunpack.i.l.bf16 %v3862_v17 }
 0x477   :  { %v1649_v3 = vsel %vm383_vm2, %v3864_v11, %v3863_v20  ;;  %v1650_v14 = vsel %vm383_vm2, %v3863_v20, %v3853_v55 }
 0x478   :  { %v1665_v63 = vmax.f32 %v1599_v12, %v1649_v3  ;;  %v3867_v49 = vpop.permute.xlu1 %3866  ;;  %v1666_v57 = vmax.f32 %v1600_v46, %v1650_v14  ;;  %v3899_v14 = vld [vmem:[%s5709_s5] ss:$8 sps:$4 sm:$0xff]  }
 0x479   :  { %v3869_v41 = vunpack.i.h.bf16 %v3867_v49  ;;  %v3868_v38 = vunpack.i.l.bf16 %v3867_v49 }
 0x47a   :  { %1769 = vmatprep.mubr.f32.mxu0 %v1666_v57 }
 0x47b   :  { %1770 = vmatmul.mubr.f32.vlgmr.msra.gmra.mrb[4].mxu0 %v1665_v63  ;;  %v1654_v39 = vsel %vm383_vm2, %v3868_v38, %v3859_v47  ;;  %v1653_v18 = vsel %vm383_vm2, %v3869_v41, %v3868_v38  ;;  %vm1981_vm2 = vcmask 982016  }
 0x47c   :  { %v1670_v19 = vmax.f32 %v1604_v54, %v1654_v39  ;;  %v1669_v52 = vmax.f32 %v1603_v22, %v1653_v18  ;;  %v5749_v22 = vmov 5  }
 0x47e   :  { %1774 = vmatprep.mubr.f32.mxu0 %v1670_v19 }
 0x47f   :  { %1775 = vmatmul.mubr.f32.gmra.mrb[6].mxu0 %v1669_v52 }
 0x480   :  { %3505 = vmatprep.mubr.msk.bf16.mxu0 %vm2033_vm11, %v3901_v43 }
 0x52e   :  { %v3586_v21 = vpop.f32.mrb[4].mxu1 }
 0x52f   :  { %v3587_v56 = vpop.f32.mrb[5].mxu1 }
 0x530   :  { %v3588_v29 = vadd.f32 %v3587_v56, %v3586_v21  ;;  %v5107_v21 = vld [vmem:[%s5706_s2] ss:$0 sm:$0xff] }
 0x532   :  { %v3589_v61 = vpop.f32.mrb[6].mxu1  ;;  %1857 = vrot.lane.b32.xlu0 %v3588_v29, %s3967_s1 }
 0x533   :  { %v3590_v42 = vpop.f32.mrb[7].mxu1 }
 0x534   :  { %v3591_v13 = vadd.f32 %v3590_v42, %v3589_v61 }
 0x536   :  { %1859 = vrot.lane.b32.xlu1 %v3591_v13, %s3967_s1  ;;  %1877 = vrot.lane.b32.xlu0 %v3968_v62, %s3969_s17  ;;  %v3904_v13 = vld [vmem:[%s5710_s6 + $0x4] ss:$8 sps:$4 sm:$0xff]  }
 0x537   :  { %3509 = vmatprep.mubr.msk.bf16.mxu1 %vm2033_vm11, %v3904_v13 }
 0x53a   :  { %1893 = vrot.lane.b32.xlu0 %v3968_v62, %s3938_s28 }
 0x53e   :  { %1909 = vrot.lane.b32.xlu0 %v3968_v62, %s3970_s3 }
 0x542   :  { %1925 = vrot.lane.b32.xlu0 %v3968_v62, %s3971_s16 }
 0x54e   :  { %v3548_v58 = vpop.f32.mrb[4].mxu0 }
 0x54f   :  { %v3549_v35 = vpop.f32.mrb[5].mxu0 }
 0x550   :  { %v3550_v27 = vadd.f32 %v3549_v35, %v3548_v58  ;;  %v5750_v58 = vmov 6   ;;  %v5133_v35 = vld [vmem:[%s5714_s10 + $0x8] sm:$0xff] }
 0x552   :  { %v3551_v15 = vpop.f32.mrb[6].mxu0 }
 0x553   :  { %v3552_v12 = vpop.f32.mrb[7].mxu0 }
 0x554   :  { %v3553_v46 = vadd.f32 %v3552_v12, %v3551_v15  ;;  %v5752_v15 = vmov 8  }
 0x5a4   :  { %v1858_v5 = vpop.permute.xlu0 %1857 }
 0x5a5   :  { %v5045_v16 = vsel %vm1863_vm10, %v3550_v27, %v1858_v5  ;;  %v5751_v27 = vmov 7  }
 0x5a8   :  { %v1860_v50 = vpop.permute.xlu1 %1859  ;;  %v1878_v54 = vpop.permute.xlu0 %1877 }
 0x5a9   :  { %v5048_v45 = vsel %vm1863_vm10, %v3553_v46, %v1860_v50 }
 0x5aa   :  { %v1874_v0 = vpack.c.bf16 %v5048_v45, %v5045_v16 }
 0x5ac   :  { %1945 = vrot.lane.b32.xlu0 %v1874_v0, %s3958_s15  ;;  %1879 = vrot.lane.b32.xlu1 %v1874_v0, %s3969_s17  ;;  %v1894_v26 = vpop.permute.xlu0 %1893 }
 0x5b0   :  { %1961 = vrot.lane.b32.xlu0 %v1874_v0, %s3972_s18  ;;  %1895 = vrot.lane.b32.xlu1 %v1874_v0, %s3938_s28  ;;  %v1910_v23 = vpop.permute.xlu0 %1909 }
 0x5b4   :  { %1977 = vrot.lane.b32.xlu0 %v1874_v0, %s3973_s19  ;;  %1911 = vrot.lane.b32.xlu1 %v1874_v0, %s3970_s3  ;;  %v1926_v44 = vpop.permute.xlu0 %1925 }
 0x5b8   :  { %1993 = vrot.lane.b32.xlu0 %v1874_v0, %s3974_s20  ;;  %1927 = vrot.lane.b32.xlu1 %v1874_v0, %s3971_s16 }
 0x5bc   :  { %1947 = vrot.lane.b32.xlu1 %v3968_v62, %s3958_s15  ;;  %2016 = vperm.xlu0 %3870, %v4780_v8  }
 0x5c0   :  { %1963 = vrot.lane.b32.xlu1 %v3968_v62, %s3972_s18  ;;  %3873 = vset.pattern.permute.xlu0 %v5749_v22 }
 0x5c4   :  { %1979 = vrot.lane.b32.xlu1 %v3968_v62, %s3973_s19 }
 0x5c8   :  { %1995 = vrot.lane.b32.xlu1 %v3968_v62, %s3974_s20 }
 0x5cc   :  { %2021 = vperm.xlu1 %3871, %v4775_v6  }
 0x5d0   :  { %2098 = vrot.lane.b32.xlu1 %v3968_v62, %s3969_s17 }
 0x5d1   :  { %3872 = vset.pattern.permute.xlu1 %v5749_v22 }
 0x5d4   :  { %2113 = vrot.lane.b32.xlu1 %v3968_v62, %s3938_s28 }
 0x5d8   :  { %2128 = vrot.lane.b32.xlu1 %v3968_v62, %s3970_s3 }
 0x5dc   :  { %2143 = vrot.lane.b32.xlu1 %v3968_v62, %s3971_s16 }
 0x61e   :  { %v1880_v34 = vpop.permute.xlu1 %1879  ;;  %v1946_v37 = vpop.permute.xlu0 %1945 }
 0x61f   :  { %v1882_v6 = vsel %vm1881_vm12, %v1878_v54, %v1880_v34 }
 0x620   :  { %2038 = vmatpush1.bf16.msra.mxu0 %v1882_v6 }
 0x621   :  { %2039 = vmatprep.subr.bf16.mxu0 %v5748_v51 }
 0x622   :  { %v1896_v59 = vpop.permute.xlu1 %1895  ;;  %v1962_v4 = vpop.permute.xlu0 %1961 }
 0x623   :  { %v1898_v1 = vsel %vm1897_vm13, %v1894_v26, %v1896_v59 }
 0x624   :  { %2040 = vmatpush1.bf16.msra.mxu0 %v1898_v1 }
 0x625   :  { %2041 = vmatprep.subr.bf16.mxu0 %v5748_v51 }
 0x626   :  { %v1912_v28 = vpop.permute.xlu1 %1911  ;;  %v1978_v60 = vpop.permute.xlu0 %1977 }
 0x627   :  { %v1914_v10 = vsel %vm1913_vm14, %v1910_v23, %v1912_v28 }
 0x628   :  { %2042 = vmatpush1.bf16.msra.mxu0 %v1914_v10 }
 0x629   :  { %2043 = vmatprep.subr.bf16.mxu0 %v5748_v51 }
 0x62a   :  { %v1928_v47 = vpop.permute.xlu1 %1927  ;;  %v1994_v20 = vpop.permute.xlu0 %1993 }
 0x62b   :  { %v1930_v7 = vsel %vm1929_vm15, %v1926_v44, %v1928_v47 }
 0x62c   :  { %2044 = vmatpush1.bf16.msra.mxu0 %v1930_v7 }
 0x62d   :  { %2045 = vmatprep.subr.bf16.mxu0 %v5748_v51 }
 0x62e   :  { %v1948_v55 = vpop.permute.xlu1 %1947 }
 0x62f   :  { %v1950_v53 = vsel %vm229_vm0, %v1946_v37, %v1948_v55 }
 0x630   :  { %2046 = vmatpush1.bf16.msra.mxu0 %v1874_v0 }
 0x631   :  { %2047 = vmatprep.subr.bf16.mxu0 %v5748_v51 }
 0x632   :  { %v1964_v40 = vpop.permute.xlu1 %1963 }
 0x633   :  { %v1966_v9 = vsel %vm1965_vm1, %v1962_v4, %v1964_v40 }
 0x634   :  { %2048 = vmatpush1.bf16.msra.mxu0 %v1950_v53  ;;  %v3902_v53 = vld [vmem:[%s5710_s6] ss:$8 sps:$4 sm:$0xff]  }
 0x635   :  { %2049 = vmatprep.subr.bf16.mxu0 %v5748_v51 }
 0x636   :  { %v1980_v2 = vpop.permute.xlu1 %1979 }
 0x637   :  { %v1982_v17 = vsel %vm1981_vm2, %v1978_v60, %v1980_v2 }
 0x638   :  { %2050 = vmatpush1.bf16.msra.mxu0 %v1966_v9 }
 0x639   :  { %2051 = vmatprep.subr.bf16.mxu0 %v5748_v51 }
 0x63a   :  { %v1996_v11 = vpop.permute.xlu1 %1995 }
 0x63b   :  { %v1998_v3 = vsel %vm1997_vm3, %v1994_v20, %v1996_v11  ;;  %v2017_v63 = vpop.permute.xlu0 %2016 }
 0x63c   :  { %2052 = vmatpush1.bf16.msra.mxu0 %v1982_v17 }
 0x63d   :  { %2053 = vmatprep.subr.bf16.mxu0 %v5748_v51 }
 0x640   :  { %2054 = vmatpush1.bf16.msra.mxu0 %v1998_v3 }
 0x641   :  { %2479 = vmatprep.subr.bf16.mxu0 %v5748_v51 }
 0x643   :  { %2070 = vmatmul.mubr.bf16.vlgmr.msra.gmra.mrb[8].mxu0 %v3899_v14 }
 0x64b   :  { %v2022_v57 = vpop.permute.xlu1 %2021 }
 0x64f   :  { %v2099_v12 = vpop.permute.xlu1 %2098 }
 0x653   :  { %v2114_v46 = vpop.permute.xlu1 %2113 }
 0x657   :  { %v2129_v0 = vpop.permute.xlu1 %2128 }
 0x65b   :  { %v2144_v22 = vpop.permute.xlu1 %2143 }
 0x716   :  { %v2071_v49 = vpop.f32.mrb[8].mxu0 }
 0x717   :  { %v2072_v41 = vadd.f32 %v2071_v49, %v2017_v63  ;;  %v2073_v38 = vpop.f32.mrb[9].mxu0 }
 0x718   :  { %v2074_v39 = vpop.f32.mrb[10].mxu0 }
 0x719   :  { %v2078_v18 = vmax.f32 %v2072_v41, 0.0  ;;  %v2075_v19 = vadd.f32 %v2074_v39, %v2022_v57  ;;  %v2076_v52 = vpop.f32.mrb[11].mxu0 }
 0x71b   :  { %v2079_v56 = vmax.f32 %v2075_v19, 0.0  ;;  %v2086_v29 = vmul.f32 %v5107_v21, %v2078_v18 }
 0x71d   :  { %v2087_v61 = vmul.f32 %v5107_v21, %v2079_v56 }
 0x71f   :  { %v2095_v42 = vpack.c.bf16 %v2087_v61, %v2086_v29 }
 0x721   :  { %2162 = vrot.lane.b32.xlu1 %v2095_v42, %s3958_s15  ;;  %2100 = vrot.lane.b32.xlu0 %v2095_v42, %s3969_s17 }
 0x725   :  { %2177 = vrot.lane.b32.xlu1 %v2095_v42, %s3972_s18  ;;  %2115 = vrot.lane.b32.xlu0 %v2095_v42, %s3938_s28 }
 0x729   :  { %2192 = vrot.lane.b32.xlu1 %v2095_v42, %s3973_s19  ;;  %2130 = vrot.lane.b32.xlu0 %v2095_v42, %s3970_s3 }
 0x72d   :  { %2207 = vrot.lane.b32.xlu1 %v2095_v42, %s3974_s20  ;;  %2145 = vrot.lane.b32.xlu0 %v2095_v42, %s3971_s16 }
 0x731   :  { %2164 = vrot.lane.b32.xlu0 %v3968_v62, %s3958_s15  ;;  %2229 = vperm.xlu1 %3872, %v4780_v8  }
 0x735   :  { %2179 = vrot.lane.b32.xlu0 %v3968_v62, %s3972_s18  ;;  %3874 = vset.pattern.permute.xlu1 %v5750_v58 }
 0x736   :  { %2295 = vperm.xlu1 %3874, %v4780_v8  }
 0x739   :  { %2194 = vrot.lane.b32.xlu0 %v3968_v62, %s3973_s19 }
 0x73a   :  { %2299 = vperm.xlu1 %3874, %v5133_v35  }
 0x73d   :  { %2209 = vrot.lane.b32.xlu0 %v3968_v62, %s3974_s20 }
 0x73e   :  { %3876 = vset.pattern.permute.xlu1 %v5751_v27 }
 0x73f   :  { %2311 = vperm.xlu1 %3876, %v5133_v35  }
 0x741   :  { %2234 = vperm.xlu0 %3873, %v5133_v35  }
 0x743   :  { %2328 = vrot.lane.b32.xlu1 %v3968_v62, %s3969_s17 }
 0x744   :  { %3877 = vset.pattern.permute.xlu1 %v5752_v15 }
 0x745   :  { %3875 = vset.pattern.permute.xlu0 %v5751_v27  ;;  %v5753_v27 = vmov 10  }
 0x746   :  { %2307 = vperm.xlu0 %3875, %v4780_v8  }
 0x747   :  { %2343 = vrot.lane.b32.xlu1 %v3968_v62, %s3938_s28 }
 0x74a   :  { %3878 = vset.pattern.permute.xlu0 %v5752_v15  ;;  %v5754_v15 = vmov 9  }
 0x74b   :  { %2358 = vrot.lane.b32.xlu1 %v3968_v62, %s3970_s3 }
 0x74f   :  { %2373 = vrot.lane.b32.xlu1 %v3968_v62, %s3971_s16 }
 0x793   :  { %v2101_v5 = vpop.permute.xlu0 %2100  ;;  %v2163_v23 = vpop.permute.xlu1 %2162 }
 0x794   :  { %v2102_v50 = vsel %vm1881_vm12, %v2099_v12, %v2101_v5 }
 0x795   :  { %2250 = vmatpush1.bf16.msra.mxu1 %v2102_v50 }
 0x796   :  { %2251 = vmatprep.subr.bf16.mxu1 %v5748_v51 }
 0x797   :  { %v2116_v8 = vpop.permute.xlu0 %2115  ;;  %v2178_v1 = vpop.permute.xlu1 %2177 }
 0x798   :  { %v2117_v43 = vsel %vm1897_vm13, %v2114_v46, %v2116_v8 }
 0x799   :  { %2252 = vmatpush1.bf16.msra.mxu1 %v2117_v43 }
 0x79a   :  { %2253 = vmatprep.subr.bf16.mxu1 %v5748_v51 }
 0x79b   :  { %v2131_v54 = vpop.permute.xlu0 %2130  ;;  %v2193_v7 = vpop.permute.xlu1 %2192 }
 0x79c   :  { %v2132_v26 = vsel %vm1913_vm14, %v2129_v0, %v2131_v54 }
 0x79d   :  { %2254 = vmatpush1.bf16.msra.mxu1 %v2132_v26 }
 0x79e   :  { %2255 = vmatprep.subr.bf16.mxu1 %v5748_v51 }
 0x79f   :  { %v2146_v34 = vpop.permute.xlu0 %2145  ;;  %v2208_v4 = vpop.permute.xlu1 %2207 }
 0x7a0   :  { %v2147_v6 = vsel %vm1929_vm15, %v2144_v22, %v2146_v34 }
 0x7a1   :  { %2256 = vmatpush1.bf16.msra.mxu1 %v2147_v6 }
 0x7a2   :  { %2257 = vmatprep.subr.bf16.mxu1 %v5748_v51 }
 0x7a3   :  { %v2165_v59 = vpop.permute.xlu0 %2164 }
 0x7a4   :  { %v2166_v28 = vsel %vm229_vm0, %v2163_v23, %v2165_v59 }
 0x7a5   :  { %2258 = vmatpush1.bf16.msra.mxu1 %v2095_v42 }
 0x7a6   :  { %2259 = vmatprep.subr.bf16.mxu1 %v5748_v51 }
 0x7a7   :  { %v2180_v44 = vpop.permute.xlu0 %2179 }
 0x7a8   :  { %v2181_v47 = vsel %vm1965_vm1, %v2178_v1, %v2180_v44 }
 0x7a9   :  { %2260 = vmatpush1.bf16.msra.mxu1 %v2166_v28 }
 0x7aa   :  { %2261 = vmatprep.subr.bf16.mxu1 %v5748_v51 }
 0x7ab   :  { %v2195_v10 = vpop.permute.xlu0 %2194 }
 0x7ac   :  { %v2196_v37 = vsel %vm1981_vm2, %v2193_v7, %v2195_v10 }
 0x7ad   :  { %2262 = vmatpush1.bf16.msra.mxu1 %v2181_v47 }
 0x7ae   :  { %2263 = vmatprep.subr.bf16.mxu1 %v5748_v51 }
 0x7af   :  { %v2210_v55 = vpop.permute.xlu0 %2209 }
 0x7b0   :  { %v2211_v40 = vsel %vm1997_vm3, %v2208_v4, %v2210_v55  ;;  %v2230_v2 = vpop.permute.xlu1 %2229 }
 0x7b1   :  { %2264 = vmatpush1.bf16.msra.mxu1 %v2196_v37 }
 0x7b2   :  { %2265 = vmatprep.subr.bf16.mxu1 %v5748_v51 }
 0x7b5   :  { %2266 = vmatpush1.bf16.msra.mxu1 %v2211_v40  ;;  %v2296_v9 = vpop.permute.xlu1 %2295 }
 0x7b6   :  { %2685 = vmatprep.subr.bf16.mxu1 %v5748_v51 }
 0x7b8   :  { %2282 = vmatmul.mubr.bf16.vlgmr.msra.gmra.mrb[8].mxu1 %v3902_v53  ;;  %v3907_v53 = vld [vmem:[%s5711_s7] ss:$8 sps:$4 sm:$0xff]  }
 0x7b9   :  { %v2300_v57 = vpop.permute.xlu1 %2299 }
 0x7be   :  { %v2312_v52 = vpop.permute.xlu1 %2311 }
 0x7c0   :  { %v2235_v17 = vpop.permute.xlu0 %2234 }
 0x7c2   :  { %v2329_v12 = vpop.permute.xlu1 %2328 }
 0x7c5   :  { %v2308_v39 = vpop.permute.xlu0 %2307 }
 0x7c6   :  { %v2344_v46 = vpop.permute.xlu1 %2343 }
 0x7ca   :  { %v2359_v0 = vpop.permute.xlu1 %2358 }
 0x7ce   :  { %v2374_v22 = vpop.permute.xlu1 %2373 }
 0x88b   :  { %v2283_v60 = vpop.f32.mrb[8].mxu1 }
 0x88c   :  { %v2284_v11 = vadd.f32 %v2283_v60, %v2230_v2  ;;  %v2285_v20 = vpop.f32.mrb[9].mxu1 }
 0x88d   :  { %v2286_v3 = vpop.f32.mrb[10].mxu1 }
 0x88e   :  { %v2290_v14 = vmax.f32 %v2284_v11, 0.0  ;;  %v2287_v63 = vadd.f32 %v2286_v3, %v2235_v17  ;;  %v2288_v49 = vpop.f32.mrb[11].mxu1 }
 0x890   :  { %v2302_v41 = vmul.f32 %v2296_v9, %v2290_v14  ;;  %v2291_v38 = vmax.f32 %v2287_v63, 0.0 }
 0x892   :  { %v2303_v18 = vmul.f32 %v2300_v57, %v2291_v38  ;;  %v2304_v19 = vadd.f32 %v2302_v41, %v5045_v16  ;;  %v3911_v16 = vld [vmem:[%s5714_s10] sm:$0xff] }
 0x894   :  { %v2314_v56 = vadd.f32 %v2308_v39, %v2304_v19  ;;  %v2305_v29 = vadd.f32 %v2303_v18, %v5048_v45  ;;  %v3905_v45 = vld [vmem:[%s5711_s7 + $0x4] ss:$8 sps:$4 sm:$0xff]   ;;  %v5755_v18 = vmov 11   ;;  %v5756_v19 = vmov 12  }
 0x895   :  { %3512 = vmatprep.mubr.msk.bf16.mxu0 %vm2033_vm11, %v3905_v45  ;;  %v2661_v39 = vld [vmem:[%s5714_s10] sm:$0xff] }
 0x896   :  { %v2315_v61 = vadd.f32 %v2312_v52, %v2305_v29  ;;  %v5178_v42 = vmul.f32 %v5107_v21, %v2314_v56  ;;  %v5757_v52 = vmov 14   ;;  %v3299_v56 = vld [vmem:[%s5714_s10 + $0x18] sm:$0xff]  ;;  %v5292_v29 = vld [vmem:[%s5714_s10 + $0x20] sm:$0xff] }
 0x898   :  { %v5181_v13 = vmul.f32 %v5107_v21, %v2315_v61  ;;  %v5758_v61 = vmov 13  }
 0x89a   :  { %v2325_v58 = vpack.c.bf16 %v5181_v13, %v5178_v42 }
 0x89c   :  { %2392 = vrot.lane.b32.xlu1 %v2325_v58, %s3958_s15  ;;  %2330 = vrot.lane.b32.xlu0 %v2325_v58, %s3969_s17 }
 0x8a0   :  { %2407 = vrot.lane.b32.xlu1 %v2325_v58, %s3972_s18  ;;  %2345 = vrot.lane.b32.xlu0 %v2325_v58, %s3938_s28 }
 0x8a4   :  { %2422 = vrot.lane.b32.xlu1 %v2325_v58, %s3973_s19  ;;  %2360 = vrot.lane.b32.xlu0 %v2325_v58, %s3970_s3 }
 0x8a8   :  { %2437 = vrot.lane.b32.xlu1 %v2325_v58, %s3974_s20  ;;  %2375 = vrot.lane.b32.xlu0 %v2325_v58, %s3971_s16 }
 0x8ac   :  { %2394 = vrot.lane.b32.xlu0 %v3968_v62, %s3958_s15  ;;  %2459 = vperm.xlu1 %3877, %v3911_v16  }
 0x8b0   :  { %2409 = vrot.lane.b32.xlu0 %v3968_v62, %s3972_s18  ;;  %2534 = vrot.lane.b32.xlu1 %v3968_v62, %s3969_s17 }
 0x8b1   :  { %3880 = vset.pattern.permute.xlu1 %v5753_v27 }
 0x8b4   :  { %2424 = vrot.lane.b32.xlu0 %v3968_v62, %s3973_s19 }
 0x8b8   :  { %2439 = vrot.lane.b32.xlu0 %v3968_v62, %s3974_s20 }
 0x8bc   :  { %2464 = vperm.xlu0 %3878, %v5133_v35  }
 0x8c0   :  { %2549 = vrot.lane.b32.xlu0 %v3968_v62, %s3938_s28 }
 0x8c1   :  { %3879 = vset.pattern.permute.xlu0 %v5754_v15 }
 0x8c4   :  { %2564 = vrot.lane.b32.xlu0 %v3968_v62, %s3970_s3 }
 0x8c8   :  { %2579 = vrot.lane.b32.xlu0 %v3968_v62, %s3971_s16 }
 0x90e   :  { %v2331_v5 = vpop.permute.xlu0 %2330  ;;  %v2393_v23 = vpop.permute.xlu1 %2392 }
 0x90f   :  { %v2332_v50 = vsel %vm1881_vm12, %v2329_v12, %v2331_v5 }
 0x910   :  { %2480 = vmatpush1.bf16.msra.mxu0 %v2332_v50 }
 0x911   :  { %2481 = vmatprep.subr.bf16.mxu0 %v5748_v51 }
 0x912   :  { %v2346_v8 = vpop.permute.xlu0 %2345  ;;  %v2408_v1 = vpop.permute.xlu1 %2407 }
 0x913   :  { %v2347_v43 = vsel %vm1897_vm13, %v2344_v46, %v2346_v8 }
 0x914   :  { %2482 = vmatpush1.bf16.msra.mxu0 %v2347_v43 }
 0x915   :  { %2483 = vmatprep.subr.bf16.mxu0 %v5748_v51 }
 0x916   :  { %v2361_v54 = vpop.permute.xlu0 %2360  ;;  %v2423_v7 = vpop.permute.xlu1 %2422 }
 0x917   :  { %v2362_v26 = vsel %vm1913_vm14, %v2359_v0, %v2361_v54 }
 0x918   :  { %2484 = vmatpush1.bf16.msra.mxu0 %v2362_v26 }
 0x919   :  { %2485 = vmatprep.subr.bf16.mxu0 %v5748_v51 }
 0x91a   :  { %v2376_v34 = vpop.permute.xlu0 %2375  ;;  %v2438_v4 = vpop.permute.xlu1 %2437 }
 0x91b   :  { %v2377_v6 = vsel %vm1929_vm15, %v2374_v22, %v2376_v34 }
 0x91c   :  { %2486 = vmatpush1.bf16.msra.mxu0 %v2377_v6 }
 0x91d   :  { %2487 = vmatprep.subr.bf16.mxu0 %v5748_v51 }
 0x91e   :  { %v2395_v59 = vpop.permute.xlu0 %2394 }
 0x91f   :  { %v2396_v28 = vsel %vm229_vm0, %v2393_v23, %v2395_v59 }
 0x920   :  { %2488 = vmatpush1.bf16.msra.mxu0 %v2325_v58  ;;  %v5299_v58 = vld [vmem:[%s5714_s10 + $0x28] sm:$0xff] }
 0x921   :  { %2489 = vmatprep.subr.bf16.mxu0 %v5748_v51 }
 0x922   :  { %v2410_v44 = vpop.permute.xlu0 %2409 }
 0x923   :  { %v2411_v47 = vsel %vm1965_vm1, %v2408_v1, %v2410_v44 }
 0x924   :  { %2490 = vmatpush1.bf16.msra.mxu0 %v2396_v28 }
 0x925   :  { %2491 = vmatprep.subr.bf16.mxu0 %v5748_v51 }
 0x926   :  { %v2425_v10 = vpop.permute.xlu0 %2424 }
 0x927   :  { %v2426_v37 = vsel %vm1981_vm2, %v2423_v7, %v2425_v10  ;;  %v3910_v7 = vld [vmem:[%s5712_s8] ss:$8 sps:$4 sm:$0xff]  }
 0x928   :  { %2492 = vmatpush1.bf16.msra.mxu0 %v2411_v47 }
 0x929   :  { %2493 = vmatprep.subr.bf16.mxu0 %v5748_v51 }
 0x92a   :  { %v2440_v55 = vpop.permute.xlu0 %2439 }
 0x92b   :  { %v2441_v40 = vsel %vm1997_vm3, %v2438_v4, %v2440_v55  ;;  %v2460_v2 = vpop.permute.xlu1 %2459 }
 0x92c   :  { %2494 = vmatpush1.bf16.msra.mxu0 %v2426_v37  ;;  %v3302_v37 = vld [vmem:[%s5714_s10 + $0x30] sm:$0xff] }
 0x92d   :  { %2495 = vmatprep.subr.bf16.mxu0 %v5748_v51 }
 0x92f   :  { %v2535_v16 = vpop.permute.xlu1 %2534 }
 0x930   :  { %2496 = vmatpush1.bf16.msra.mxu0 %v2441_v40 }
 0x933   :  { %2512 = vmatmul.mubr.bf16.vlgmr.msra.gmra.mrb[12].mxu0 %v3907_v53 }
 0x93b   :  { %v2465_v60 = vpop.permute.xlu0 %2464 }
 0x93f   :  { %v2550_v45 = vpop.permute.xlu0 %2549 }
 0x943   :  { %v2565_v15 = vpop.permute.xlu0 %2564 }
 0x947   :  { %v2580_v5 = vpop.permute.xlu0 %2579 }
 0xa06   :  { %v2513_v9 = vpop.f32.mrb[12].mxu0 }
 0xa07   :  { %v2514_v17 = vadd.f32 %v2513_v9, %v2460_v2  ;;  %v2515_v11 = vpop.f32.mrb[13].mxu0 }
 0xa08   :  { %v2516_v20 = vpop.f32.mrb[14].mxu0 }
 0xa09   :  { %v2520_v3 = vmax.f32 %v2514_v17, 0.0  ;;  %v2517_v14 = vadd.f32 %v2516_v20, %v2465_v60  ;;  %v2518_v63 = vpop.f32.mrb[15].mxu0 }
 0xa0b   :  { %v2521_v49 = vmax.f32 %v2517_v14, 0.0  ;;  %v2522_v57 = vmul.f32 %v5107_v21, %v2520_v3 }
 0xa0d   :  { %v2523_v41 = vmul.f32 %v5107_v21, %v2521_v49  ;;  %v3908_v21 = vld [vmem:[%s5712_s8 + $0x4] ss:$8 sps:$4 sm:$0xff]  }
 0xa0e   :  { %3515 = vmatprep.mubr.msk.bf16.mxu1 %vm2033_vm11, %v3908_v21  ;;  %v2753_v21 = vld [vmem:[#allocation10 + $0x8] sm:$0xff] }
 0xa0f   :  { %v5240_v38 = vpack.c.bf16 %v2523_v41, %v2522_v57 }
 0xa11   :  { %2598 = vrot.lane.b32.xlu0 %v5240_v38, %s3958_s15  ;;  %2536 = vrot.lane.b32.xlu1 %v5240_v38, %s3969_s17 }
 0xa15   :  { %2613 = vrot.lane.b32.xlu0 %v5240_v38, %s3972_s18  ;;  %2551 = vrot.lane.b32.xlu1 %v5240_v38, %s3938_s28 }
 0xa19   :  { %2628 = vrot.lane.b32.xlu0 %v5240_v38, %s3973_s19  ;;  %2566 = vrot.lane.b32.xlu1 %v5240_v38, %s3970_s3 }
 0xa1d   :  { %2643 = vrot.lane.b32.xlu0 %v5240_v38, %s3974_s20  ;;  %2581 = vrot.lane.b32.xlu1 %v5240_v38, %s3971_s16 }
 0xa21   :  { %2600 = vrot.lane.b32.xlu1 %v3968_v62, %s3958_s15  ;;  %2665 = vperm.xlu0 %3879, %v2661_v39  }
 0xa25   :  { %2615 = vrot.lane.b32.xlu1 %v3968_v62, %s3972_s18  ;;  %2670 = vperm.xlu0 %3879, %v5133_v35  }
 0xa29   :  { %2630 = vrot.lane.b32.xlu1 %v3968_v62, %s3973_s19  ;;  %3883 = vset.pattern.permute.xlu0 %v5755_v18 }
 0xa2a   :  { %2747 = vperm.xlu0 %3883, %v5133_v35  }
 0xa2d   :  { %2645 = vrot.lane.b32.xlu1 %v3968_v62, %s3974_s20  ;;  %v3298_v62 = vld [vmem:[%s5714_s10 + $0x10] sm:$0xff] }
 0xa2e   :  { %3885 = vset.pattern.permute.xlu0 %v5756_v19 }
 0xa2f   :  { %3311 = vperm.xlu0 %3885, %v5133_v35  }
 0xa31   :  { %2731 = vperm.xlu1 %3880, %v2661_v39  }
 0xa33   :  { %3890 = vset.pattern.permute.xlu0 %v5757_v52 }
 0xa34   :  { %3431 = vperm.xlu0 %3890, %v3298_v62  }
 0xa35   :  { %3881 = vset.pattern.permute.xlu1 %v5755_v18 }
 0xa36   :  { %2743 = vperm.xlu1 %3881, %v2661_v39  }
 0xa38   :  { %3435 = vperm.xlu0 %3890, %v3299_v56  }
 0xa3a   :  { %3882 = vset.pattern.permute.xlu1 %v5753_v27 }
 0xa3b   :  { %2735 = vperm.xlu1 %3882, %v5133_v35  }
 0xa3c   :  { %3894 = vset.pattern.permute.xlu0 %v5758_v61 }
 0xa3d   :  { %3377 = vperm.xlu0 %3894, %v5292_v29  }
 0xa3f   :  { %3884 = vset.pattern.permute.xlu1 %v5756_v19 }
 0xa40   :  { %3306 = vperm.xlu1 %3884, %v2661_v39  }
 0xa41   :  { %3381 = vperm.xlu0 %3894, %v5299_v58  }
 0xa44   :  { %3316 = vperm.xlu1 %3884, %v3298_v62  }
 0xa45   :  { %3385 = vperm.xlu0 %3894, %v3302_v37  }
 0xa48   :  { %3321 = vperm.xlu1 %3884, %v3299_v56  }
 0xa4c   :  { %3886 = vset.pattern.permute.xlu1 %v5758_v61 }
 0xa4d   :  { %3361 = vperm.xlu1 %3886, %v2661_v39  }
 0xa51   :  { %3365 = vperm.xlu1 %3886, %v5133_v35  }
 0xa55   :  { %3887 = vset.pattern.permute.xlu1 %v5757_v52 }
 0xa56   :  { %3423 = vperm.xlu1 %3887, %v2661_v39   ;;  %v2774_v39 = vld [vmem:[#allocation10 + $0x48] sm:$0xff] }
 0xa5a   :  { %3427 = vperm.xlu1 %3887, %v5133_v35  }
 0xa5e   :  { %3888 = vset.pattern.permute.xlu1 %v5756_v19 }
 0xa5f   :  { %3326 = vperm.xlu1 %3888, %v5292_v29  }
 0xa63   :  { %3889 = vset.pattern.permute.xlu1 %v5758_v61 }
 0xa64   :  { %3369 = vperm.xlu1 %3889, %v3298_v62  }
 0xa68   :  { %3891 = vset.pattern.permute.xlu1 %v5756_v19 }
 0xa69   :  { %3331 = vperm.xlu1 %3891, %v5299_v58  }
 0xa6d   :  { %3892 = vset.pattern.permute.xlu1 %v5758_v61 }
 0xa6e   :  { %3373 = vperm.xlu1 %3892, %v3299_v56  }
 0xa72   :  { %3893 = vset.pattern.permute.xlu1 %v5756_v19 }
 0xa73   :  { %3336 = vperm.xlu1 %3893, %v3302_v37  }
 0xa77   :  { %3895 = vset.pattern.permute.xlu1 %v5757_v52 }
 0xa78   :  { %3439 = vperm.xlu1 %3895, %v5292_v29  }
 0xa7c   :  { %3896 = vset.pattern.permute.xlu1 %v5756_v19 }
 0xa83   :  { %v2537_v27 = vpop.permute.xlu1 %2536  ;;  %v2599_v22 = vpop.permute.xlu0 %2598 }
 0xa84   :  { %v2538_v35 = vsel %vm1881_vm12, %v2535_v16, %v2537_v27  ;;  %v2803_v16 = vld [vmem:[#allocation10 + $0x88] sm:$0xff] }
 0xa85   :  { %2686 = vmatpush1.bf16.msra.mxu1 %v2538_v35  ;;  %v2832_v27 = vld [vmem:[#allocation10 + $0xc8] sm:$0xff] }
 0xa86   :  { %2687 = vmatprep.subr.bf16.mxu1 %v5748_v51  ;;  %v2861_v35 = vld [vmem:[#allocation10 + $0x108] sm:$0xff] }
 0xa87   :  { %v2552_v12 = vpop.permute.xlu1 %2551  ;;  %v2614_v26 = vpop.permute.xlu0 %2613 }
 0xa88   :  { %v2553_v46 = vsel %vm1897_vm13, %v2550_v45, %v2552_v12  ;;  %v2752_v12 = vld [vmem:[#allocation10] sm:$0xff] }
 0xa89   :  { %2688 = vmatpush1.bf16.msra.mxu1 %v2553_v46 }
 0xa8a   :  { %2689 = vmatprep.subr.bf16.mxu1 %v5748_v51 }
 0xa8b   :  { %v2567_v50 = vpop.permute.xlu1 %2566  ;;  %v2629_v1 = vpop.permute.xlu0 %2628 }
 0xa8c   :  { %v2568_v0 = vsel %vm1913_vm14, %v2565_v15, %v2567_v50  ;;  %v2890_v50 = vld [vmem:[#allocation10 + $0x148] sm:$0xff] }
 0xa8d   :  { %2690 = vmatpush1.bf16.msra.mxu1 %v2568_v0  ;;  %v2919_v0 = vld [vmem:[#allocation10 + $0x188] sm:$0xff] }
 0xa8e   :  { %2691 = vmatprep.subr.bf16.mxu1 %v5748_v51 }
 0xa8f   :  { %v2582_v8 = vpop.permute.xlu1 %2581  ;;  %v2644_v10 = vpop.permute.xlu0 %2643 }
 0xa90   :  { %v2583_v43 = vsel %vm1929_vm15, %v2580_v5, %v2582_v8  ;;  %v2773_v8 = vld [vmem:[#allocation10 + $0x40] sm:$0xff] }
 0xa91   :  { %2692 = vmatpush1.bf16.msra.mxu1 %v2583_v43 }
 0xa92   :  { %2693 = vmatprep.subr.bf16.mxu1 %v5748_v51 }
 0xa93   :  { %v2601_v54 = vpop.permute.xlu1 %2600 }
 0xa94   :  { %v2602_v6 = vsel %vm229_vm0, %v2599_v22, %v2601_v54  ;;  %vm3400_vm0 = vcmask 15360  }
 0xa95   :  { %2694 = vmatpush1.bf16.msra.mxu1 %v5240_v38 }
 0xa96   :  { %2695 = vmatprep.subr.bf16.mxu1 %v5748_v51 }
 0xa97   :  { %v2616_v34 = vpop.permute.xlu1 %2615 }
 0xa98   :  { %v2617_v59 = vsel %vm1965_vm1, %v2614_v26, %v2616_v34 }
 0xa99   :  { %2696 = vmatpush1.bf16.msra.mxu1 %v2602_v6 }
 0xa9a   :  { %2697 = vmatprep.subr.bf16.mxu1 %v5748_v51 }
 0xa9b   :  { %v2631_v23 = vpop.permute.xlu1 %2630 }
 0xa9c   :  { %v2632_v44 = vsel %vm1981_vm2, %v2629_v1, %v2631_v23 }
 0xa9d   :  { %2698 = vmatpush1.bf16.msra.mxu1 %v2617_v59  ;;  %v2802_v59 = vld [vmem:[#allocation10 + $0x80] sm:$0xff] }
 0xa9e   :  { %2699 = vmatprep.subr.bf16.mxu1 %v5748_v51 }
 0xa9f   :  { %v2646_v28 = vpop.permute.xlu1 %2645 }
 0xaa0   :  { %v2647_v47 = vsel %vm1997_vm3, %v2644_v10, %v2646_v28  ;;  %v2666_v4 = vpop.permute.xlu0 %2665  ;;  %v2948_v10 = vld [vmem:[#allocation10 + $0x1c8] sm:$0xff] }
 0xaa1   :  { %2700 = vmatpush1.bf16.msra.mxu1 %v2632_v44 }
 0xaa2   :  { %2701 = vmatprep.subr.bf16.mxu1 %v5748_v51  ;;  %v5342_v51 = vld [vmem:[%s5714_s10 + $0x38] sm:$0xff] }
 0xaa3   :  { %3341 = vperm.xlu1 %3896, %v5342_v51  }
 0xaa4   :  { %v2671_v60 = vpop.permute.xlu0 %2670 }
 0xaa5   :  { %2702 = vmatpush1.bf16.msra.mxu1 %v2647_v47  ;;  %v2977_v47 = vld [vmem:[#allocation10 + $0x208] sm:$0xff] }
 0xaa7   :  { %3897 = vset.pattern.permute.xlu1 %v5757_v52 }
 0xaa8   :  { %2718 = vmatmul.mubr.bf16.vlgmr.msra.gmra.mrb[12].mxu1 %v3910_v7  ;;  %3443 = vperm.xlu1 %3897, %v5299_v58   ;;  %v3006_v7 = vld [vmem:[#allocation10 + $0x248] sm:$0xff] }
 0xaa9   :  { %v2748_v52 = vpop.permute.xlu0 %2747 }
 0xaac   :  { %3447 = vperm.xlu1 %3897, %v3302_v37  }
 0xab0   :  { %v2732_v55 = vpop.permute.xlu1 %2731 }
 0xab5   :  { %v2744_v40 = vpop.permute.xlu1 %2743 }
 0xaba   :  { %v2736_v14 = vpop.permute.xlu1 %2735 }
 0xb7b   :  { %v2719_v53 = vpop.f32.mrb[12].mxu1 }
 0xb7c   :  { %v2720_v2 = vadd.f32 %v2719_v53, %v2666_v4  ;;  %v2721_v9 = vpop.f32.mrb[13].mxu1  ;;  %v3035_v4 = vld [vmem:[#allocation10 + $0x288] sm:$0xff]  ;;  %v2756_v53 = vld [vmem:[#allocation10 + $0x20] sm:$0xff] }
 0xb7d   :  { %v2722_v17 = vpop.f32.mrb[14].mxu1 }
 0xb7e   :  { %v2726_v11 = vmax.f32 %v2720_v2, 0.0  ;;  %v2723_v20 = vadd.f32 %v2722_v17, %v2671_v60  ;;  %v2724_v3 = vpop.f32.mrb[15].mxu1  ;;  %v3064_v60 = vld [vmem:[#allocation10 + $0x2c8] sm:$0xff] }
 0xb7f   :  { %v3093_v17 = vld [vmem:[#allocation10 + $0x308] sm:$0xff] }
 0xb80   :  { %v2738_v63 = vmul.f32 %v2732_v55, %v2726_v11  ;;  %v2727_v49 = vmax.f32 %v2723_v20, 0.0 }
 0xb82   :  { %v2740_v57 = vadd.f32 %v2738_v63, %v5178_v42  ;;  %v2739_v41 = vmul.f32 %v2736_v14, %v2727_v49  ;;  %v3122_v63 = vld [vmem:[#allocation10 + $0x348] sm:$0xff] }
 0xb83   :  { %v3151_v49 = vld [vmem:[#allocation10 + $0x388] sm:$0xff] }
 0xb84   :  { %v2750_v38 = vadd.f32 %v2744_v40, %v2740_v57  ;;  %v2741_v62 = vadd.f32 %v2739_v41, %v5181_v13  ;;  %v2831_v40 = vld [vmem:[#allocation10 + $0xc0] sm:$0xff] }
 0xb86   :  { %v5349_v18 = vrot.slane %v2750_v38, %v4083_v24  ;;  %v5352_v19 = vrot.slane %v2750_v38, %v4100_v32  ;;  %v5356_v56 = vrot.slane %v2750_v38, %v4205_v36  ;;  %v5361_v61 = vrot.slane %v2750_v38, %v4220_v48 }
 0xb87   :  { %v5364_v58 = vrot.slane %v2750_v38, %v4094_v30  ;;  %v2751_v45 = vadd.f32 %v2748_v52, %v2741_v62  ;;  %v5367_v13 = vrot.slane %v2750_v38, %v4103_v33  ;;  %v5370_v15 = vrot.slane %v2750_v38, %v4086_v25 }
 0xb88   :  { %v2765_v29 = vmul.f32 %v5349_v18, %v2753_v21  ;;  %v2786_v42 = vmul.f32 %v5352_v19, %v2774_v39  ;;  %v2815_v5 = vmul.f32 %v5356_v56, %v2803_v16  ;;  %v5374_v43 = vrot.slane %v2750_v38, %v4097_v31  ;;  %v2806_v39 = vld [vmem:[#allocation10 + $0xa0] sm:$0xff] }
 0xb89   :  { %v2844_v22 = vmul.f32 %v5361_v61, %v2832_v27  ;;  %v2873_v54 = vmul.f32 %v5364_v58, %v2861_v35  ;;  %v5379_v26 = vrot.slane %v2751_v45, %v4083_v24  ;;  %v5382_v34 = vrot.slane %v2751_v45, %v4100_v32  ;;  %v2918_v16 = vld [vmem:[#allocation10 + $0x180] sm:$0xff] }
 0xb8a   :  { %v2794_v46 = vadd.f32 %v2786_v42, %v2765_v29  ;;  %v2764_v23 = vmul.f32 %v5349_v18, %v2752_v12  ;;  %v5386_v1 = vrot.slane %v2751_v45, %v4205_v36  ;;  %v2902_v44 = vmul.f32 %v5367_v13, %v2890_v50  ;;  %v2889_v42 = vld [vmem:[#allocation10 + $0x140] sm:$0xff] }
 0xb8b   :  { %v2931_v28 = vmul.f32 %v5370_v15, %v2919_v0  ;;  %v2785_v24 = vmul.f32 %v5352_v19, %v2773_v8  ;;  %v5392_v37 = vrot.slane %v2751_v45, %v4220_v48  ;;  %v5395_v32 = vrot.slane %v2751_v45, %v4094_v30  ;;  %v2777_v30 = vld [vmem:[#allocation10 + $0x60] sm:$0xff] }
 0xb8c   :  { %v2823_v6 = vadd.f32 %v2815_v5, %v2794_v46  ;;  %v5398_v55 = vrot.slane %v2751_v45, %v4103_v33  ;;  %v5401_v2 = vrot.slane %v2751_v45, %v4086_v25  ;;  %v5404_v9 = vrot.slane %v2751_v45, %v4097_v31  ;;  %v2860_v25 = vld [vmem:[#allocation10 + $0x100] sm:$0xff]  ;;  %v3180_v31 = vld [vmem:[#allocation10 + $0x3c8] sm:$0xff] }
 0xb8d   :  { %v2793_v48 = vadd.f32 %v2785_v24, %v2764_v23  ;;  %v2814_v11 = vmul.f32 %v5356_v56, %v2802_v59  ;;  %v2960_v33 = vmul.f32 %v5374_v43, %v2948_v10  ;;  %v2989_v3 = vmul.f32 %v5379_v26, %v2977_v47  ;;  %v2947_v45 = vld [vmem:[#allocation10 + $0x1c0] sm:$0xff] }
 0xb8e   :  { %v2852_v36 = vadd.f32 %v2844_v22, %v2823_v6  ;;  %v3018_v14 = vmul.f32 %v5382_v34, %v3006_v7  ;;  %v5411_v57 = vmul.f32 %v5386_v1, %v3035_v4  ;;  %v2843_v38 = vmul.f32 %v5361_v61, %v2831_v40  ;;  %v2976_v50 = vld [vmem:[#allocation10 + $0x200] sm:$0xff]  ;;  %v2775_v4 = vld [vmem:[#allocation10 + $0x50] sm:$0xff] }
 0xb8f   :  { %v2822_v41 = vadd.f32 %v2814_v11, %v2793_v48  ;;  %v2768_v21 = vmul.f32 %v5349_v18, %v2756_v53  ;;  %v5416_v52 = vmul.f32 %v5392_v37, %v3064_v60  ;;  %v5419_v29 = vmul.f32 %v5395_v32, %v3093_v17  ;;  %v2835_v0 = vld [vmem:[#allocation10 + $0xe0] sm:$0xff] }
 0xb90   :  { %v2881_v20 = vadd.f32 %v2873_v54, %v2852_v36  ;;  %v2789_v27 = vmul.f32 %v5352_v19, %v2777_v30  ;;  %v5423_v35 = vmul.f32 %v5398_v55, %v3122_v63  ;;  %v5426_v12 = vmul.f32 %v5401_v2, %v3151_v49  ;;  %v3005_v54 = vld [vmem:[#allocation10 + $0x240] sm:$0xff] }
 0xb91   :  { %v2851_v46 = vadd.f32 %v2843_v38, %v2822_v41  ;;  %v2872_v5 = vmul.f32 %v5364_v58, %v2860_v25  ;;  %v5430_v22 = vmul.f32 %v5404_v9, %v3180_v31  ;;  %v3034_v6 = vld [vmem:[#allocation10 + $0x280] sm:$0xff]  ;;  %v2818_v59 = vmul.f32 %v5356_v56, %v2806_v39  ;;  %v2804_v25 = vld [vmem:[#allocation10 + $0x90] sm:$0xff] }
 0xb92   :  { %v2910_v62 = vadd.f32 %v2902_v44, %v2881_v20  ;;  %v2797_v23 = vadd.f32 %v2789_v27, %v2768_v21  ;;  %v2754_v44 = vld [vmem:[#allocation10 + $0x10] sm:$0xff]  ;;  %v2901_v47 = vmul.f32 %v5367_v13, %v2889_v42  ;;  %v2930_v7 = vmul.f32 %v5370_v15, %v2918_v16  ;;  %v2864_v36 = vld [vmem:[#allocation10 + $0x120] sm:$0xff] }
 0xb93   :  { %v2880_v10 = vadd.f32 %v2872_v5, %v2851_v46  ;;  %v2959_v24 = vmul.f32 %v5374_v43, %v2947_v45  ;;  %v3063_v53 = vld [vmem:[#allocation10 + $0x2c0] sm:$0xff]  ;;  %v2847_v48 = vmul.f32 %v5361_v61, %v2835_v0  ;;  %v3017_v20 = vmul.f32 %v5382_v34, %v3005_v54  ;;  %v2833_v46 = vld [vmem:[#allocation10 + $0xd0] sm:$0xff] }
 0xb94   :  { %v2939_v8 = vadd.f32 %v2931_v28, %v2910_v62  ;;  %v2988_v28 = vmul.f32 %v5379_v26, %v2976_v50  ;;  %v3092_v60 = vld [vmem:[#allocation10 + $0x300] sm:$0xff]  ;;  %v2826_v17 = vadd.f32 %v2818_v59, %v2797_v23  ;;  %v3046_v63 = vmul.f32 %v5386_v1, %v3034_v6 }
 0xb95   :  { %v2893_v11 = vld [vmem:[#allocation10 + $0x160] sm:$0xff]  ;;  %v2909_v30 = vadd.f32 %v2901_v47, %v2880_v10  ;;  %v2766_v49 = vmul.f32 %v5349_v18, %v2754_v44  ;;  %v2876_v21 = vmul.f32 %v5364_v58, %v2864_v36  ;;  %v2787_v62 = vmul.f32 %v5352_v19, %v2775_v4  ;;  %v2862_v47 = vld [vmem:[#allocation10 + $0x110] sm:$0xff] }
 0xb96   :  { %v2968_v40 = vadd.f32 %v2960_v33, %v2939_v8  ;;  %v3121_v41 = vld [vmem:[#allocation10 + $0x340] sm:$0xff]  ;;  %v2855_v33 = vadd.f32 %v2847_v48, %v2826_v17  ;;  %v3075_v16 = vmul.f32 %v5392_v37, %v3063_v53  ;;  %v5445_v45 = vmul.f32 %v5395_v32, %v3092_v60  ;;  %v2758_v53 = vld [vmem:[#allocation10 + $0x30] sm:$0xff] }
 0xb97   :  { %v3150_v38 = vld [vmem:[#allocation10 + $0x380] sm:$0xff]  ;;  %v2938_v42 = vadd.f32 %v2930_v7, %v2909_v30  ;;  %v2905_v27 = vmul.f32 %v5367_v13, %v2893_v11  ;;  %v2795_v54 = vadd.f32 %v2787_v62, %v2766_v49  ;;  %v2816_v6 = vmul.f32 %v5356_v56, %v2804_v25  ;;  %v2779_v60 = vld [vmem:[#allocation10 + $0x70] sm:$0xff] }
 0xb98   :  { %v2997_v31 = vadd.f32 %v2989_v3, %v2968_v40  ;;  %v2922_v39 = vld [vmem:[#allocation10 + $0x1a0] sm:$0xff]  ;;  %v2884_v3 = vadd.f32 %v2876_v21, %v2855_v33  ;;  %v5450_v59 = vmul.f32 %v5398_v55, %v3121_v41  ;;  %v5453_v44 = vmul.f32 %v5401_v2, %v3150_v38  ;;  %v2891_v30 = vld [vmem:[#allocation10 + $0x150] sm:$0xff] }
 0xb99   :  { %v3179_v50 = vld [vmem:[#allocation10 + $0x3c0] sm:$0xff]  ;;  %v2967_v23 = vadd.f32 %v2959_v24, %v2938_v42  ;;  %v2934_v10 = vmul.f32 %v5370_v15, %v2922_v39  ;;  %v2824_v4 = vadd.f32 %v2816_v6, %v2795_v54  ;;  %v2845_v40 = vmul.f32 %v5361_v61, %v2833_v46  ;;  %v2808_v38 = vld [vmem:[#allocation10 + $0xb0] sm:$0xff] }
 0xb9a   :  { %v3026_v5 = vadd.f32 %v3018_v14, %v2997_v31  ;;  %v2951_v0 = vld [vmem:[#allocation10 + $0x1e0] sm:$0xff]  ;;  %v2913_v14 = vadd.f32 %v2905_v27, %v2884_v3  ;;  %v5459_v24 = vmul.f32 %v5404_v9, %v3179_v50  ;;  %v2874_v41 = vmul.f32 %v5364_v58, %v2862_v47  ;;  %v2837_v50 = vld [vmem:[#allocation10 + $0xf0] sm:$0xff] }
 0xb9b   :  { %v2980_v8 = vld [vmem:[#allocation10 + $0x220] sm:$0xff]  ;;  %v2996_v17 = vadd.f32 %v2988_v28, %v2967_v23  ;;  %v2963_v48 = vmul.f32 %v5374_v43, %v2951_v0  ;;  %v2853_v31 = vadd.f32 %v2845_v40, %v2824_v4  ;;  %v2920_v28 = vld [vmem:[#allocation10 + $0x190] sm:$0xff]  ;;  %v2770_v39 = vmul.f32 %v5349_v18, %v2758_v53 }
 0xb9c   :  { %v3055_v7 = vadd.f32 %v5411_v57, %v3026_v5  ;;  %v3009_v36 = vld [vmem:[#allocation10 + $0x260] sm:$0xff]  ;;  %v2992_v11 = vmul.f32 %v5379_v26, %v2980_v8  ;;  %v2942_v25 = vadd.f32 %v2934_v10, %v2913_v14  ;;  %v2791_v62 = vmul.f32 %v5352_v19, %v2779_v60  ;;  %v2949_v8 = vld [vmem:[#allocation10 + $0x1d0] sm:$0xff] }
 0xb9d   :  { %v3038_v57 = vld [vmem:[#allocation10 + $0x2a0] sm:$0xff]  ;;  %v3025_v33 = vadd.f32 %v3017_v20, %v2996_v17  ;;  %v3021_v21 = vmul.f32 %v5382_v34, %v3009_v36  ;;  %v2882_v5 = vadd.f32 %v2874_v41, %v2853_v31  ;;  %v2820_v54 = vmul.f32 %v5356_v56, %v2808_v38  ;;  %v2978_v4 = vld [vmem:[#allocation10 + $0x210] sm:$0xff] }
 0xb9e   :  { %v3084_v49 = vadd.f32 %v5416_v52, %v3055_v7  ;;  %v2971_v27 = vadd.f32 %v2963_v48, %v2942_v25  ;;  %v3067_v46 = vld [vmem:[#allocation10 + $0x2e0] sm:$0xff]  ;;  %v2903_v52 = vmul.f32 %v5367_v13, %v2891_v30  ;;  %v3050_v0 = vmul.f32 %v5386_v1, %v3038_v57  ;;  %v2866_v7 = vld [vmem:[#allocation10 + $0x130] sm:$0xff] }
 0xb9f   :  { %v3054_v3 = vadd.f32 %v3046_v63, %v3025_v33  ;;  %v2799_v20 = vadd.f32 %v2791_v62, %v2770_v39  ;;  %v3096_v10 = vld [vmem:[#allocation10 + $0x320] sm:$0xff]  ;;  %v3079_v36 = vmul.f32 %v5392_v37, %v3067_v46  ;;  %v2849_v63 = vmul.f32 %v5361_v61, %v2837_v50  ;;  %v3007_v25 = vld [vmem:[#allocation10 + $0x250] sm:$0xff] }
 0xba0   :  { %v3113_v42 = vadd.f32 %v5419_v29, %v3084_v49  ;;  %v3000_v23 = vadd.f32 %v2992_v11, %v2971_v27  ;;  %v2911_v47 = vadd.f32 %v2903_v52, %v2882_v5  ;;  %v2932_v29 = vmul.f32 %v5370_v15, %v2920_v28  ;;  %v3125_v17 = vld [vmem:[#allocation10 + $0x360] sm:$0xff]  ;;  %v2895_v11 = vld [vmem:[#allocation10 + $0x170] sm:$0xff]  ;;  %v2776_v28 = vld [vmem:[#allocation10 + $0x58] sm:$0xff] }
 0xba1   :  { %v3083_v14 = vadd.f32 %v3075_v16, %v3054_v3  ;;  %v2828_v40 = vadd.f32 %v2820_v54, %v2799_v20  ;;  %v3108_v49 = vmul.f32 %v5395_v32, %v3096_v10  ;;  %v2878_v57 = vmul.f32 %v5364_v58, %v2866_v7  ;;  %v2924_v31 = vld [vmem:[#allocation10 + $0x1b0] sm:$0xff]  ;;  %v2805_v3 = vld [vmem:[#allocation10 + $0x98] sm:$0xff] }
 0xba2   :  { %v3142_v6 = vadd.f32 %v5423_v35, %v3113_v42  ;;  %v3029_v60 = vadd.f32 %v3021_v21, %v3000_v23  ;;  %v2940_v48 = vadd.f32 %v2932_v29, %v2911_v47  ;;  %v2961_v35 = vmul.f32 %v5374_v43, %v2949_v8  ;;  %v2755_v21 = vld [vmem:[#allocation10 + $0x18] sm:$0xff]  ;;  %v3036_v62 = vld [vmem:[#allocation10 + $0x290] sm:$0xff] }
 0xba3   :  { %v3112_v30 = vadd.f32 %v5445_v45, %v3083_v14  ;;  %v2857_v16 = vadd.f32 %v2849_v63, %v2828_v40  ;;  %v2990_v33 = vmul.f32 %v5379_v26, %v2978_v4  ;;  %v3137_v45 = vmul.f32 %v5398_v55, %v3125_v17  ;;  %v2953_v46 = vld [vmem:[#allocation10 + $0x1f0] sm:$0xff]  ;;  %v2834_v14 = vld [vmem:[#allocation10 + $0xd8] sm:$0xff]  ;;  %v3183_v4 = vld [vmem:[#allocation10 + $0x3e0] sm:$0xff] }
 0xba4   :  { %v3171_v53 = vadd.f32 %v5426_v12, %v3142_v6  ;;  %v3058_v38 = vadd.f32 %v3050_v0, %v3029_v60  ;;  %v2969_v12 = vadd.f32 %v2961_v35, %v2940_v48  ;;  %v2907_v27 = vmul.f32 %v5367_v13, %v2895_v11  ;;  %v3065_v8 = vld [vmem:[#allocation10 + $0x2d0] sm:$0xff] }
 0xba5   :  { %v3141_v39 = vadd.f32 %v5450_v59, %v3112_v30  ;;  %v2886_v42 = vadd.f32 %v2878_v57, %v2857_v16  ;;  %v3019_v52 = vmul.f32 %v5382_v34, %v3007_v25  ;;  %v2936_v50 = vmul.f32 %v5370_v15, %v2924_v31  ;;  %v3154_v59 = vld [vmem:[#allocation10 + $0x3a0] sm:$0xff]  ;;  %v2982_v7 = vld [vmem:[#allocation10 + $0x230] sm:$0xff]  ;;  %v2863_v30 = vld [vmem:[#allocation10 + $0x118] sm:$0xff] }
 0xba6   :  { %v5482_v41 = vadd.f32 %v5430_v22, %v3171_v53  ;;  %v3087_v22 = vadd.f32 %v3079_v36, %v3058_v38  ;;  %v2998_v5 = vadd.f32 %v2990_v33, %v2969_v12  ;;  %v2767_v54 = vmul.f32 %v5349_v18, %v2755_v21  ;;  %v3011_v11 = vld [vmem:[#allocation10 + $0x270] sm:$0xff] }
 0xba7   :  { %v3170_v0 = vadd.f32 %v5453_v44, %v3141_v39  ;;  %v2915_v20 = vadd.f32 %v2907_v27, %v2886_v42  ;;  %v2788_v6 = vmul.f32 %v5352_v19, %v2776_v28  ;;  %v3048_v47 = vmul.f32 %v5386_v1, %v3036_v62  ;;  %v3094_v44 = vld [vmem:[#allocation10 + $0x310] sm:$0xff]  ;;  %v2892_v28 = vld [vmem:[#allocation10 + $0x158] sm:$0xff]  ;;  %v2757_v39 = vld [vmem:[#allocation10 + $0x28] sm:$0xff] }
 0xba8   :  { %3241 = vrot.lane.b32.xlu0 %v5482_v41, %s3967_s1  ;;  %v3116_v23 = vadd.f32 %v3108_v49, %v3087_v22  ;;  %v3027_v10 = vadd.f32 %v3019_v52, %v2998_v5  ;;  %v2965_v29 = vmul.f32 %v5374_v43, %v2953_v46  ;;  %v2817_v53 = vmul.f32 %v5356_v56, %v2805_v3  ;;  %v3123_v49 = vld [vmem:[#allocation10 + $0x350] sm:$0xff]  ;;  %v2778_v22 = vld [vmem:[#allocation10 + $0x68] sm:$0xff] }
 0xba9   :  { %v5498_v36 = vadd.f32 %v5459_v24, %v3170_v0  ;;  %v2944_v40 = vadd.f32 %v2936_v50, %v2915_v20  ;;  %v2796_v63 = vadd.f32 %v2788_v6, %v2767_v54  ;;  %v3166_v17 = vmul.f32 %v5401_v2, %v3154_v59  ;;  %v3040_v16 = vld [vmem:[#allocation10 + $0x2b0] sm:$0xff]  ;;  %v2921_v59 = vld [vmem:[#allocation10 + $0x198] sm:$0xff] }
 0xbaa   :  { %v3145_v60 = vadd.f32 %v3137_v45, %v3116_v23  ;;  %v3056_v48 = vadd.f32 %v3048_v47, %v3027_v10  ;;  %v3077_v35 = vmul.f32 %v5392_v37, %v3065_v8  ;;  %v2994_v25 = vmul.f32 %v5379_v26, %v2982_v7  ;;  %v3152_v45 = vld [vmem:[#allocation10 + $0x390] sm:$0xff]  ;;  %v2807_v10 = vld [vmem:[#allocation10 + $0xa8] sm:$0xff] }
 0xbab   :  { %3239 = vrot.lane.b32.xlu1 %v5498_v36, %s3967_s1  ;;  %v2973_v24 = vadd.f32 %v2965_v29, %v2944_v40  ;;  %v2825_v57 = vadd.f32 %v2817_v53, %v2796_v63  ;;  %v2846_v31 = vmul.f32 %v5361_v61, %v2834_v14  ;;  %v3195_v12 = vmul.f32 %v5404_v9, %v3183_v4  ;;  %v3069_v0 = vld [vmem:[#allocation10 + $0x2f0] sm:$0xff]  ;;  %v2950_v14 = vld [vmem:[#allocation10 + $0x1d8] sm:$0xff] }
 0xbac   :  { %v3174_v38 = vadd.f32 %v3166_v17, %v3145_v60  ;;  %v3085_v33 = vadd.f32 %v3077_v35, %v3056_v48  ;;  %v3106_v21 = vmul.f32 %v5395_v32, %v3094_v44  ;;  %v3023_v42 = vmul.f32 %v5382_v34, %v3011_v11  ;;  %v3181_v8 = vld [vmem:[#allocation10 + $0x3d0] sm:$0xff]  ;;  %v2836_v60 = vld [vmem:[#allocation10 + $0xe8] sm:$0xff]  ;;  %v2979_v11 = vld [vmem:[#allocation10 + $0x218] sm:$0xff] }
 0xbad   :  { %v3002_v62 = vadd.f32 %v2994_v25, %v2973_v24  ;;  %v2854_v27 = vadd.f32 %v2846_v31, %v2825_v57  ;;  %v2875_v46 = vmul.f32 %v5364_v58, %v2863_v30  ;;  %v3135_v50 = vmul.f32 %v5398_v55, %v3123_v49  ;;  %v3098_v7 = vld [vmem:[#allocation10 + $0x330] sm:$0xff] }
 0xbae   :  { %v5511_v5 = vadd.f32 %v3195_v12, %v3174_v38  ;;  %v3114_v52 = vadd.f32 %v3106_v21, %v3085_v33  ;;  %v3052_v3 = vmul.f32 %v5386_v1, %v3040_v16  ;;  %v2904_v6 = vmul.f32 %v5367_v13, %v2892_v28  ;;  %v3127_v35 = vld [vmem:[#allocation10 + $0x370] sm:$0xff]  ;;  %v2865_v38 = vld [vmem:[#allocation10 + $0x128] sm:$0xff]  ;;  %v2759_v12 = vld [vmem:[#allocation10 + $0x38] sm:$0xff] }
 0xbaf   :  { %v3031_v20 = vadd.f32 %v3023_v42, %v3002_v62  ;;  %v2883_v54 = vadd.f32 %v2875_v46, %v2854_v27  ;;  %v2769_v23 = vmul.f32 %v5349_v18, %v2757_v39  ;;  %v3164_v29 = vmul.f32 %v5401_v2, %v3152_v45  ;;  %v3156_v16 = vld [vmem:[#allocation10 + $0x3b0] sm:$0xff]  ;;  %v3008_v21 = vld [vmem:[#allocation10 + $0x258] sm:$0xff] }
 0xbb0   :  { %3247 = vrot.lane.b32.xlu0 %v5511_v5, %s3967_s1  ;;  %v3143_v47 = vadd.f32 %v3135_v50, %v3114_v52  ;;  %v2790_v4 = vmul.f32 %v5352_v19, %v2778_v22  ;;  %v3081_v40 = vmul.f32 %v5392_v37, %v3069_v0  ;;  %v2933_v53 = vmul.f32 %v5370_v15, %v2921_v59  ;;  %v2780_v45 = vld [vmem:[#allocation10 + $0x78] sm:$0xff]  ;;  %v3185_v27 = vld [vmem:[#allocation10 + $0x3f0] sm:$0xff]  ;;  %v2894_v50 = vld [vmem:[#allocation10 + $0x168] sm:$0xff] }
 0xbb1   :  { %v3060_v44 = vadd.f32 %v3052_v3, %v3031_v20  ;;  %v2912_v63 = vadd.f32 %v2904_v6, %v2883_v54  ;;  %v3193_v48 = vmul.f32 %v5404_v9, %v3181_v8  ;;  %v2819_v49 = vmul.f32 %v5356_v56, %v2807_v10  ;;  %v3037_v52 = vld [vmem:[#allocation10 + $0x298] sm:$0xff] }
 0xbb2   :  { %v3172_v17 = vadd.f32 %v3164_v29, %v3143_v47  ;;  %v2798_v30 = vadd.f32 %v2790_v4, %v2769_v23  ;;  %v3110_v25 = vmul.f32 %v5395_v32, %v3098_v7  ;;  %v2962_v31 = vmul.f32 %v5374_v43, %v2950_v14  ;;  %v2809_v20 = vld [vmem:[#allocation10 + $0xb8] sm:$0xff]  ;;  %v2923_v47 = vld [vmem:[#allocation10 + $0x1a8] sm:$0xff] }
 0xbb3   :  { %v3089_v24 = vadd.f32 %v3081_v40, %v3060_v44  ;;  %v2941_v57 = vadd.f32 %v2933_v53, %v2912_v63  ;;  %v2848_v39 = vmul.f32 %v5361_v61, %v2836_v60  ;;  %v3139_v42 = vmul.f32 %v5398_v55, %v3127_v35  ;;  %v3066_v10 = vld [vmem:[#allocation10 + $0x2d8] sm:$0xff] }
 0xbb4   :  { %v5527_v33 = vadd.f32 %v3193_v48, %v3172_v17  ;;  %v2827_v28 = vadd.f32 %v2819_v49, %v2798_v30  ;;  %v2991_v22 = vmul.f32 %v5379_v26, %v2979_v11  ;;  %v3168_v3 = vmul.f32 %v5401_v2, %v3156_v16  ;;  %v2838_v40 = vld [vmem:[#allocation10 + $0xf8] sm:$0xff] }
 0xbb5   :  { %v3118_v62 = vadd.f32 %v3110_v25, %v3089_v24  ;;  %v2970_v46 = vadd.f32 %v2962_v31, %v2941_v57  ;;  %v2877_v59 = vmul.f32 %v5364_v58, %v2865_v38  ;;  %v2771_v8 = vmul.f32 %v5349_v18, %v2759_v12  ;;  %v2952_v18 = vld [vmem:[#allocation10 + $0x1e8] sm:$0xff]  ;;  %v3095_v35 = vld [vmem:[#allocation10 + $0x318] sm:$0xff] }
 0xbb6   :  { %3243 = vrot.lane.b32.xlu1 %v5527_v33, %s3967_s1  ;;  %v2856_v0 = vadd.f32 %v2848_v39, %v2827_v28  ;;  %v3020_v23 = vmul.f32 %v5382_v34, %v3008_v21  ;;  %v2792_v29 = vmul.f32 %v5352_v19, %v2780_v45  ;;  %v3197_v7 = vmul.f32 %v5404_v9, %v3185_v27  ;;  %v2867_v30 = vld [vmem:[#allocation10 + $0x138] sm:$0xff]  ;;  %v2981_v25 = vld [vmem:[#allocation10 + $0x228] sm:$0xff] }
 0xbb7   :  { %v3147_v54 = vadd.f32 %v3139_v42, %v3118_v62  ;;  %v2999_v6 = vadd.f32 %v2991_v22, %v2970_v46  ;;  %v3049_v14 = vmul.f32 %v5386_v1, %v3037_v52  ;;  %v2906_v44 = vmul.f32 %v5367_v13, %v2894_v50  ;;  %v3124_v31 = vld [vmem:[#allocation10 + $0x358] sm:$0xff]  ;;  %v3010_v39 = vld [vmem:[#allocation10 + $0x268] sm:$0xff] }
 0xbb8   :  { %v2885_v4 = vadd.f32 %v2877_v59, %v2856_v0  ;;  %v2800_v60 = vadd.f32 %v2792_v29, %v2771_v8  ;;  %v2821_v17 = vmul.f32 %v5356_v56, %v2809_v20  ;;  %v3078_v48 = vmul.f32 %v5392_v37, %v3066_v10  ;;  %v2896_v21 = vld [vmem:[#allocation10 + $0x178] sm:$0xff]  ;;  %v3039_v50 = vld [vmem:[#allocation10 + $0x2a8] sm:$0xff] }
 0xbb9   :  { %v3176_v63 = vadd.f32 %v3168_v3, %v3147_v54  ;;  %v3028_v53 = vadd.f32 %v3020_v23, %v2999_v6  ;;  %v2935_v19 = vmul.f32 %v5370_v15, %v2923_v47  ;;  %v2850_v57 = vmul.f32 %v5361_v61, %v2838_v40  ;;  %v3153_v42 = vld [vmem:[#allocation10 + $0x398] sm:$0xff]  ;;  %v3068_v23 = vld [vmem:[#allocation10 + $0x2e8] sm:$0xff] }
 0xbba   :  { %v2914_v11 = vadd.f32 %v2906_v44, %v2885_v4  ;;  %v2829_v16 = vadd.f32 %v2821_v17, %v2800_v60  ;;  %v2964_v12 = vmul.f32 %v5374_v43, %v2952_v18  ;;  %v3107_v28 = vmul.f32 %v5395_v32, %v3095_v35  ;;  %v2925_v61 = vld [vmem:[#allocation10 + $0x1b8] sm:$0xff]  ;;  %v3097_v44 = vld [vmem:[#allocation10 + $0x328] sm:$0xff] }
 0xbbb   :  { %v5545_v49 = vadd.f32 %v3197_v7, %v3176_v63  ;;  %v3057_v24 = vadd.f32 %v3049_v14, %v3028_v53  ;;  %v2879_v62 = vmul.f32 %v5364_v58, %v2867_v30  ;;  %v2993_v46 = vmul.f32 %v5379_v26, %v2981_v25  ;;  %v3182_v59 = vld [vmem:[#allocation10 + $0x3d8] sm:$0xff]  ;;  %v5563_v53 = vpop.permute.xlu1 %3306  ;;  %v3126_v35 = vld [vmem:[#allocation10 + $0x368] sm:$0xff] }
 0xbbc   :  { %v2943_v38 = vadd.f32 %v2935_v19, %v2914_v11  ;;  %v2858_v45 = vadd.f32 %v2850_v57, %v2829_v16  ;;  %v3136_v52 = vmul.f32 %v5398_v55, %v3124_v31  ;;  %v2908_v0 = vmul.f32 %v5367_v13, %v2896_v21  ;;  %v2954_v54 = vld [vmem:[#allocation10 + $0x1f8] sm:$0xff]  ;;  %v3184_v21 = vld [vmem:[#allocation10 + $0x3e8] sm:$0xff] }
 0xbbd   :  { %3251 = vrot.lane.b32.xlu0 %v5545_v49, %s3967_s1  ;;  %v3086_v56 = vadd.f32 %v3078_v48, %v3057_v24  ;;  %v3022_v20 = vmul.f32 %v5382_v34, %v3010_v39  ;;  %v3165_v58 = vmul.f32 %v5401_v2, %v3153_v42  ;;  %v2937_v47 = vmul.f32 %v5370_v15, %v2925_v61  ;;  %v2983_v14 = vld [vmem:[#allocation10 + $0x238] sm:$0xff] }
 0xbbe   :  { %v2972_v27 = vadd.f32 %v2964_v12, %v2943_v38  ;;  %v2887_v3 = vadd.f32 %v2879_v62, %v2858_v45  ;;  %v3051_v7 = vmul.f32 %v5386_v1, %v3039_v50  ;;  %v3194_v13 = vmul.f32 %v5404_v9, %v3182_v59  ;;  %v3012_v17 = vld [vmem:[#allocation10 + $0x278] sm:$0xff] }
 0xbbf   :  { %v3115_v22 = vadd.f32 %v3107_v28, %v3086_v56  ;;  %v2966_v63 = vmul.f32 %v5374_v43, %v2954_v54  ;;  %v3080_v60 = vmul.f32 %v5392_v37, %v3068_v23  ;;  %v2995_v11 = vmul.f32 %v5379_v26, %v2983_v14  ;;  %v3041_v25 = vld [vmem:[#allocation10 + $0x2b8] sm:$0xff]  ;;  %v3155_v43 = vld [vmem:[#allocation10 + $0x3a8] sm:$0xff]  ;;  %v5573_v28 = vpop.permute.xlu1 %3316 }
 0xbc0   :  { %v3001_v8 = vadd.f32 %v2993_v46, %v2972_v27  ;;  %v2916_v10 = vadd.f32 %v2908_v0, %v2887_v3  ;;  %v5759_v19 = vmov 15   ;;  %v3109_v24 = vmul.f32 %v5395_v32, %v3097_v44  ;;  %v3070_v12 = vld [vmem:[#allocation10 + $0x2f8] sm:$0xff] }
 0xbc1   :  { %v3144_v6 = vadd.f32 %v3136_v52, %v3115_v22  ;;  %3389 = vperm.xlu0 %3894, %v5342_v51   ;;  %v3024_v57 = vmul.f32 %v5382_v34, %v3012_v17  ;;  %v3138_v38 = vmul.f32 %v5398_v55, %v3126_v35  ;;  %v3053_v26 = vmul.f32 %v5386_v1, %v3041_v25  ;;  %v3099_v62 = vld [vmem:[#allocation10 + $0x338] sm:$0xff] }
 0xbc2   :  { %v3030_v29 = vadd.f32 %v3022_v20, %v3001_v8  ;;  %v2945_v40 = vadd.f32 %v2937_v47, %v2916_v10  ;;  %v3167_v45 = vmul.f32 %v5401_v2, %v3155_v43  ;;  %v3082_v27 = vmul.f32 %v5392_v37, %v3070_v12  ;;  %v3128_v61 = vld [vmem:[#allocation10 + $0x378] sm:$0xff] }
 0xbc3   :  { %v3173_v4 = vadd.f32 %v3165_v58, %v3144_v6  ;;  %v3196_v34 = vmul.f32 %v5404_v9, %v3184_v21  ;;  %v3111_v52 = vmul.f32 %v5395_v32, %v3099_v62  ;;  %v3157_v3 = vld [vmem:[#allocation10 + $0x3b8] sm:$0xff]  ;;  %v3140_v1 = vmul.f32 %v5398_v55, %v3128_v61  ;;  %v5580_v59 = vpop.permute.xlu1 %3321 }
 0xbc4   :  { %v3059_v18 = vadd.f32 %v3051_v7, %v3030_v29  ;;  %v2974_v15 = vadd.f32 %v2966_v63, %v2945_v40  ;;  %v3186_v8 = vld [vmem:[#allocation10 + $0x3f8] sm:$0xff]  ;;  %v3169_v37 = vmul.f32 %v5401_v2, %v3157_v3  ;;  %v3210_v55 = vsel %vm1863_vm10, %v5482_v41, 0.0  ;;  %v5605_v41 = vpop.permute.xlu0 %3311 }
 0xbc5   :  { %v3202_v48 = vadd.f32 %v3194_v13, %v3173_v4  ;;  %3898 = vset.pattern.permute.xlu0 %v5759_v19  ;;  %v3198_v6 = vmul.f32 %v5404_v9, %v3186_v8  ;;  %v3207_v13 = vsel %vm1863_vm10, %v5498_v36, 0.0  ;;  %v3213_v63 = vsel %vm1863_vm10, %v5527_v33, 0.0 }
 0xbc6   :  { %v3088_v30 = vadd.f32 %v3080_v60, %v3059_v18  ;;  %v3003_v16 = vadd.f32 %v2995_v11, %v2974_v15  ;;  %v3219_v60 = vsel %vm1863_vm10, %v5511_v5, 0.0  ;;  %v3225_v36 = vsel %vm1863_vm10, %v5545_v49, 0.0 }
 0xbc7   :  { %3245 = vrot.lane.b32.xlu1 %v3202_v48, %s3967_s1  ;;  %v5585_v58 = vpop.permute.xlu1 %3361  ;;  %v3216_v47 = vsel %vm1863_vm10, %v3202_v48, 0.0 }
 0xbc8   :  { %v3117_v31 = vadd.f32 %v3109_v24, %v3088_v30  ;;  %v3032_v56 = vadd.f32 %v3024_v57, %v3003_v16  ;;  %v5611_v40 = vpop.permute.xlu0 %3431 }
 0xbca   :  { %v3146_v39 = vadd.f32 %v3138_v38, %v3117_v31  ;;  %v3061_v42 = vadd.f32 %v3053_v26, %v3032_v56 }
 0xbcb   :  { %v5588_v32 = vpop.permute.xlu1 %3365 }
 0xbcc   :  { %v3175_v46 = vadd.f32 %v3167_v45, %v3146_v39  ;;  %v3090_v22 = vadd.f32 %v3082_v27, %v3061_v42  ;;  %v5619_v17 = vpop.permute.xlu0 %3435  ;;  %v3485_v42 = vld [vmem:[%s5714_s10] sm:$0x3] }
 0xbce   :  { %v3204_v50 = vadd.f32 %v3196_v34, %v3175_v46  ;;  %v3119_v0 = vadd.f32 %v3111_v52, %v3090_v22 }
 0xbcf   :  { %v5592_v10 = vpop.permute.xlu1 %3423 }
 0xbd0   :  { %3249 = vrot.lane.b32.xlu1 %v3204_v50, %s3967_s1  ;;  %v3148_v20 = vadd.f32 %v3140_v1, %v3119_v0  ;;  %v3222_v9 = vsel %vm1863_vm10, %v3204_v50, 0.0  ;;  %v5625_v35 = vpop.permute.xlu0 %3377 }
 0xbd2   :  { %v3177_v54 = vadd.f32 %v3169_v37, %v3148_v20 }
 0xbd3   :  { %v5595_v2 = vpop.permute.xlu1 %3427 }
 0xbd4   :  { %v3206_v23 = vadd.f32 %v3198_v6, %v3177_v54  ;;  %v5629_v33 = vpop.permute.xlu0 %3381 }
 0xbd6   :  { %3253 = vrot.lane.b32.xlu1 %v3206_v23, %s3967_s1  ;;  %v3228_v7 = vsel %vm1863_vm10, %v3206_v23, 0.0 }
 0xbd7   :  { %v5598_v29 = vpop.permute.xlu1 %3326 }
 0xbd8   :  { %v5633_v19 = vpop.permute.xlu0 %3385 }
 0xbdb   :  { %v5601_v14 = vpop.permute.xlu1 %3369 }
 0xbdf   :  { %v5603_v4 = vpop.permute.xlu1 %3331 }
 0xbe0   :  { %3211 = vadd.xlane.f32.xlu0 %v3210_v55 }
 0xbe3   :  { %v5609_v44 = vpop.permute.xlu1 %3373 }
 0xbe4   :  { %3217 = vadd.xlane.f32.xlu0 %v3216_v47 }
 0xbe7   :  { %v5615_v18 = vpop.permute.xlu1 %3336 }
 0xbe8   :  { %3223 = vadd.xlane.f32.xlu0 %v3222_v9 }
 0xbeb   :  { %v5623_v48 = vpop.permute.xlu1 %3439 }
 0xbec   :  { %3229 = vadd.xlane.f32.xlu0 %v3228_v7 }
 0xbef   :  { %v5627_v15 = vpop.permute.xlu1 %3341 }
 0xbf3   :  { %v5631_v11 = vpop.permute.xlu1 %3443 }
 0xbf7   :  { %v5635_v30 = vpop.permute.xlu1 %3447 }
 0xbfa   :  { %3208 = vadd.xlane.f32.xlu1 %v3207_v13 }
 0xbfe   :  { %3214 = vadd.xlane.f32.xlu1 %v3213_v63 }
 0xc02   :  { %3220 = vadd.xlane.f32.xlu1 %v3219_v60 }
 0xc06   :  { %3226 = vadd.xlane.f32.xlu1 %v3225_v36 }
 0xc1a   :  { %v3242_v5 = vpop.permute.xlu0 %3241 }
 0xc1b   :  { %v3266_v24 = vsel %vm1863_vm10, %v3242_v5, 0.0 }
 0xc1c   :  { %3267 = vadd.xlane.f32.xlu1 %v3266_v24 }
 0xc1d   :  { %v3240_v49 = vpop.permute.xlu1 %3239 }
 0xc1e   :  { %v3263_v25 = vsel %vm1863_vm10, %v3240_v49, 0.0 }
 0xc1f   :  { %3264 = vadd.xlane.f32.xlu0 %v3263_v25 }
 0xc22   :  { %v3248_v43 = vpop.permute.xlu0 %3247 }
 0xc23   :  { %v3275_v16 = vsel %vm1863_vm10, %v3248_v43, 0.0 }
 0xc24   :  { %3276 = vadd.xlane.f32.xlu1 %v3275_v16 }
 0xc28   :  { %v3244_v57 = vpop.permute.xlu1 %3243 }
 0xc29   :  { %v3269_v31 = vsel %vm1863_vm10, %v3244_v57, 0.0 }
 0xc2a   :  { %3270 = vadd.xlane.f32.xlu0 %v3269_v31 }
 0xc2f   :  { %v3252_v38 = vpop.permute.xlu0 %3251 }
 0xc30   :  { %v3281_v12 = vsel %vm1863_vm10, %v3252_v38, 0.0 }
 0xc31   :  { %3282 = vadd.xlane.f32.xlu1 %v3281_v12 }
 0xc39   :  { %v3246_v21 = vpop.permute.xlu1 %3245 }
 0xc3a   :  { %v3272_v56 = vsel %vm1863_vm10, %v3246_v21, 0.0 }
 0xc3b   :  { %3273 = vadd.xlane.f32.xlu0 %v3272_v56 }
 0xc40   :  { %v5649_v27 = vpop.permute.xlu0 %3389 }
 0xc42   :  { %v3250_v26 = vpop.permute.xlu1 %3249  ;;  %3451 = vperm.xlu1 %3897, %v5342_v51  }
 0xc43   :  { %v3278_v39 = vsel %vm1863_vm10, %v3250_v26, 0.0 }
 0xc44   :  { %3279 = vadd.xlane.f32.xlu0 %v3278_v39 }
 0xc48   :  { %v3254_v45 = vpop.permute.xlu1 %3253 }
 0xc49   :  { %v3284_v62 = vsel %vm1863_vm10, %v3254_v45, 0.0 }
 0xc4a   :  { %3285 = vadd.xlane.f32.xlu0 %v3284_v62 }
 0xc60   :  { %3488 = vperm.xlu0 %3898, %v3485_v42  }
 0xc6d   :  { %v3212_v46 = vpop.xlane.xlu0 %3211 }
 0xc71   :  { %v3218_v61 = vpop.xlane.xlu0 %3217 }
 0xc75   :  { %v3224_v52 = vpop.xlane.xlu0 %3223 }
 0xc79   :  { %v5651_v50 = vpop.xlane.xlu0 %3229 }
 0xc87   :  { %v3209_v34 = vpop.xlane.xlu1 %3208 }
 0xc8b   :  { %v3215_v22 = vpop.xlane.xlu1 %3214 }
 0xc8f   :  { %v3221_v51 = vpop.xlane.xlu1 %3220 }
 0xc93   :  { %v3227_v3 = vpop.xlane.xlu1 %3226 }
 0xca9   :  { %v3268_v1 = vpop.xlane.xlu1 %3267 }
 0xcaa   :  { %v3289_v37 = vsel %vm1929_vm15, %v3212_v46, %v3268_v1 }
 0xcab   :  { %v3345_v23 = vadd.f32 %v5605_v41, %v3289_v37 }
 0xcac   :  { %v3265_v0 = vpop.xlane.xlu0 %3264 }
 0xcad   :  { %v3288_v20 = vsel %vm1929_vm15, %v3209_v34, %v3265_v0  ;;  %v3353_v9 = vmax.f32 %v3345_v23, 0.0 }
 0xcae   :  { %v3344_v6 = vadd.f32 %v5563_v53, %v3288_v20 }
 0xcaf   :  { %v3393_v60 = vmul.f32 %v5588_v32, %v3353_v9  ;;  %v3455_v24 = vmul.f32 %v5595_v2, %v3353_v9 }
 0xcb0   :  { %v3352_v47 = vmax.f32 %v3344_v6, 0.0 }
 0xcb1   :  { %v3277_v7 = vpop.xlane.xlu1 %3276  ;;  %v3402_v32 = vsel %vm3400_vm0, %v3393_v60, 0.0  ;;  %v3463_v2 = vsel %vm3400_vm0, %v3455_v24, 0.0 }
 0xcb2   :  { %v3392_v63 = vmul.f32 %v5585_v58, %v3352_v47  ;;  %v3292_v36 = vsel %vm1929_vm15, %v3221_v51, %v3277_v7  ;;  %v3454_v5 = vmul.f32 %v5592_v10, %v3352_v47 }
 0xcb3   :  { %v3348_v49 = vadd.f32 %v5598_v29, %v3292_v36 }
 0xcb4   :  { %v3401_v58 = vsel %vm3400_vm0, %v3392_v63, 0.0  ;;  %v3462_v10 = vsel %vm3400_vm0, %v3454_v5, 0.0 }
 0xcb5   :  { %v3403_v31 = vadd.f32 %v3402_v32, %v3401_v58  ;;  %v3356_v29 = vmax.f32 %v3348_v49, 0.0  ;;  %v3464_v12 = vadd.f32 %v3463_v2, %v3462_v10 }
 0xcb7   :  { %v3271_v8 = vpop.xlane.xlu0 %3270  ;;  %v3396_v42 = vmul.f32 %v5625_v35, %v3356_v29  ;;  %v3458_v46 = vmul.f32 %v5623_v48, %v3356_v29 }
 0xcb8   :  { %v3290_v54 = vsel %vm1929_vm15, %v3215_v22, %v3271_v8 }
 0xcb9   :  { %v3346_v55 = vadd.f32 %v5573_v28, %v3290_v54  ;;  %v3469_v0 = vsel %vm3400_vm0, %v3458_v46, 0.0 }
 0xcbb   :  { %v3354_v13 = vmax.f32 %v3346_v55, 0.0 }
 0xcbd   :  { %v3394_v53 = vmul.f32 %v5601_v14, %v3354_v13  ;;  %v3456_v28 = vmul.f32 %v5611_v40, %v3354_v13 }
 0xcbe   :  { %v3283_v16 = vpop.xlane.xlu1 %3282 }
 0xcbf   :  { %v3404_v14 = vsel %vm3400_vm0, %v3394_v53, 0.0  ;;  %v3465_v40 = vsel %vm3400_vm0, %v3456_v28, 0.0  ;;  %v3294_v38 = vsel %vm1929_vm15, %v3227_v3, %v3283_v16  ;;  %v3408_v3 = vsel %vm3400_vm0, %v3396_v42, 0.0 }
 0xcc0   :  { %v3466_v26 = vadd.f32 %v3465_v40, %v3464_v12  ;;  %v3350_v62 = vadd.f32 %v5615_v18, %v3294_v38 }
 0xcc8   :  { %v3274_v41 = vpop.xlane.xlu0 %3273 }
 0xcc9   :  { %v3291_v25 = vsel %vm1929_vm15, %v3218_v61, %v3274_v41 }
 0xcca   :  { %v3347_v43 = vadd.f32 %v5580_v59, %v3291_v25  ;;  %v3405_v59 = vadd.f32 %v3404_v14, %v3403_v31 }
 0xccc   :  { %v3355_v57 = vmax.f32 %v3347_v43, 0.0 }
 0xcce   :  { %v3395_v21 = vmul.f32 %v5609_v44, %v3355_v57  ;;  %v3457_v56 = vmul.f32 %v5619_v17, %v3355_v57  ;;  %v3358_v17 = vmax.f32 %v3350_v62, 0.0 }
 0xcd0   :  { %v3406_v39 = vsel %vm3400_vm0, %v3395_v21, 0.0  ;;  %v3467_v45 = vsel %vm3400_vm0, %v3457_v56, 0.0  ;;  %v3398_v48 = vmul.f32 %v5633_v19, %v3358_v17  ;;  %v3460_v37 = vmul.f32 %v5635_v30, %v3358_v17  ;;  %v3452_v19 = vpop.permute.xlu1 %3451 }
 0xcd1   :  { %v3280_v34 = vpop.xlane.xlu0 %3279  ;;  %v3407_v61 = vadd.f32 %v3406_v39, %v3405_v59  ;;  %v3468_v22 = vadd.f32 %v3467_v45, %v3466_v26 }
 0xcd2   :  { %v3293_v51 = vsel %vm1929_vm15, %v3224_v52, %v3280_v34 }
 0xcd3   :  { %v3349_v44 = vadd.f32 %v5603_v4, %v3293_v51  ;;  %v3409_v8 = vadd.f32 %v3408_v3, %v3407_v61  ;;  %v3470_v20 = vadd.f32 %v3469_v0, %v3468_v22 }
 0xcd5   :  { %v3357_v1 = vmax.f32 %v3349_v44, 0.0 }
 0xcd7   :  { %v3397_v18 = vmul.f32 %v5629_v33, %v3357_v1  ;;  %v3459_v35 = vmul.f32 %v5631_v11, %v3357_v1  ;;  %v3286_v54 = vpop.xlane.xlu0 %3285  ;;  %v3412_v33 = vsel %vm3400_vm0, %v3398_v48, 0.0  ;;  %v3473_v11 = vsel %vm3400_vm0, %v3460_v37, 0.0 }
 0xcd8   :  { %v3295_v6 = vsel %vm1929_vm15, %v5651_v50, %v3286_v54 }
 0xcd9   :  { %v3410_v52 = vsel %vm3400_vm0, %v3397_v18, 0.0  ;;  %v3471_v4 = vsel %vm3400_vm0, %v3459_v35, 0.0  ;;  %v3351_v47 = vadd.f32 %v5627_v15, %v3295_v6 }
 0xcda   :  { %v3411_v23 = vadd.f32 %v3410_v52, %v3409_v8  ;;  %v3472_v55 = vadd.f32 %v3471_v4, %v3470_v20 }
 0xcdb   :  { %v3359_v9 = vmax.f32 %v3351_v47, 0.0 }
 0xcdc   :  { %v3413_v7 = vadd.f32 %v3412_v33, %v3411_v23  ;;  %v3474_v30 = vadd.f32 %v3473_v11, %v3472_v55 }
 0xcdd   :  { %v3399_v13 = vmul.f32 %v5649_v27, %v3359_v9  ;;  %v3461_v63 = vmul.f32 %v3452_v19, %v3359_v9 }
 0xcdf   :  { %v3414_v60 = vsel %vm3400_vm0, %v3399_v13, 0.0  ;;  %v3475_v36 = vsel %vm3400_vm0, %v3461_v63, 0.0  ;;  %v3489_v16 = vpop.permute.xlu0 %3488 }
 0xce0   :  { %v3415_v50 = vadd.f32 %v3414_v60, %v3413_v7  ;;  %v3476_v5 = vadd.f32 %v3475_v36, %v3474_v30 }
 0xce2   :  { %v3416_v24 = vrot.slane %v3415_v50, 4  ;;  %v3477_v53 = vrot.slane %v3476_v5, 4 }
 0xce4   :  { %v3417_v15 = vadd.f32 %v3416_v24, %v3415_v50  ;;  %v3478_v41 = vadd.f32 %v3477_v53, %v3476_v5 }
 0xce6   :  { %v3418_v28 = vrot.slane %v3417_v15, 2  ;;  %v3479_v49 = vrot.slane %v3478_v41, 2 }
 0xce8   :  { %v3419_v25 = vadd.f32 %v3418_v28, %v3417_v15  ;;  %v3480_v58 = vadd.f32 %v3479_v49, %v3478_v41 }
 0xcea   :  { %v3420_v32 = vrot.slane %v3419_v25, 1  ;;  %v3481_v43 = vrot.slane %v3480_v58, 1 }
 0xcec   :  { %v3421_v27 = vadd.f32 %v3420_v32, %v3419_v25  ;;  %v3482_v10 = vadd.f32 %v3481_v43, %v3480_v58 }
 0xcee   :  { %v3484_v2 = vsel %vm3483_vm4, %v3421_v27, %v3482_v10 }
 0xcef   :  { %v3491_v14 = vadd.f32 %v3489_v16, %v3484_v2 }
 0xcf1   :  { %3493 = vst.msk [vmem:[%s5715_s11] sm:$0x3] %vm3492_vm5, %v3491_v14 }
 0xcf2   :  { %3498 = vsyncpa [#allocation11], 1 }

</bundles_post_ra>
